<compile_context>
chip_gen: v7x
topology: tpu7x:2x2x1
jax: 0.10.0
libtpu: 0.0.40
codegen_flags: <defaults>
</compile_context>

<pallas_src>
import math

import numpy as np
import jax
import jax.numpy as jnp
from jax.experimental import pallas as pl
from jax.experimental.pallas import tpu as pltpu

# ----------------------------- config ---------------------------------------
B, L = 2, 16          # batch, seq_len
ENC_IN = 4            # configs.enc_in
D_MODEL = 32          # configs.d_model
N_HEADS = 4           # configs.n_heads
E_LAYERS = 2          # configs.e_layers
D_FF = 64             # configs.d_ff
C_OUT = 4             # configs.c_out
LN_EPS = 1e-5         # torch.nn.LayerNorm default
DH = D_MODEL // N_HEADS
_SCALE = 1.0 / math.sqrt(DH)          # FullAttention: 1/sqrt(E)


def _r8(n):
    return (n + 7) // 8 * 8


# ---------------- packed-parameter slab layout (f32, 128 lanes wide) ---------
_PK_LANES = 128
# per-layer block (row offsets relative to the layer base)
_L_WQKV = 0                        # (D, 3D)   cols [0, 96)
_L_WO   = _L_WQKV + D_MODEL        # (D, D)    cols [0, 32)
_L_W1   = _L_WO + D_MODEL          # (D, Dff)  cols [0, 64)
_L_W2   = _L_W1 + D_MODEL          # (Dff, D)  cols [0, 32)
_L_BIAS = _L_W2 + D_FF             # 8 rows: bqkv, bo, ln1_g, ln1_b, b1, b2, ln2_g, ln2_b
_LAYER_ROWS = _r8(_L_BIAS + 8)     # 168
# tail block
_T_BASE = E_LAYERS * _LAYER_ROWS   # 336
_T_POSB = _T_BASE                  # (B*L, D)      positional emb, already tiled per batch
_T_WTOK = _T_POSB + _r8(B * L)     # (ENC_IN, 3D)  conv taps [W_{l-1} | W_l | W_{l+1}]
_T_ROLL = _T_WTOK + _r8(ENC_IN)    # (B*L, 2*B*L)  cols [0,32)=P_roll(+1), [32,64)=P_roll(-1)
_T_LNF  = _T_ROLL + _r8(B * L)     # row +0 lnf_g, +1 lnf_b, +2 bp
_T_WP   = _T_LNF + 8               # (D, C_OUT)
_TOTAL_ROWS = _r8(_T_WP + D_MODEL)  # 448


# --------------------------- in-kernel helpers -------------------------------
def _layernorm(x, g, b):
    mu = jnp.mean(x, axis=-1, keepdims=True)
    xc = x - mu
    var = jnp.mean(xc * xc, axis=-1, keepdims=True)
    return xc * jax.lax.rsqrt(var + LN_EPS) * g + b


# ------------------------------ fused kernel ---------------------------------
def fused_transformer_kernel(x_ref, p_ref, o_ref, ctx_ref):
    # ---- DataEmbedding: circular Conv1d (k=3, no bias) + positional emb.
    #      Circular shift expressed as permutation matmuls (no lane shuffles).
    wtok = p_ref[_T_WTOK:_T_WTOK + ENC_IN, 0:3 * D_MODEL]          # (Cin, 3D)
    posb = p_ref[_T_POSB:_T_POSB + B * L, 0:D_MODEL]               # (B*L, D)
    p_m1 = p_ref[_T_ROLL:_T_ROLL + B * L, 0:B * L]                 # roll(+1) perm
    p_p1 = p_ref[_T_ROLL:_T_ROLL + B * L, B * L:2 * B * L]         # roll(-1) perm

    t = jnp.dot(x_ref[...], wtok, preferred_element_type=jnp.float32)   # (B*L, 3D)
    x = (jnp.dot(p_m1, t[:, 0:D_MODEL], preferred_element_type=jnp.float32)
         + t[:, D_MODEL:2 * D_MODEL]
         + jnp.dot(p_p1, t[:, 2 * D_MODEL:3 * D_MODEL],
                   preferred_element_type=jnp.float32)
         + posb)

    for layer in range(E_LAYERS):                       # static unroll
        base = layer * _LAYER_ROWS
        wqkv = p_ref[base + _L_WQKV:base + _L_WQKV + D_MODEL, 0:3 * D_MODEL]
        wo   = p_ref[base + _L_WO:base + _L_WO + D_MODEL, 0:D_MODEL]
        w1   = p_ref[base + _L_W1:base + _L_W1 + D_MODEL, 0:D_FF]
        w2   = p_ref[base + _L_W2:base + _L_W2 + D_FF, 0:D_MODEL]
        bb = base + _L_BIAS
        bqkv = p_ref[bb + 0:bb + 1, 0:3 * D_MODEL]
        bo   = p_ref[bb + 1:bb + 2, 0:D_MODEL]
        ln1g = p_ref[bb + 2:bb + 3, 0:D_MODEL]
        ln1b = p_ref[bb + 3:bb + 4, 0:D_MODEL]
        b1   = p_ref[bb + 4:bb + 5, 0:D_FF]
        b2   = p_ref[bb + 5:bb + 6, 0:D_MODEL]
        ln2g = p_ref[bb + 6:bb + 7, 0:D_MODEL]
        ln2b = p_ref[bb + 7:bb + 8, 0:D_MODEL]

        # ---- fused QKV projection: ONE (B*L, D) @ (D, 3D) matmul
        qkv = jnp.dot(x, wqkv, preferred_element_type=jnp.float32) + bqkv

        # ---- scores for every (batch, head); softmax batched over all of them
        scores = []
        vals = []
        for b in range(B):                              # static unroll
            r0 = b * L
            for h in range(N_HEADS):                    # static unroll
                c = h * DH
                q = qkv[r0:r0 + L, c:c + DH]
                k = qkv[r0:r0 + L, D_MODEL + c:D_MODEL + c + DH]
                v = qkv[r0:r0 + L, 2 * D_MODEL + c:2 * D_MODEL + c + DH]
                s = jax.lax.dot_general(q, k, (((1,), (1,)), ((), ())),
                                        preferred_element_type=jnp.float32)
                scores.append(s * _SCALE)
                vals.append(v)

        s_all = jnp.concatenate(scores, axis=0)                   # (B*H*L, L)
        s_all = s_all - jnp.max(s_all, axis=-1, keepdims=True)
        p_all = jnp.exp(s_all)
        denom = jnp.sum(p_all, axis=-1, keepdims=True)
        r = pl.reciprocal(denom, approx=True)
        r = r * (2.0 - denom * r)                                 # one Newton step
        p_all = p_all * r

        # ---- per-head context into a (B*L, D) VMEM slab, then ONE out-proj matmul
        for b in range(B):
            for h in range(N_HEADS):
                idx = b * N_HEADS + h
                ph = p_all[idx * L:(idx + 1) * L, :]
                oh = jnp.dot(ph, vals[idx], preferred_element_type=jnp.float32)
                ctx_ref[b * L:(b + 1) * L, h * DH:(h + 1) * DH] = oh
        attn = jnp.dot(ctx_ref[...], wo, preferred_element_type=jnp.float32) + bo

        # ---- feed-forward (Conv1d k=1 == Linear) with residuals + LayerNorms
        x1 = _layernorm(x + attn, ln1g, ln1b)                     # norm1
        y = jnp.dot(x1, w1, preferred_element_type=jnp.float32) + b1
        y = jnp.maximum(y, 0.0)                                   # relu
        y = jnp.dot(y, w2, preferred_element_type=jnp.float32) + b2
        x = _layernorm(x1 + y, ln2g, ln2b)                        # norm2

    # ---- Encoder final LayerNorm + projection Linear(d_model, c_out)
    lnfg = p_ref[_T_LNF + 0:_T_LNF + 1, 0:D_MODEL]
    lnfb = p_ref[_T_LNF + 1:_T_LNF + 2, 0:D_MODEL]
    bp   = p_ref[_T_LNF + 2:_T_LNF + 3, 0:C_OUT]
    wp   = p_ref[_T_WP:_T_WP + D_MODEL, 0:C_OUT]

    xf = _layernorm(x, lnfg, lnfb)
    o_ref[...] = jnp.dot(xf, wp, preferred_element_type=jnp.float32) + bp


# ------------------------------ wrappers --------------------------------------
def _roll_perms():
    """Per-batch circular row-shift permutation matrices (roll +1 / roll -1)."""
    n = B * L
    p1 = np.zeros((n, n), np.float32)
    p2 = np.zeros((n, n), np.float32)
    for b in range(B):
        for i in range(L):
            r = b * L + i
            p1[r, b * L + (i - 1) % L] = 1.0     # xm1[i] = x[i-1]
            p2[r, b * L + (i + 1) % L] = 1.0     # xp1[i] = x[i+1]
    return jnp.asarray(p1), jnp.asarray(p2)


def pack_params(params):
    """One-time (outside jit) repack of all weights into a single (448,128) slab."""
    buf = jnp.zeros((_TOTAL_ROWS, _PK_LANES), jnp.float32)
    for i, lp in enumerate(params["layers"]):
        base = i * _LAYER_ROWS
        wqkv = jnp.concatenate([lp["wq"], lp["wk"], lp["wv"]], axis=1)
        bqkv = jnp.concatenate([lp["bq"], lp["bk"], lp["bv"]], axis=1)
        buf = buf.at[base + _L_WQKV:base + _L_WQKV + D_MODEL, 0:3 * D_MODEL].set(wqkv)
        buf = buf.at[base + _L_WO:base + _L_WO + D_MODEL, 0:D_MODEL].set(lp["wo"])
        buf = buf.at[base + _L_W1:base + _L_W1 + D_MODEL, 0:D_FF].set(lp["w1"])
        buf = buf.at[base + _L_W2:base + _L_W2 + D_FF, 0:D_MODEL].set(lp["w2"])
        bb = base + _L_BIAS
        buf = buf.at[bb + 0, 0:3 * D_MODEL].set(bqkv[0])
        buf = buf.at[bb + 1, 0:D_MODEL].set(lp["bo"][0])
        buf = buf.at[bb + 2, 0:D_MODEL].set(lp["ln1_g"][0])
        buf = buf.at[bb + 3, 0:D_MODEL].set(lp["ln1_b"][0])
        buf = buf.at[bb + 4, 0:D_FF].set(lp["b1"][0])
        buf = buf.at[bb + 5, 0:D_MODEL].set(lp["b2"][0])
        buf = buf.at[bb + 6, 0:D_MODEL].set(lp["ln2_g"][0])
        buf = buf.at[bb + 7, 0:D_MODEL].set(lp["ln2_b"][0])

    p1, p2 = _roll_perms()
    buf = buf.at[_T_POSB:_T_POSB + B * L, 0:D_MODEL].set(jnp.tile(params["pos"], (B, 1)))
    buf = buf.at[_T_WTOK:_T_WTOK + ENC_IN, 0:3 * D_MODEL].set(
        jnp.concatenate(params["tok_w"], axis=1))
    buf = buf.at[_T_ROLL:_T_ROLL + B * L, 0:B * L].set(p1)
    buf = buf.at[_T_ROLL:_T_ROLL + B * L, B * L:2 * B * L].set(p2)
    buf = buf.at[_T_LNF + 0, 0:D_MODEL].set(params["lnf_g"][0])
    buf = buf.at[_T_LNF + 1, 0:D_MODEL].set(params["lnf_b"][0])
    buf = buf.at[_T_LNF + 2, 0:C_OUT].set(params["bp"][0])
    buf = buf.at[_T_WP:_T_WP + D_MODEL, 0:C_OUT].set(params["wp"])
    return buf


@jax.jit
def transformer_forward(x_enc, packed):
    # Model.forward -> anomaly_detection (x_mark_enc / x_dec / x_mark_dec unused)
    x_flat = x_enc.reshape(B * L, ENC_IN)          # free (row-major) reshape
    out_flat = pl.pallas_call(
        fused_transformer_kernel,
        out_shape=jax.ShapeDtypeStruct((B * L, C_OUT), jnp.float32),
        scratch_shapes=[pltpu.VMEM((B * L, D_MODEL), jnp.float32)],
    )(x_flat, packed)
    return out_flat.reshape(B, L, C_OUT)


# --------------------------- parameter init -----------------------------------
def init_params(key):
    keys = iter(jax.random.split(key, 128))

    def rnd(shape, scale=0.05):
        return scale * jax.random.normal(next(keys), shape, dtype=jnp.float32)

    params = {}
    # TokenEmbedding conv taps: W_k[c, d] == conv.weight[d, c, k], k = 0,1,2
    params["tok_w"] = [rnd((ENC_IN, D_MODEL)) for _ in range(3)]

    # Positional embedding (sinusoidal), pe[:, :L]
    pos = jnp.arange(L, dtype=jnp.float32)[:, None]
    div = jnp.exp(jnp.arange(0, D_MODEL, 2, dtype=jnp.float32)
                  * (-math.log(10000.0) / D_MODEL))
    pe = jnp.zeros((L, D_MODEL), dtype=jnp.float32)
    pe = pe.at[:, 0::2].set(jnp.sin(pos * div))
    pe = pe.at[:, 1::2].set(jnp.cos(pos * div))
    params["pos"] = pe

    layers = []
    for _ in range(E_LAYERS):
        layers.append(dict(
            wq=rnd((D_MODEL, D_MODEL)), bq=rnd((1, D_MODEL)),
            wk=rnd((D_MODEL, D_MODEL)), bk=rnd((1, D_MODEL)),
            wv=rnd((D_MODEL, D_MODEL)), bv=rnd((1, D_MODEL)),
            wo=rnd((D_MODEL, D_MODEL)), bo=rnd((1, D_MODEL)),
            ln1_g=1.0 + rnd((1, D_MODEL)), ln1_b=rnd((1, D_MODEL)),
            w1=rnd((D_MODEL, D_FF)), b1=rnd((1, D_FF)),
            w2=rnd((D_FF, D_MODEL)), b2=rnd((1, D_MODEL)),
            ln2_g=1.0 + rnd((1, D_MODEL)), ln2_b=rnd((1, D_MODEL)),
        ))
    params["layers"] = layers
    params["lnf_g"] = 1.0 + rnd((1, D_MODEL))
    params["lnf_b"] = rnd((1, D_MODEL))
    params["wp"] = rnd((D_MODEL, C_OUT))
    params["bp"] = rnd((1, C_OUT))
    return params


# ----------------------------- pure-JAX reference ------------------------------
def reference_forward(x, params):
    with jax.default_matmul_precision("highest"):
        def ln(v, g, b):
            mu = jnp.mean(v, axis=-1, keepdims=True)
            vc = v - mu
            var = jnp.mean(vc * vc, axis=-1, keepdims=True)
            return vc / jnp.sqrt(var + LN_EPS) * g + b

        xm1 = jnp.roll(x, 1, axis=1)
        xp1 = jnp.roll(x, -1, axis=1)
        h = (xm1 @ params["tok_w"][0] + x @ params["tok_w"][1]
             + xp1 @ params["tok_w"][2] + params["pos"][None])

        bsz, seq, d_model = h.shape
        dh = d_model // N_HEADS
        for lp in params["layers"]:
            q = (h @ lp["wq"] + lp["bq"]).reshape(bsz, seq, N_HEADS, dh)
            k = (h @ lp["wk"] + lp["bk"]).reshape(bsz, seq, N_HEADS, dh)
            v = (h @ lp["wv"] + lp["bv"]).reshape(bsz, seq, N_HEADS, dh)
            s = jnp.einsum("blhe,bshe->bhls", q, k) / math.sqrt(dh)
            a = jax.nn.softmax(s, axis=-1)
            o = jnp.einsum("bhls,bshd->blhd", a, v).reshape(bsz, seq, d_model)
            o = o @ lp["wo"] + lp["bo"]
            x1 = ln(h + o, lp["ln1_g"], lp["ln1_b"])
            y = jnp.maximum(x1 @ lp["w1"] + lp["b1"], 0.0) @ lp["w2"] + lp["b2"]
            h = ln(x1 + y, lp["ln2_g"], lp["ln2_b"])
        h = ln(h, params["lnf_g"], params["lnf_b"])
        return h @ params["wp"] + params["bp"]


# ----------------------------------- main --------------------------------------
if __name__ == "__main__":
    key = jax.random.PRNGKey(0)
    k_param, k_x = jax.random.split(key)
    params = init_params(k_param)
    packed = pack_params(params)
    x_enc = jax.random.normal(k_x, (B, L, ENC_IN), dtype=jnp.float32)

    out = transformer_forward(x_enc, packed)
    out = jax.block_until_ready(out)
    assert out.shape == (B, L, C_OUT), out.shape

    ref = reference_forward(x_enc, params)
    if not jnp.allclose(out, ref, rtol=2e-4, atol=2e-4):
        max_err = float(jnp.max(jnp.abs(out - ref)))
        raise AssertionError(f"Pallas output mismatch vs reference, max_err={max_err}")

    print("KERNEL_OK")
</pallas_src>

<mosaic_0001>
module attributes {stable_mosaic.version = 11 : i64} {
  func.func @fused_transformer_kernel(%arg0: memref<32x4xf32, #tpu.memory_space<vmem>>, %arg1: memref<448x128xf32, #tpu.memory_space<vmem>>, %arg2: memref<32x4xf32, #tpu.memory_space<vmem>>, %arg3: memref<32x32xf32, #tpu.memory_space<vmem>>) attributes {dimension_semantics = [], scalar_prefetch = 0 : i64, scratch_operands = 1 : i64, tpu.core_type = #tpu.core_type<tc>} {
    %c368 = arith.constant 368 : index
    %c0 = arith.constant 0 : index
    %0 = vector.load %arg1[%c368, %c0] : memref<448x128xf32, #tpu.memory_space<vmem>>, vector<4x96xf32>
    %c336 = arith.constant 336 : index
    %c0_0 = arith.constant 0 : index
    %1 = vector.load %arg1[%c336, %c0_0] : memref<448x128xf32, #tpu.memory_space<vmem>>, vector<32x32xf32>
    %c376 = arith.constant 376 : index
    %c0_1 = arith.constant 0 : index
    %2 = vector.load %arg1[%c376, %c0_1] : memref<448x128xf32, #tpu.memory_space<vmem>>, vector<32x32xf32>
    %c376_2 = arith.constant 376 : index
    %c32 = arith.constant 32 : index
    %3 = vector.load %arg1[%c376_2, %c32] : memref<448x128xf32, #tpu.memory_space<vmem>>, vector<32x32xf32>
    %c0_3 = arith.constant 0 : index
    %c0_4 = arith.constant 0 : index
    %4 = vector.load %arg0[%c0_3, %c0_4] : memref<32x4xf32, #tpu.memory_space<vmem>>, vector<32x4xf32>
    %cst = arith.constant dense<0.000000e+00> : vector<32x96xf32>
    %5 = tpu.matmul %4, %0, %cst {dimension_numbers = #tpu.dot_dimension_numbers<[1], [0], [0], [1], [0, 0, 1, 1], [], []>} : vector<32x4xf32>, vector<4x96xf32>, vector<32x96xf32> -> vector<32x96xf32>
    %6 = vector.extract_strided_slice %5 {offsets = [0, 0], sizes = [32, 32], strides = [1, 1]} : vector<32x96xf32> to vector<32x32xf32>
    %cst_5 = arith.constant dense<0.000000e+00> : vector<32x32xf32>
    %7 = tpu.matmul %2, %6, %cst_5 {dimension_numbers = #tpu.dot_dimension_numbers<[1], [0], [0], [1], [0, 0, 1, 1], [], []>} : vector<32x32xf32>, vector<32x32xf32>, vector<32x32xf32> -> vector<32x32xf32>
    %8 = vector.extract_strided_slice %5 {offsets = [0, 32], sizes = [32, 32], strides = [1, 1]} : vector<32x96xf32> to vector<32x32xf32>
    %9 = arith.addf %7, %8 : vector<32x32xf32>
    %10 = vector.extract_strided_slice %5 {offsets = [0, 64], sizes = [32, 32], strides = [1, 1]} : vector<32x96xf32> to vector<32x32xf32>
    %cst_6 = arith.constant dense<0.000000e+00> : vector<32x32xf32>
    %11 = tpu.matmul %3, %10, %cst_6 {dimension_numbers = #tpu.dot_dimension_numbers<[1], [0], [0], [1], [0, 0, 1, 1], [], []>} : vector<32x32xf32>, vector<32x32xf32>, vector<32x32xf32> -> vector<32x32xf32>
    %12 = arith.addf %9, %11 : vector<32x32xf32>
    %13 = arith.addf %12, %1 : vector<32x32xf32>
    %c0_7 = arith.constant 0 : index
    %c0_8 = arith.constant 0 : index
    %14 = vector.load %arg1[%c0_7, %c0_8] : memref<448x128xf32, #tpu.memory_space<vmem>>, vector<32x96xf32>
    %c32_9 = arith.constant 32 : index
    %c0_10 = arith.constant 0 : index
    %15 = vector.load %arg1[%c32_9, %c0_10] : memref<448x128xf32, #tpu.memory_space<vmem>>, vector<32x32xf32>
    %c64 = arith.constant 64 : index
    %c0_11 = arith.constant 0 : index
    %16 = vector.load %arg1[%c64, %c0_11] : memref<448x128xf32, #tpu.memory_space<vmem>>, vector<32x64xf32>
    %c96 = arith.constant 96 : index
    %c0_12 = arith.constant 0 : index
    %17 = vector.load %arg1[%c96, %c0_12] : memref<448x128xf32, #tpu.memory_space<vmem>>, vector<64x32xf32>
    %c160 = arith.constant 160 : index
    %c0_13 = arith.constant 0 : index
    %18 = vector.load %arg1[%c160, %c0_13] : memref<448x128xf32, #tpu.memory_space<vmem>>, vector<1x96xf32>
    %c161 = arith.constant 161 : index
    %c0_14 = arith.constant 0 : index
    %19 = vector.load %arg1[%c161, %c0_14] : memref<448x128xf32, #tpu.memory_space<vmem>>, vector<1x32xf32>
    %c162 = arith.constant 162 : index
    %c0_15 = arith.constant 0 : index
    %20 = vector.load %arg1[%c162, %c0_15] : memref<448x128xf32, #tpu.memory_space<vmem>>, vector<1x32xf32>
    %c163 = arith.constant 163 : index
    %c0_16 = arith.constant 0 : index
    %21 = vector.load %arg1[%c163, %c0_16] : memref<448x128xf32, #tpu.memory_space<vmem>>, vector<1x32xf32>
    %c164 = arith.constant 164 : index
    %c0_17 = arith.constant 0 : index
    %22 = vector.load %arg1[%c164, %c0_17] : memref<448x128xf32, #tpu.memory_space<vmem>>, vector<1x64xf32>
    %c165 = arith.constant 165 : index
    %c0_18 = arith.constant 0 : index
    %23 = vector.load %arg1[%c165, %c0_18] : memref<448x128xf32, #tpu.memory_space<vmem>>, vector<1x32xf32>
    %c166 = arith.constant 166 : index
    %c0_19 = arith.constant 0 : index
    %24 = vector.load %arg1[%c166, %c0_19] : memref<448x128xf32, #tpu.memory_space<vmem>>, vector<1x32xf32>
    %c167 = arith.constant 167 : index
    %c0_20 = arith.constant 0 : index
    %25 = vector.load %arg1[%c167, %c0_20] : memref<448x128xf32, #tpu.memory_space<vmem>>, vector<1x32xf32>
    %cst_21 = arith.constant dense<0.000000e+00> : vector<32x96xf32>
    %26 = tpu.matmul %13, %14, %cst_21 {dimension_numbers = #tpu.dot_dimension_numbers<[1], [0], [0], [1], [0, 0, 1, 1], [], []>} : vector<32x32xf32>, vector<32x96xf32>, vector<32x96xf32> -> vector<32x96xf32>
    %27 = vector.broadcast %18 : vector<1x96xf32> to vector<32x96xf32>
    %28 = arith.addf %26, %27 : vector<32x96xf32>
    %29 = vector.extract_strided_slice %28 {offsets = [0, 0], sizes = [16, 8], strides = [1, 1]} : vector<32x96xf32> to vector<16x8xf32>
    %30 = vector.extract_strided_slice %28 {offsets = [0, 32], sizes = [16, 8], strides = [1, 1]} : vector<32x96xf32> to vector<16x8xf32>
    %31 = vector.extract_strided_slice %28 {offsets = [0, 64], sizes = [16, 8], strides = [1, 1]} : vector<32x96xf32> to vector<16x8xf32>
    %cst_22 = arith.constant dense<0.000000e+00> : vector<16x16xf32>
    %32 = tpu.matmul %29, %30, %cst_22 {dimension_numbers = #tpu.dot_dimension_numbers<[1], [1], [0], [0], [0, 0, 1, 0], [], []>} : vector<16x8xf32>, vector<16x8xf32>, vector<16x16xf32> -> vector<16x16xf32>
    %cst_23 = arith.constant 0.353553385 : f32
    %33 = vector.broadcast %cst_23 : f32 to vector<16x16xf32>
    %34 = arith.mulf %32, %33 : vector<16x16xf32>
    %35 = vector.extract_strided_slice %28 {offsets = [0, 8], sizes = [16, 8], strides = [1, 1]} : vector<32x96xf32> to vector<16x8xf32>
    %36 = vector.extract_strided_slice %28 {offsets = [0, 40], sizes = [16, 8], strides = [1, 1]} : vector<32x96xf32> to vector<16x8xf32>
    %37 = vector.extract_strided_slice %28 {offsets = [0, 72], sizes = [16, 8], strides = [1, 1]} : vector<32x96xf32> to vector<16x8xf32>
    %cst_24 = arith.constant dense<0.000000e+00> : vector<16x16xf32>
    %38 = tpu.matmul %35, %36, %cst_24 {dimension_numbers = #tpu.dot_dimension_numbers<[1], [1], [0], [0], [0, 0, 1, 0], [], []>} : vector<16x8xf32>, vector<16x8xf32>, vector<16x16xf32> -> vector<16x16xf32>
    %cst_25 = arith.constant 0.353553385 : f32
    %39 = vector.broadcast %cst_25 : f32 to vector<16x16xf32>
    %40 = arith.mulf %38, %39 : vector<16x16xf32>
    %41 = vector.extract_strided_slice %28 {offsets = [0, 16], sizes = [16, 8], strides = [1, 1]} : vector<32x96xf32> to vector<16x8xf32>
    %42 = vector.extract_strided_slice %28 {offsets = [0, 48], sizes = [16, 8], strides = [1, 1]} : vector<32x96xf32> to vector<16x8xf32>
    %43 = vector.extract_strided_slice %28 {offsets = [0, 80], sizes = [16, 8], strides = [1, 1]} : vector<32x96xf32> to vector<16x8xf32>
    %cst_26 = arith.constant dense<0.000000e+00> : vector<16x16xf32>
    %44 = tpu.matmul %41, %42, %cst_26 {dimension_numbers = #tpu.dot_dimension_numbers<[1], [1], [0], [0], [0, 0, 1, 0], [], []>} : vector<16x8xf32>, vector<16x8xf32>, vector<16x16xf32> -> vector<16x16xf32>
    %cst_27 = arith.constant 0.353553385 : f32
    %45 = vector.broadcast %cst_27 : f32 to vector<16x16xf32>
    %46 = arith.mulf %44, %45 : vector<16x16xf32>
    %47 = vector.extract_strided_slice %28 {offsets = [0, 24], sizes = [16, 8], strides = [1, 1]} : vector<32x96xf32> to vector<16x8xf32>
    %48 = vector.extract_strided_slice %28 {offsets = [0, 56], sizes = [16, 8], strides = [1, 1]} : vector<32x96xf32> to vector<16x8xf32>
    %49 = vector.extract_strided_slice %28 {offsets = [0, 88], sizes = [16, 8], strides = [1, 1]} : vector<32x96xf32> to vector<16x8xf32>
    %cst_28 = arith.constant dense<0.000000e+00> : vector<16x16xf32>
    %50 = tpu.matmul %47, %48, %cst_28 {dimension_numbers = #tpu.dot_dimension_numbers<[1], [1], [0], [0], [0, 0, 1, 0], [], []>} : vector<16x8xf32>, vector<16x8xf32>, vector<16x16xf32> -> vector<16x16xf32>
    %cst_29 = arith.constant 0.353553385 : f32
    %51 = vector.broadcast %cst_29 : f32 to vector<16x16xf32>
    %52 = arith.mulf %50, %51 : vector<16x16xf32>
    %53 = vector.extract_strided_slice %28 {offsets = [16, 0], sizes = [16, 8], strides = [1, 1]} : vector<32x96xf32> to vector<16x8xf32>
    %54 = vector.extract_strided_slice %28 {offsets = [16, 32], sizes = [16, 8], strides = [1, 1]} : vector<32x96xf32> to vector<16x8xf32>
    %55 = vector.extract_strided_slice %28 {offsets = [16, 64], sizes = [16, 8], strides = [1, 1]} : vector<32x96xf32> to vector<16x8xf32>
    %cst_30 = arith.constant dense<0.000000e+00> : vector<16x16xf32>
    %56 = tpu.matmul %53, %54, %cst_30 {dimension_numbers = #tpu.dot_dimension_numbers<[1], [1], [0], [0], [0, 0, 1, 0], [], []>} : vector<16x8xf32>, vector<16x8xf32>, vector<16x16xf32> -> vector<16x16xf32>
    %cst_31 = arith.constant 0.353553385 : f32
    %57 = vector.broadcast %cst_31 : f32 to vector<16x16xf32>
    %58 = arith.mulf %56, %57 : vector<16x16xf32>
    %59 = vector.extract_strided_slice %28 {offsets = [16, 8], sizes = [16, 8], strides = [1, 1]} : vector<32x96xf32> to vector<16x8xf32>
    %60 = vector.extract_strided_slice %28 {offsets = [16, 40], sizes = [16, 8], strides = [1, 1]} : vector<32x96xf32> to vector<16x8xf32>
    %61 = vector.extract_strided_slice %28 {offsets = [16, 72], sizes = [16, 8], strides = [1, 1]} : vector<32x96xf32> to vector<16x8xf32>
    %cst_32 = arith.constant dense<0.000000e+00> : vector<16x16xf32>
    %62 = tpu.matmul %59, %60, %cst_32 {dimension_numbers = #tpu.dot_dimension_numbers<[1], [1], [0], [0], [0, 0, 1, 0], [], []>} : vector<16x8xf32>, vector<16x8xf32>, vector<16x16xf32> -> vector<16x16xf32>
    %cst_33 = arith.constant 0.353553385 : f32
    %63 = vector.broadcast %cst_33 : f32 to vector<16x16xf32>
    %64 = arith.mulf %62, %63 : vector<16x16xf32>
    %65 = vector.extract_strided_slice %28 {offsets = [16, 16], sizes = [16, 8], strides = [1, 1]} : vector<32x96xf32> to vector<16x8xf32>
    %66 = vector.extract_strided_slice %28 {offsets = [16, 48], sizes = [16, 8], strides = [1, 1]} : vector<32x96xf32> to vector<16x8xf32>
    %67 = vector.extract_strided_slice %28 {offsets = [16, 80], sizes = [16, 8], strides = [1, 1]} : vector<32x96xf32> to vector<16x8xf32>
    %cst_34 = arith.constant dense<0.000000e+00> : vector<16x16xf32>
    %68 = tpu.matmul %65, %66, %cst_34 {dimension_numbers = #tpu.dot_dimension_numbers<[1], [1], [0], [0], [0, 0, 1, 0], [], []>} : vector<16x8xf32>, vector<16x8xf32>, vector<16x16xf32> -> vector<16x16xf32>
    %cst_35 = arith.constant 0.353553385 : f32
    %69 = vector.broadcast %cst_35 : f32 to vector<16x16xf32>
    %70 = arith.mulf %68, %69 : vector<16x16xf32>
    %71 = vector.extract_strided_slice %28 {offsets = [16, 24], sizes = [16, 8], strides = [1, 1]} : vector<32x96xf32> to vector<16x8xf32>
    %72 = vector.extract_strided_slice %28 {offsets = [16, 56], sizes = [16, 8], strides = [1, 1]} : vector<32x96xf32> to vector<16x8xf32>
    %73 = vector.extract_strided_slice %28 {offsets = [16, 88], sizes = [16, 8], strides = [1, 1]} : vector<32x96xf32> to vector<16x8xf32>
    %cst_36 = arith.constant dense<0.000000e+00> : vector<16x16xf32>
    %74 = tpu.matmul %71, %72, %cst_36 {dimension_numbers = #tpu.dot_dimension_numbers<[1], [1], [0], [0], [0, 0, 1, 0], [], []>} : vector<16x8xf32>, vector<16x8xf32>, vector<16x16xf32> -> vector<16x16xf32>
    %cst_37 = arith.constant 0.353553385 : f32
    %75 = vector.broadcast %cst_37 : f32 to vector<16x16xf32>
    %76 = arith.mulf %74, %75 : vector<16x16xf32>
    %77 = tpu.concatenate %34, %40, %46, %52, %58, %64, %70, %76 in 0 : vector<16x16xf32>, vector<16x16xf32>, vector<16x16xf32>, vector<16x16xf32>, vector<16x16xf32>, vector<16x16xf32>, vector<16x16xf32>, vector<16x16xf32> -> vector<128x16xf32>
    %cst_38 = arith.constant dense<0xFF800000> : vector<128xf32>
    %78 = vector.multi_reduction <maximumf>, %77, %cst_38 [1] : vector<128x16xf32> to vector<128xf32>
    %79 = vector.shape_cast %78 : vector<128xf32> to vector<128x1xf32>
    %80 = vector.broadcast %79 : vector<128x1xf32> to vector<128x16xf32>
    %81 = arith.subf %77, %80 : vector<128x16xf32>
    %82 = math.exp %81 : vector<128x16xf32>
    %cst_39 = arith.constant dense<0.000000e+00> : vector<128xf32>
    %83 = vector.multi_reduction <add>, %82, %cst_39 [1] : vector<128x16xf32> to vector<128xf32>
    %84 = vector.shape_cast %83 : vector<128xf32> to vector<128x1xf32>
    %85 = tpu.reciprocal %84 {approx = true} : vector<128x1xf32> -> vector<128x1xf32>
    %86 = arith.mulf %84, %85 : vector<128x1xf32>
    %cst_40 = arith.constant 2.000000e+00 : f32
    %87 = vector.broadcast %cst_40 : f32 to vector<128x1xf32>
    %88 = arith.subf %87, %86 : vector<128x1xf32>
    %89 = arith.mulf %85, %88 : vector<128x1xf32>
    %90 = vector.broadcast %89 : vector<128x1xf32> to vector<128x16xf32>
    %91 = arith.mulf %82, %90 : vector<128x16xf32>
    %92 = vector.extract_strided_slice %91 {offsets = [0, 0], sizes = [16, 16], strides = [1, 1]} : vector<128x16xf32> to vector<16x16xf32>
    %cst_41 = arith.constant dense<0.000000e+00> : vector<16x8xf32>
    %93 = tpu.matmul %92, %31, %cst_41 {dimension_numbers = #tpu.dot_dimension_numbers<[1], [0], [0], [1], [0, 0, 1, 1], [], []>} : vector<16x16xf32>, vector<16x8xf32>, vector<16x8xf32> -> vector<16x8xf32>
    %c0_42 = arith.constant 0 : index
    %c0_43 = arith.constant 0 : index
    %94 = vector.load %arg3[%c0_42, %c0_43] : memref<32x32xf32, #tpu.memory_space<vmem>>, vector<16x8xf32>
    tpu.vector_store %arg3[%c0_42, %c0_43], %93 {strides = array<i32>} : memref<32x32xf32, #tpu.memory_space<vmem>>, vector<16x8xf32>,
    %95 = vector.extract_strided_slice %91 {offsets = [16, 0], sizes = [16, 16], strides = [1, 1]} : vector<128x16xf32> to vector<16x16xf32>
    %cst_44 = arith.constant dense<0.000000e+00> : vector<16x8xf32>
    %96 = tpu.matmul %95, %37, %cst_44 {dimension_numbers = #tpu.dot_dimension_numbers<[1], [0], [0], [1], [0, 0, 1, 1], [], []>} : vector<16x16xf32>, vector<16x8xf32>, vector<16x8xf32> -> vector<16x8xf32>
    %c0_45 = arith.constant 0 : index
    %c8 = arith.constant 8 : index
    %97 = vector.load %arg3[%c0_45, %c8] : memref<32x32xf32, #tpu.memory_space<vmem>>, vector<16x8xf32>
    tpu.vector_store %arg3[%c0_45, %c8], %96 {strides = array<i32>} : memref<32x32xf32, #tpu.memory_space<vmem>>, vector<16x8xf32>,
    %98 = vector.extract_strided_slice %91 {offsets = [32, 0], sizes = [16, 16], strides = [1, 1]} : vector<128x16xf32> to vector<16x16xf32>
    %cst_46 = arith.constant dense<0.000000e+00> : vector<16x8xf32>
    %99 = tpu.matmul %98, %43, %cst_46 {dimension_numbers = #tpu.dot_dimension_numbers<[1], [0], [0], [1], [0, 0, 1, 1], [], []>} : vector<16x16xf32>, vector<16x8xf32>, vector<16x8xf32> -> vector<16x8xf32>
    %c0_47 = arith.constant 0 : index
    %c16 = arith.constant 16 : index
    %100 = vector.load %arg3[%c0_47, %c16] : memref<32x32xf32, #tpu.memory_space<vmem>>, vector<16x8xf32>
    tpu.vector_store %arg3[%c0_47, %c16], %99 {strides = array<i32>} : memref<32x32xf32, #tpu.memory_space<vmem>>, vector<16x8xf32>,
    %101 = vector.extract_strided_slice %91 {offsets = [48, 0], sizes = [16, 16], strides = [1, 1]} : vector<128x16xf32> to vector<16x16xf32>
    %cst_48 = arith.constant dense<0.000000e+00> : vector<16x8xf32>
    %102 = tpu.matmul %101, %49, %cst_48 {dimension_numbers = #tpu.dot_dimension_numbers<[1], [0], [0], [1], [0, 0, 1, 1], [], []>} : vector<16x16xf32>, vector<16x8xf32>, vector<16x8xf32> -> vector<16x8xf32>
    %c0_49 = arith.constant 0 : index
    %c24 = arith.constant 24 : index
    %103 = vector.load %arg3[%c0_49, %c24] : memref<32x32xf32, #tpu.memory_space<vmem>>, vector<16x8xf32>
    tpu.vector_store %arg3[%c0_49, %c24], %102 {strides = array<i32>} : memref<32x32xf32, #tpu.memory_space<vmem>>, vector<16x8xf32>,
    %104 = vector.extract_strided_slice %91 {offsets = [64, 0], sizes = [16, 16], strides = [1, 1]} : vector<128x16xf32> to vector<16x16xf32>
    %cst_50 = arith.constant dense<0.000000e+00> : vector<16x8xf32>
    %105 = tpu.matmul %104, %55, %cst_50 {dimension_numbers = #tpu.dot_dimension_numbers<[1], [0], [0], [1], [0, 0, 1, 1], [], []>} : vector<16x16xf32>, vector<16x8xf32>, vector<16x8xf32> -> vector<16x8xf32>
    %c16_51 = arith.constant 16 : index
    %c0_52 = arith.constant 0 : index
    %106 = vector.load %arg3[%c16_51, %c0_52] : memref<32x32xf32, #tpu.memory_space<vmem>>, vector<16x8xf32>
    tpu.vector_store %arg3[%c16_51, %c0_52], %105 {strides = array<i32>} : memref<32x32xf32, #tpu.memory_space<vmem>>, vector<16x8xf32>,
    %107 = vector.extract_strided_slice %91 {offsets = [80, 0], sizes = [16, 16], strides = [1, 1]} : vector<128x16xf32> to vector<16x16xf32>
    %cst_53 = arith.constant dense<0.000000e+00> : vector<16x8xf32>
    %108 = tpu.matmul %107, %61, %cst_53 {dimension_numbers = #tpu.dot_dimension_numbers<[1], [0], [0], [1], [0, 0, 1, 1], [], []>} : vector<16x16xf32>, vector<16x8xf32>, vector<16x8xf32> -> vector<16x8xf32>
    %c16_54 = arith.constant 16 : index
    %c8_55 = arith.constant 8 : index
    %109 = vector.load %arg3[%c16_54, %c8_55] : memref<32x32xf32, #tpu.memory_space<vmem>>, vector<16x8xf32>
    tpu.vector_store %arg3[%c16_54, %c8_55], %108 {strides = array<i32>} : memref<32x32xf32, #tpu.memory_space<vmem>>, vector<16x8xf32>,
    %110 = vector.extract_strided_slice %91 {offsets = [96, 0], sizes = [16, 16], strides = [1, 1]} : vector<128x16xf32> to vector<16x16xf32>
    %cst_56 = arith.constant dense<0.000000e+00> : vector<16x8xf32>
    %111 = tpu.matmul %110, %67, %cst_56 {dimension_numbers = #tpu.dot_dimension_numbers<[1], [0], [0], [1], [0, 0, 1, 1], [], []>} : vector<16x16xf32>, vector<16x8xf32>, vector<16x8xf32> -> vector<16x8xf32>
    %c16_57 = arith.constant 16 : index
    %c16_58 = arith.constant 16 : index
    %112 = vector.load %arg3[%c16_57, %c16_58] : memref<32x32xf32, #tpu.memory_space<vmem>>, vector<16x8xf32>
    tpu.vector_store %arg3[%c16_57, %c16_58], %111 {strides = array<i32>} : memref<32x32xf32, #tpu.memory_space<vmem>>, vector<16x8xf32>,
    %113 = vector.extract_strided_slice %91 {offsets = [112, 0], sizes = [16, 16], strides = [1, 1]} : vector<128x16xf32> to vector<16x16xf32>
    %cst_59 = arith.constant dense<0.000000e+00> : vector<16x8xf32>
    %114 = tpu.matmul %113, %73, %cst_59 {dimension_numbers = #tpu.dot_dimension_numbers<[1], [0], [0], [1], [0, 0, 1, 1], [], []>} : vector<16x16xf32>, vector<16x8xf32>, vector<16x8xf32> -> vector<16x8xf32>
    %c16_60 = arith.constant 16 : index
    %c24_61 = arith.constant 24 : index
    %115 = vector.load %arg3[%c16_60, %c24_61] : memref<32x32xf32, #tpu.memory_space<vmem>>, vector<16x8xf32>
    tpu.vector_store %arg3[%c16_60, %c24_61], %114 {strides = array<i32>} : memref<32x32xf32, #tpu.memory_space<vmem>>, vector<16x8xf32>,
    %c0_62 = arith.constant 0 : index
    %c0_63 = arith.constant 0 : index
    %116 = vector.load %arg3[%c0_62, %c0_63] : memref<32x32xf32, #tpu.memory_space<vmem>>, vector<32x32xf32>
    %cst_64 = arith.constant dense<0.000000e+00> : vector<32x32xf32>
    %117 = tpu.matmul %116, %15, %cst_64 {dimension_numbers = #tpu.dot_dimension_numbers<[1], [0], [0], [1], [0, 0, 1, 1], [], []>} : vector<32x32xf32>, vector<32x32xf32>, vector<32x32xf32> -> vector<32x32xf32>
    %118 = vector.broadcast %19 : vector<1x32xf32> to vector<32x32xf32>
    %119 = arith.addf %117, %118 : vector<32x32xf32>
    %120 = arith.addf %13, %119 : vector<32x32xf32>
    %cst_65 = arith.constant dense<0.000000e+00> : vector<32xf32>
    %121 = vector.multi_reduction <add>, %120, %cst_65 [1] : vector<32x32xf32> to vector<32xf32>
    %122 = vector.shape_cast %121 : vector<32xf32> to vector<32x1xf32>
    %cst_66 = arith.constant 3.200000e+01 : f32
    %123 = vector.broadcast %cst_66 : f32 to vector<32x1xf32>
    %124 = arith.divf %122, %123 : vector<32x1xf32>
    %125 = vector.broadcast %124 : vector<32x1xf32> to vector<32x32xf32>
    %126 = arith.subf %120, %125 : vector<32x32xf32>
    %127 = arith.mulf %126, %126 : vector<32x32xf32>
    %cst_67 = arith.constant dense<0.000000e+00> : vector<32xf32>
    %128 = vector.multi_reduction <add>, %127, %cst_67 [1] : vector<32x32xf32> to vector<32xf32>
    %129 = vector.shape_cast %128 : vector<32xf32> to vector<32x1xf32>
    %cst_68 = arith.constant 3.200000e+01 : f32
    %130 = vector.broadcast %cst_68 : f32 to vector<32x1xf32>
    %131 = arith.divf %129, %130 : vector<32x1xf32>
    %cst_69 = arith.constant 9.99999974E-6 : f32
    %132 = vector.broadcast %cst_69 : f32 to vector<32x1xf32>
    %133 = arith.addf %131, %132 : vector<32x1xf32>
    %134 = math.rsqrt %133 : vector<32x1xf32>
    %135 = vector.broadcast %134 : vector<32x1xf32> to vector<32x32xf32>
    %136 = arith.mulf %126, %135 : vector<32x32xf32>
    %137 = vector.broadcast %20 : vector<1x32xf32> to vector<32x32xf32>
    %138 = arith.mulf %136, %137 : vector<32x32xf32>
    %139 = vector.broadcast %21 : vector<1x32xf32> to vector<32x32xf32>
    %140 = arith.addf %138, %139 : vector<32x32xf32>
    %cst_70 = arith.constant dense<0.000000e+00> : vector<32x64xf32>
    %141 = tpu.matmul %140, %16, %cst_70 {dimension_numbers = #tpu.dot_dimension_numbers<[1], [0], [0], [1], [0, 0, 1, 1], [], []>} : vector<32x32xf32>, vector<32x64xf32>, vector<32x64xf32> -> vector<32x64xf32>
    %142 = vector.broadcast %22 : vector<1x64xf32> to vector<32x64xf32>
    %143 = arith.addf %141, %142 : vector<32x64xf32>
    %cst_71 = arith.constant 0.000000e+00 : f32
    %144 = vector.broadcast %cst_71 : f32 to vector<32x64xf32>
    %145 = arith.maximumf %143, %144 : vector<32x64xf32>
    %cst_72 = arith.constant dense<0.000000e+00> : vector<32x32xf32>
    %146 = tpu.matmul %145, %17, %cst_72 {dimension_numbers = #tpu.dot_dimension_numbers<[1], [0], [0], [1], [0, 0, 1, 1], [], []>} : vector<32x64xf32>, vector<64x32xf32>, vector<32x32xf32> -> vector<32x32xf32>
    %147 = vector.broadcast %23 : vector<1x32xf32> to vector<32x32xf32>
    %148 = arith.addf %146, %147 : vector<32x32xf32>
    %149 = arith.addf %140, %148 : vector<32x32xf32>
    %cst_73 = arith.constant dense<0.000000e+00> : vector<32xf32>
    %150 = vector.multi_reduction <add>, %149, %cst_73 [1] : vector<32x32xf32> to vector<32xf32>
    %151 = vector.shape_cast %150 : vector<32xf32> to vector<32x1xf32>
    %cst_74 = arith.constant 3.200000e+01 : f32
    %152 = vector.broadcast %cst_74 : f32 to vector<32x1xf32>
    %153 = arith.divf %151, %152 : vector<32x1xf32>
    %154 = vector.broadcast %153 : vector<32x1xf32> to vector<32x32xf32>
    %155 = arith.subf %149, %154 : vector<32x32xf32>
    %156 = arith.mulf %155, %155 : vector<32x32xf32>
    %cst_75 = arith.constant dense<0.000000e+00> : vector<32xf32>
    %157 = vector.multi_reduction <add>, %156, %cst_75 [1] : vector<32x32xf32> to vector<32xf32>
    %158 = vector.shape_cast %157 : vector<32xf32> to vector<32x1xf32>
    %cst_76 = arith.constant 3.200000e+01 : f32
    %159 = vector.broadcast %cst_76 : f32 to vector<32x1xf32>
    %160 = arith.divf %158, %159 : vector<32x1xf32>
    %cst_77 = arith.constant 9.99999974E-6 : f32
    %161 = vector.broadcast %cst_77 : f32 to vector<32x1xf32>
    %162 = arith.addf %160, %161 : vector<32x1xf32>
    %163 = math.rsqrt %162 : vector<32x1xf32>
    %164 = vector.broadcast %163 : vector<32x1xf32> to vector<32x32xf32>
    %165 = arith.mulf %155, %164 : vector<32x32xf32>
    %166 = vector.broadcast %24 : vector<1x32xf32> to vector<32x32xf32>
    %167 = arith.mulf %165, %166 : vector<32x32xf32>
    %168 = vector.broadcast %25 : vector<1x32xf32> to vector<32x32xf32>
    %169 = arith.addf %167, %168 : vector<32x32xf32>
    %c168 = arith.constant 168 : index
    %c0_78 = arith.constant 0 : index
    %170 = vector.load %arg1[%c168, %c0_78] : memref<448x128xf32, #tpu.memory_space<vmem>>, vector<32x96xf32>
    %c200 = arith.constant 200 : index
    %c0_79 = arith.constant 0 : index
    %171 = vector.load %arg1[%c200, %c0_79] : memref<448x128xf32, #tpu.memory_space<vmem>>, vector<32x32xf32>
    %c232 = arith.constant 232 : index
    %c0_80 = arith.constant 0 : index
    %172 = vector.load %arg1[%c232, %c0_80] : memref<448x128xf32, #tpu.memory_space<vmem>>, vector<32x64xf32>
    %c264 = arith.constant 264 : index
    %c0_81 = arith.constant 0 : index
    %173 = vector.load %arg1[%c264, %c0_81] : memref<448x128xf32, #tpu.memory_space<vmem>>, vector<64x32xf32>
    %c328 = arith.constant 328 : index
    %c0_82 = arith.constant 0 : index
    %174 = vector.load %arg1[%c328, %c0_82] : memref<448x128xf32, #tpu.memory_space<vmem>>, vector<1x96xf32>
    %c329 = arith.constant 329 : index
    %c0_83 = arith.constant 0 : index
    %175 = vector.load %arg1[%c329, %c0_83] : memref<448x128xf32, #tpu.memory_space<vmem>>, vector<1x32xf32>
    %c330 = arith.constant 330 : index
    %c0_84 = arith.constant 0 : index
    %176 = vector.load %arg1[%c330, %c0_84] : memref<448x128xf32, #tpu.memory_space<vmem>>, vector<1x32xf32>
    %c331 = arith.constant 331 : index
    %c0_85 = arith.constant 0 : index
    %177 = vector.load %arg1[%c331, %c0_85] : memref<448x128xf32, #tpu.memory_space<vmem>>, vector<1x32xf32>
    %c332 = arith.constant 332 : index
    %c0_86 = arith.constant 0 : index
    %178 = vector.load %arg1[%c332, %c0_86] : memref<448x128xf32, #tpu.memory_space<vmem>>, vector<1x64xf32>
    %c333 = arith.constant 333 : index
    %c0_87 = arith.constant 0 : index
    %179 = vector.load %arg1[%c333, %c0_87] : memref<448x128xf32, #tpu.memory_space<vmem>>, vector<1x32xf32>
    %c334 = arith.constant 334 : index
    %c0_88 = arith.constant 0 : index
    %180 = vector.load %arg1[%c334, %c0_88] : memref<448x128xf32, #tpu.memory_space<vmem>>, vector<1x32xf32>
    %c335 = arith.constant 335 : index
    %c0_89 = arith.constant 0 : index
    %181 = vector.load %arg1[%c335, %c0_89] : memref<448x128xf32, #tpu.memory_space<vmem>>, vector<1x32xf32>
    %cst_90 = arith.constant dense<0.000000e+00> : vector<32x96xf32>
    %182 = tpu.matmul %169, %170, %cst_90 {dimension_numbers = #tpu.dot_dimension_numbers<[1], [0], [0], [1], [0, 0, 1, 1], [], []>} : vector<32x32xf32>, vector<32x96xf32>, vector<32x96xf32> -> vector<32x96xf32>
    %183 = vector.broadcast %174 : vector<1x96xf32> to vector<32x96xf32>
    %184 = arith.addf %182, %183 : vector<32x96xf32>
    %185 = vector.extract_strided_slice %184 {offsets = [0, 0], sizes = [16, 8], strides = [1, 1]} : vector<32x96xf32> to vector<16x8xf32>
    %186 = vector.extract_strided_slice %184 {offsets = [0, 32], sizes = [16, 8], strides = [1, 1]} : vector<32x96xf32> to vector<16x8xf32>
    %187 = vector.extract_strided_slice %184 {offsets = [0, 64], sizes = [16, 8], strides = [1, 1]} : vector<32x96xf32> to vector<16x8xf32>
    %cst_91 = arith.constant dense<0.000000e+00> : vector<16x16xf32>
    %188 = tpu.matmul %185, %186, %cst_91 {dimension_numbers = #tpu.dot_dimension_numbers<[1], [1], [0], [0], [0, 0, 1, 0], [], []>} : vector<16x8xf32>, vector<16x8xf32>, vector<16x16xf32> -> vector<16x16xf32>
    %cst_92 = arith.constant 0.353553385 : f32
    %189 = vector.broadcast %cst_92 : f32 to vector<16x16xf32>
    %190 = arith.mulf %188, %189 : vector<16x16xf32>
    %191 = vector.extract_strided_slice %184 {offsets = [0, 8], sizes = [16, 8], strides = [1, 1]} : vector<32x96xf32> to vector<16x8xf32>
    %192 = vector.extract_strided_slice %184 {offsets = [0, 40], sizes = [16, 8], strides = [1, 1]} : vector<32x96xf32> to vector<16x8xf32>
    %193 = vector.extract_strided_slice %184 {offsets = [0, 72], sizes = [16, 8], strides = [1, 1]} : vector<32x96xf32> to vector<16x8xf32>
    %cst_93 = arith.constant dense<0.000000e+00> : vector<16x16xf32>
    %194 = tpu.matmul %191, %192, %cst_93 {dimension_numbers = #tpu.dot_dimension_numbers<[1], [1], [0], [0], [0, 0, 1, 0], [], []>} : vector<16x8xf32>, vector<16x8xf32>, vector<16x16xf32> -> vector<16x16xf32>
    %cst_94 = arith.constant 0.353553385 : f32
    %195 = vector.broadcast %cst_94 : f32 to vector<16x16xf32>
    %196 = arith.mulf %194, %195 : vector<16x16xf32>
    %197 = vector.extract_strided_slice %184 {offsets = [0, 16], sizes = [16, 8], strides = [1, 1]} : vector<32x96xf32> to vector<16x8xf32>
    %198 = vector.extract_strided_slice %184 {offsets = [0, 48], sizes = [16, 8], strides = [1, 1]} : vector<32x96xf32> to vector<16x8xf32>
    %199 = vector.extract_strided_slice %184 {offsets = [0, 80], sizes = [16, 8], strides = [1, 1]} : vector<32x96xf32> to vector<16x8xf32>
    %cst_95 = arith.constant dense<0.000000e+00> : vector<16x16xf32>
    %200 = tpu.matmul %197, %198, %cst_95 {dimension_numbers = #tpu.dot_dimension_numbers<[1], [1], [0], [0], [0, 0, 1, 0], [], []>} : vector<16x8xf32>, vector<16x8xf32>, vector<16x16xf32> -> vector<16x16xf32>
    %cst_96 = arith.constant 0.353553385 : f32
    %201 = vector.broadcast %cst_96 : f32 to vector<16x16xf32>
    %202 = arith.mulf %200, %201 : vector<16x16xf32>
    %203 = vector.extract_strided_slice %184 {offsets = [0, 24], sizes = [16, 8], strides = [1, 1]} : vector<32x96xf32> to vector<16x8xf32>
    %204 = vector.extract_strided_slice %184 {offsets = [0, 56], sizes = [16, 8], strides = [1, 1]} : vector<32x96xf32> to vector<16x8xf32>
    %205 = vector.extract_strided_slice %184 {offsets = [0, 88], sizes = [16, 8], strides = [1, 1]} : vector<32x96xf32> to vector<16x8xf32>
    %cst_97 = arith.constant dense<0.000000e+00> : vector<16x16xf32>
    %206 = tpu.matmul %203, %204, %cst_97 {dimension_numbers = #tpu.dot_dimension_numbers<[1], [1], [0], [0], [0, 0, 1, 0], [], []>} : vector<16x8xf32>, vector<16x8xf32>, vector<16x16xf32> -> vector<16x16xf32>
    %cst_98 = arith.constant 0.353553385 : f32
    %207 = vector.broadcast %cst_98 : f32 to vector<16x16xf32>
    %208 = arith.mulf %206, %207 : vector<16x16xf32>
    %209 = vector.extract_strided_slice %184 {offsets = [16, 0], sizes = [16, 8], strides = [1, 1]} : vector<32x96xf32> to vector<16x8xf32>
    %210 = vector.extract_strided_slice %184 {offsets = [16, 32], sizes = [16, 8], strides = [1, 1]} : vector<32x96xf32> to vector<16x8xf32>
    %211 = vector.extract_strided_slice %184 {offsets = [16, 64], sizes = [16, 8], strides = [1, 1]} : vector<32x96xf32> to vector<16x8xf32>
    %cst_99 = arith.constant dense<0.000000e+00> : vector<16x16xf32>
    %212 = tpu.matmul %209, %210, %cst_99 {dimension_numbers = #tpu.dot_dimension_numbers<[1], [1], [0], [0], [0, 0, 1, 0], [], []>} : vector<16x8xf32>, vector<16x8xf32>, vector<16x16xf32> -> vector<16x16xf32>
    %cst_100 = arith.constant 0.353553385 : f32
    %213 = vector.broadcast %cst_100 : f32 to vector<16x16xf32>
    %214 = arith.mulf %212, %213 : vector<16x16xf32>
    %215 = vector.extract_strided_slice %184 {offsets = [16, 8], sizes = [16, 8], strides = [1, 1]} : vector<32x96xf32> to vector<16x8xf32>
    %216 = vector.extract_strided_slice %184 {offsets = [16, 40], sizes = [16, 8], strides = [1, 1]} : vector<32x96xf32> to vector<16x8xf32>
    %217 = vector.extract_strided_slice %184 {offsets = [16, 72], sizes = [16, 8], strides = [1, 1]} : vector<32x96xf32> to vector<16x8xf32>
    %cst_101 = arith.constant dense<0.000000e+00> : vector<16x16xf32>
    %218 = tpu.matmul %215, %216, %cst_101 {dimension_numbers = #tpu.dot_dimension_numbers<[1], [1], [0], [0], [0, 0, 1, 0], [], []>} : vector<16x8xf32>, vector<16x8xf32>, vector<16x16xf32> -> vector<16x16xf32>
    %cst_102 = arith.constant 0.353553385 : f32
    %219 = vector.broadcast %cst_102 : f32 to vector<16x16xf32>
    %220 = arith.mulf %218, %219 : vector<16x16xf32>
    %221 = vector.extract_strided_slice %184 {offsets = [16, 16], sizes = [16, 8], strides = [1, 1]} : vector<32x96xf32> to vector<16x8xf32>
    %222 = vector.extract_strided_slice %184 {offsets = [16, 48], sizes = [16, 8], strides = [1, 1]} : vector<32x96xf32> to vector<16x8xf32>
    %223 = vector.extract_strided_slice %184 {offsets = [16, 80], sizes = [16, 8], strides = [1, 1]} : vector<32x96xf32> to vector<16x8xf32>
    %cst_103 = arith.constant dense<0.000000e+00> : vector<16x16xf32>
    %224 = tpu.matmul %221, %222, %cst_103 {dimension_numbers = #tpu.dot_dimension_numbers<[1], [1], [0], [0], [0, 0, 1, 0], [], []>} : vector<16x8xf32>, vector<16x8xf32>, vector<16x16xf32> -> vector<16x16xf32>
    %cst_104 = arith.constant 0.353553385 : f32
    %225 = vector.broadcast %cst_104 : f32 to vector<16x16xf32>
    %226 = arith.mulf %224, %225 : vector<16x16xf32>
    %227 = vector.extract_strided_slice %184 {offsets = [16, 24], sizes = [16, 8], strides = [1, 1]} : vector<32x96xf32> to vector<16x8xf32>
    %228 = vector.extract_strided_slice %184 {offsets = [16, 56], sizes = [16, 8], strides = [1, 1]} : vector<32x96xf32> to vector<16x8xf32>
    %229 = vector.extract_strided_slice %184 {offsets = [16, 88], sizes = [16, 8], strides = [1, 1]} : vector<32x96xf32> to vector<16x8xf32>
    %cst_105 = arith.constant dense<0.000000e+00> : vector<16x16xf32>
    %230 = tpu.matmul %227, %228, %cst_105 {dimension_numbers = #tpu.dot_dimension_numbers<[1], [1], [0], [0], [0, 0, 1, 0], [], []>} : vector<16x8xf32>, vector<16x8xf32>, vector<16x16xf32> -> vector<16x16xf32>
    %cst_106 = arith.constant 0.353553385 : f32
    %231 = vector.broadcast %cst_106 : f32 to vector<16x16xf32>
    %232 = arith.mulf %230, %231 : vector<16x16xf32>
    %233 = tpu.concatenate %190, %196, %202, %208, %214, %220, %226, %232 in 0 : vector<16x16xf32>, vector<16x16xf32>, vector<16x16xf32>, vector<16x16xf32>, vector<16x16xf32>, vector<16x16xf32>, vector<16x16xf32>, vector<16x16xf32> -> vector<128x16xf32>
    %cst_107 = arith.constant dense<0xFF800000> : vector<128xf32>
    %234 = vector.multi_reduction <maximumf>, %233, %cst_107 [1] : vector<128x16xf32> to vector<128xf32>
    %235 = vector.shape_cast %234 : vector<128xf32> to vector<128x1xf32>
    %236 = vector.broadcast %235 : vector<128x1xf32> to vector<128x16xf32>
    %237 = arith.subf %233, %236 : vector<128x16xf32>
    %238 = math.exp %237 : vector<128x16xf32>
    %cst_108 = arith.constant dense<0.000000e+00> : vector<128xf32>
    %239 = vector.multi_reduction <add>, %238, %cst_108 [1] : vector<128x16xf32> to vector<128xf32>
    %240 = vector.shape_cast %239 : vector<128xf32> to vector<128x1xf32>
    %241 = tpu.reciprocal %240 {approx = true} : vector<128x1xf32> -> vector<128x1xf32>
    %242 = arith.mulf %240, %241 : vector<128x1xf32>
    %cst_109 = arith.constant 2.000000e+00 : f32
    %243 = vector.broadcast %cst_109 : f32 to vector<128x1xf32>
    %244 = arith.subf %243, %242 : vector<128x1xf32>
    %245 = arith.mulf %241, %244 : vector<128x1xf32>
    %246 = vector.broadcast %245 : vector<128x1xf32> to vector<128x16xf32>
    %247 = arith.mulf %238, %246 : vector<128x16xf32>
    %248 = vector.extract_strided_slice %247 {offsets = [0, 0], sizes = [16, 16], strides = [1, 1]} : vector<128x16xf32> to vector<16x16xf32>
    %cst_110 = arith.constant dense<0.000000e+00> : vector<16x8xf32>
    %249 = tpu.matmul %248, %187, %cst_110 {dimension_numbers = #tpu.dot_dimension_numbers<[1], [0], [0], [1], [0, 0, 1, 1], [], []>} : vector<16x16xf32>, vector<16x8xf32>, vector<16x8xf32> -> vector<16x8xf32>
    %c0_111 = arith.constant 0 : index
    %c0_112 = arith.constant 0 : index
    %250 = vector.load %arg3[%c0_111, %c0_112] : memref<32x32xf32, #tpu.memory_space<vmem>>, vector<16x8xf32>
    tpu.vector_store %arg3[%c0_111, %c0_112], %249 {strides = array<i32>} : memref<32x32xf32, #tpu.memory_space<vmem>>, vector<16x8xf32>,
    %251 = vector.extract_strided_slice %247 {offsets = [16, 0], sizes = [16, 16], strides = [1, 1]} : vector<128x16xf32> to vector<16x16xf32>
    %cst_113 = arith.constant dense<0.000000e+00> : vector<16x8xf32>
    %252 = tpu.matmul %251, %193, %cst_113 {dimension_numbers = #tpu.dot_dimension_numbers<[1], [0], [0], [1], [0, 0, 1, 1], [], []>} : vector<16x16xf32>, vector<16x8xf32>, vector<16x8xf32> -> vector<16x8xf32>
    %c0_114 = arith.constant 0 : index
    %c8_115 = arith.constant 8 : index
    %253 = vector.load %arg3[%c0_114, %c8_115] : memref<32x32xf32, #tpu.memory_space<vmem>>, vector<16x8xf32>
    tpu.vector_store %arg3[%c0_114, %c8_115], %252 {strides = array<i32>} : memref<32x32xf32, #tpu.memory_space<vmem>>, vector<16x8xf32>,
    %254 = vector.extract_strided_slice %247 {offsets = [32, 0], sizes = [16, 16], strides = [1, 1]} : vector<128x16xf32> to vector<16x16xf32>
    %cst_116 = arith.constant dense<0.000000e+00> : vector<16x8xf32>
    %255 = tpu.matmul %254, %199, %cst_116 {dimension_numbers = #tpu.dot_dimension_numbers<[1], [0], [0], [1], [0, 0, 1, 1], [], []>} : vector<16x16xf32>, vector<16x8xf32>, vector<16x8xf32> -> vector<16x8xf32>
    %c0_117 = arith.constant 0 : index
    %c16_118 = arith.constant 16 : index
    %256 = vector.load %arg3[%c0_117, %c16_118] : memref<32x32xf32, #tpu.memory_space<vmem>>, vector<16x8xf32>
    tpu.vector_store %arg3[%c0_117, %c16_118], %255 {strides = array<i32>} : memref<32x32xf32, #tpu.memory_space<vmem>>, vector<16x8xf32>,
    %257 = vector.extract_strided_slice %247 {offsets = [48, 0], sizes = [16, 16], strides = [1, 1]} : vector<128x16xf32> to vector<16x16xf32>
    %cst_119 = arith.constant dense<0.000000e+00> : vector<16x8xf32>
    %258 = tpu.matmul %257, %205, %cst_119 {dimension_numbers = #tpu.dot_dimension_numbers<[1], [0], [0], [1], [0, 0, 1, 1], [], []>} : vector<16x16xf32>, vector<16x8xf32>, vector<16x8xf32> -> vector<16x8xf32>
    %c0_120 = arith.constant 0 : index
    %c24_121 = arith.constant 24 : index
    %259 = vector.load %arg3[%c0_120, %c24_121] : memref<32x32xf32, #tpu.memory_space<vmem>>, vector<16x8xf32>
    tpu.vector_store %arg3[%c0_120, %c24_121], %258 {strides = array<i32>} : memref<32x32xf32, #tpu.memory_space<vmem>>, vector<16x8xf32>,
    %260 = vector.extract_strided_slice %247 {offsets = [64, 0], sizes = [16, 16], strides = [1, 1]} : vector<128x16xf32> to vector<16x16xf32>
    %cst_122 = arith.constant dense<0.000000e+00> : vector<16x8xf32>
    %261 = tpu.matmul %260, %211, %cst_122 {dimension_numbers = #tpu.dot_dimension_numbers<[1], [0], [0], [1], [0, 0, 1, 1], [], []>} : vector<16x16xf32>, vector<16x8xf32>, vector<16x8xf32> -> vector<16x8xf32>
    %c16_123 = arith.constant 16 : index
    %c0_124 = arith.constant 0 : index
    %262 = vector.load %arg3[%c16_123, %c0_124] : memref<32x32xf32, #tpu.memory_space<vmem>>, vector<16x8xf32>
    tpu.vector_store %arg3[%c16_123, %c0_124], %261 {strides = array<i32>} : memref<32x32xf32, #tpu.memory_space<vmem>>, vector<16x8xf32>,
    %263 = vector.extract_strided_slice %247 {offsets = [80, 0], sizes = [16, 16], strides = [1, 1]} : vector<128x16xf32> to vector<16x16xf32>
    %cst_125 = arith.constant dense<0.000000e+00> : vector<16x8xf32>
    %264 = tpu.matmul %263, %217, %cst_125 {dimension_numbers = #tpu.dot_dimension_numbers<[1], [0], [0], [1], [0, 0, 1, 1], [], []>} : vector<16x16xf32>, vector<16x8xf32>, vector<16x8xf32> -> vector<16x8xf32>
    %c16_126 = arith.constant 16 : index
    %c8_127 = arith.constant 8 : index
    %265 = vector.load %arg3[%c16_126, %c8_127] : memref<32x32xf32, #tpu.memory_space<vmem>>, vector<16x8xf32>
    tpu.vector_store %arg3[%c16_126, %c8_127], %264 {strides = array<i32>} : memref<32x32xf32, #tpu.memory_space<vmem>>, vector<16x8xf32>,
    %266 = vector.extract_strided_slice %247 {offsets = [96, 0], sizes = [16, 16], strides = [1, 1]} : vector<128x16xf32> to vector<16x16xf32>
    %cst_128 = arith.constant dense<0.000000e+00> : vector<16x8xf32>
    %267 = tpu.matmul %266, %223, %cst_128 {dimension_numbers = #tpu.dot_dimension_numbers<[1], [0], [0], [1], [0, 0, 1, 1], [], []>} : vector<16x16xf32>, vector<16x8xf32>, vector<16x8xf32> -> vector<16x8xf32>
    %c16_129 = arith.constant 16 : index
    %c16_130 = arith.constant 16 : index
    %268 = vector.load %arg3[%c16_129, %c16_130] : memref<32x32xf32, #tpu.memory_space<vmem>>, vector<16x8xf32>
    tpu.vector_store %arg3[%c16_129, %c16_130], %267 {strides = array<i32>} : memref<32x32xf32, #tpu.memory_space<vmem>>, vector<16x8xf32>,
    %269 = vector.extract_strided_slice %247 {offsets = [112, 0], sizes = [16, 16], strides = [1, 1]} : vector<128x16xf32> to vector<16x16xf32>
    %cst_131 = arith.constant dense<0.000000e+00> : vector<16x8xf32>
    %270 = tpu.matmul %269, %229, %cst_131 {dimension_numbers = #tpu.dot_dimension_numbers<[1], [0], [0], [1], [0, 0, 1, 1], [], []>} : vector<16x16xf32>, vector<16x8xf32>, vector<16x8xf32> -> vector<16x8xf32>
    %c16_132 = arith.constant 16 : index
    %c24_133 = arith.constant 24 : index
    %271 = vector.load %arg3[%c16_132, %c24_133] : memref<32x32xf32, #tpu.memory_space<vmem>>, vector<16x8xf32>
    tpu.vector_store %arg3[%c16_132, %c24_133], %270 {strides = array<i32>} : memref<32x32xf32, #tpu.memory_space<vmem>>, vector<16x8xf32>,
    %c0_134 = arith.constant 0 : index
    %c0_135 = arith.constant 0 : index
    %272 = vector.load %arg3[%c0_134, %c0_135] : memref<32x32xf32, #tpu.memory_space<vmem>>, vector<32x32xf32>
    %cst_136 = arith.constant dense<0.000000e+00> : vector<32x32xf32>
    %273 = tpu.matmul %272, %171, %cst_136 {dimension_numbers = #tpu.dot_dimension_numbers<[1], [0], [0], [1], [0, 0, 1, 1], [], []>} : vector<32x32xf32>, vector<32x32xf32>, vector<32x32xf32> -> vector<32x32xf32>
    %274 = vector.broadcast %175 : vector<1x32xf32> to vector<32x32xf32>
    %275 = arith.addf %273, %274 : vector<32x32xf32>
    %276 = arith.addf %169, %275 : vector<32x32xf32>
    %cst_137 = arith.constant dense<0.000000e+00> : vector<32xf32>
    %277 = vector.multi_reduction <add>, %276, %cst_137 [1] : vector<32x32xf32> to vector<32xf32>
    %278 = vector.shape_cast %277 : vector<32xf32> to vector<32x1xf32>
    %cst_138 = arith.constant 3.200000e+01 : f32
    %279 = vector.broadcast %cst_138 : f32 to vector<32x1xf32>
    %280 = arith.divf %278, %279 : vector<32x1xf32>
    %281 = vector.broadcast %280 : vector<32x1xf32> to vector<32x32xf32>
    %282 = arith.subf %276, %281 : vector<32x32xf32>
    %283 = arith.mulf %282, %282 : vector<32x32xf32>
    %cst_139 = arith.constant dense<0.000000e+00> : vector<32xf32>
    %284 = vector.multi_reduction <add>, %283, %cst_139 [1] : vector<32x32xf32> to vector<32xf32>
    %285 = vector.shape_cast %284 : vector<32xf32> to vector<32x1xf32>
    %cst_140 = arith.constant 3.200000e+01 : f32
    %286 = vector.broadcast %cst_140 : f32 to vector<32x1xf32>
    %287 = arith.divf %285, %286 : vector<32x1xf32>
    %cst_141 = arith.constant 9.99999974E-6 : f32
    %288 = vector.broadcast %cst_141 : f32 to vector<32x1xf32>
    %289 = arith.addf %287, %288 : vector<32x1xf32>
    %290 = math.rsqrt %289 : vector<32x1xf32>
    %291 = vector.broadcast %290 : vector<32x1xf32> to vector<32x32xf32>
    %292 = arith.mulf %282, %291 : vector<32x32xf32>
    %293 = vector.broadcast %176 : vector<1x32xf32> to vector<32x32xf32>
    %294 = arith.mulf %292, %293 : vector<32x32xf32>
    %295 = vector.broadcast %177 : vector<1x32xf32> to vector<32x32xf32>
    %296 = arith.addf %294, %295 : vector<32x32xf32>
    %cst_142 = arith.constant dense<0.000000e+00> : vector<32x64xf32>
    %297 = tpu.matmul %296, %172, %cst_142 {dimension_numbers = #tpu.dot_dimension_numbers<[1], [0], [0], [1], [0, 0, 1, 1], [], []>} : vector<32x32xf32>, vector<32x64xf32>, vector<32x64xf32> -> vector<32x64xf32>
    %298 = vector.broadcast %178 : vector<1x64xf32> to vector<32x64xf32>
    %299 = arith.addf %297, %298 : vector<32x64xf32>
    %cst_143 = arith.constant 0.000000e+00 : f32
    %300 = vector.broadcast %cst_143 : f32 to vector<32x64xf32>
    %301 = arith.maximumf %299, %300 : vector<32x64xf32>
    %cst_144 = arith.constant dense<0.000000e+00> : vector<32x32xf32>
    %302 = tpu.matmul %301, %173, %cst_144 {dimension_numbers = #tpu.dot_dimension_numbers<[1], [0], [0], [1], [0, 0, 1, 1], [], []>} : vector<32x64xf32>, vector<64x32xf32>, vector<32x32xf32> -> vector<32x32xf32>
    %303 = vector.broadcast %179 : vector<1x32xf32> to vector<32x32xf32>
    %304 = arith.addf %302, %303 : vector<32x32xf32>
    %305 = arith.addf %296, %304 : vector<32x32xf32>
    %cst_145 = arith.constant dense<0.000000e+00> : vector<32xf32>
    %306 = vector.multi_reduction <add>, %305, %cst_145 [1] : vector<32x32xf32> to vector<32xf32>
    %307 = vector.shape_cast %306 : vector<32xf32> to vector<32x1xf32>
    %cst_146 = arith.constant 3.200000e+01 : f32
    %308 = vector.broadcast %cst_146 : f32 to vector<32x1xf32>
    %309 = arith.divf %307, %308 : vector<32x1xf32>
    %310 = vector.broadcast %309 : vector<32x1xf32> to vector<32x32xf32>
    %311 = arith.subf %305, %310 : vector<32x32xf32>
    %312 = arith.mulf %311, %311 : vector<32x32xf32>
    %cst_147 = arith.constant dense<0.000000e+00> : vector<32xf32>
    %313 = vector.multi_reduction <add>, %312, %cst_147 [1] : vector<32x32xf32> to vector<32xf32>
    %314 = vector.shape_cast %313 : vector<32xf32> to vector<32x1xf32>
    %cst_148 = arith.constant 3.200000e+01 : f32
    %315 = vector.broadcast %cst_148 : f32 to vector<32x1xf32>
    %316 = arith.divf %314, %315 : vector<32x1xf32>
    %cst_149 = arith.constant 9.99999974E-6 : f32
    %317 = vector.broadcast %cst_149 : f32 to vector<32x1xf32>
    %318 = arith.addf %316, %317 : vector<32x1xf32>
    %319 = math.rsqrt %318 : vector<32x1xf32>
    %320 = vector.broadcast %319 : vector<32x1xf32> to vector<32x32xf32>
    %321 = arith.mulf %311, %320 : vector<32x32xf32>
    %322 = vector.broadcast %180 : vector<1x32xf32> to vector<32x32xf32>
    %323 = arith.mulf %321, %322 : vector<32x32xf32>
    %324 = vector.broadcast %181 : vector<1x32xf32> to vector<32x32xf32>
    %325 = arith.addf %323, %324 : vector<32x32xf32>
    %c408 = arith.constant 408 : index
    %c0_150 = arith.constant 0 : index
    %326 = vector.load %arg1[%c408, %c0_150] : memref<448x128xf32, #tpu.memory_space<vmem>>, vector<1x32xf32>
    %c409 = arith.constant 409 : index
    %c0_151 = arith.constant 0 : index
    %327 = vector.load %arg1[%c409, %c0_151] : memref<448x128xf32, #tpu.memory_space<vmem>>, vector<1x32xf32>
    %c410 = arith.constant 410 : index
    %c0_152 = arith.constant 0 : index
    %328 = vector.load %arg1[%c410, %c0_152] : memref<448x128xf32, #tpu.memory_space<vmem>>, vector<1x4xf32>
    %c416 = arith.constant 416 : index
    %c0_153 = arith.constant 0 : index
    %329 = vector.load %arg1[%c416, %c0_153] : memref<448x128xf32, #tpu.memory_space<vmem>>, vector<32x4xf32>
    %cst_154 = arith.constant dense<0.000000e+00> : vector<32xf32>
    %330 = vector.multi_reduction <add>, %325, %cst_154 [1] : vector<32x32xf32> to vector<32xf32>
    %331 = vector.shape_cast %330 : vector<32xf32> to vector<32x1xf32>
    %cst_155 = arith.constant 3.200000e+01 : f32
    %332 = vector.broadcast %cst_155 : f32 to vector<32x1xf32>
    %333 = arith.divf %331, %332 : vector<32x1xf32>
    %334 = vector.broadcast %333 : vector<32x1xf32> to vector<32x32xf32>
    %335 = arith.subf %325, %334 : vector<32x32xf32>
    %336 = arith.mulf %335, %335 : vector<32x32xf32>
    %cst_156 = arith.constant dense<0.000000e+00> : vector<32xf32>
    %337 = vector.multi_reduction <add>, %336, %cst_156 [1] : vector<32x32xf32> to vector<32xf32>
    %338 = vector.shape_cast %337 : vector<32xf32> to vector<32x1xf32>
    %cst_157 = arith.constant 3.200000e+01 : f32
    %339 = vector.broadcast %cst_157 : f32 to vector<32x1xf32>
    %340 = arith.divf %338, %339 : vector<32x1xf32>
    %cst_158 = arith.constant 9.99999974E-6 : f32
    %341 = vector.broadcast %cst_158 : f32 to vector<32x1xf32>
    %342 = arith.addf %340, %341 : vector<32x1xf32>
    %343 = math.rsqrt %342 : vector<32x1xf32>
    %344 = vector.broadcast %343 : vector<32x1xf32> to vector<32x32xf32>
    %345 = arith.mulf %335, %344 : vector<32x32xf32>
    %346 = vector.broadcast %326 : vector<1x32xf32> to vector<32x32xf32>
    %347 = arith.mulf %345, %346 : vector<32x32xf32>
    %348 = vector.broadcast %327 : vector<1x32xf32> to vector<32x32xf32>
    %349 = arith.addf %347, %348 : vector<32x32xf32>
    %cst_159 = arith.constant dense<0.000000e+00> : vector<32x4xf32>
    %350 = tpu.matmul %349, %329, %cst_159 {dimension_numbers = #tpu.dot_dimension_numbers<[1], [0], [0], [1], [0, 0, 1, 1], [], []>} : vector<32x32xf32>, vector<32x4xf32>, vector<32x4xf32> -> vector<32x4xf32>
    %351 = vector.broadcast %328 : vector<1x4xf32> to vector<32x4xf32>
    %352 = arith.addf %350, %351 : vector<32x4xf32>
    %c0_160 = arith.constant 0 : index
    %c0_161 = arith.constant 0 : index
    %353 = vector.load %arg2[%c0_160, %c0_161] : memref<32x4xf32, #tpu.memory_space<vmem>>, vector<32x4xf32>
    tpu.vector_store %arg2[%c0_160, %c0_161], %352 {strides = array<i32>} : memref<32x4xf32, #tpu.memory_space<vmem>>, vector<32x4xf32>,
    return
  }
}

</mosaic_0001>

<bundles_post_ra>
// kernel: transformer_forward.1
= control target key start
LH: loop header
LB: loop body
LE: loop exit
PB: predicated region body
PF: predicated region fallthrough
CT: control target
= control target key end

     0   :  { %7 = vsyncpa [#allocation4], 0  ;;  %s6628_s9 = smov [#allocation3]   ;;  %s7492_s0 = inlined_call_operand.vmem [shape: f32[32,4], index: 0, kind: input, shape index: {}]   ;;  %s7493_s1 = inlined_call_operand.hbm [shape: f32[448,128], index: 1, kind: input, shape index: {}]   ;;  %s7494_s2 = inlined_call_operand.vmem [shape: f32[32,4], index: 2, kind: output, shape index: {}]  }
   0x1   :  { %s15_s10 = sshll.u32 %s6628_s9, 4  ;;  %s6604_s13 = scalar_lea.hbm %s7493_s1, 7168  ;;  %s16_s10 = int_to_ptr.vmem [resolvable:$true] %s15_s10 }
   0x2   :  { %p6605_p0 = scmp.ne.s32.totalorder %s7493_s1, %s6604_s13  ;;  %p6608_p1 = scmp.lt.u32.totalorder %s6604_s13, %s7493_s1 }
   0x4   :  { %p6610_p2 = pnand %p6608_p1, %p6605_p0 }
   0x6   :  { %6613 = shalt.err (!%p6610_p2)
}
   0x7   :  { %s6614_s18 = scalar_lea.vmem %s16_s10, 7168  ;;  %p6619_p4 = scmp.lt.s32.totalorder %s16_s10, %s16_s10 }
   0x8   :  { %p6615_p3 = scmp.ne.s32.totalorder %s16_s10, %s6614_s18  ;;  %p6620_p5 = scmp.lt.s32.totalorder %s6614_s18, %s6614_s18 }
   0xa   :  { %p6621_p6 = por %p6620_p5, %p6619_p4 }
   0xc   :  { %p6622_p7 = pnand %p6621_p6, %p6615_p3 }
   0xe   :  { %6625 = shalt.err (!%p6622_p7)
}
   0xf   :  { %s6629_s19 = smov 128   ;;  %s6630_s20 = smov 8  }
  0x10   :  { %21 = dma.hbm_to_vmem [thread:$0]  %s7493_s1, 7168, %s16_s10, [#allocation4], %s6629_s19, %s6629_s19, %s6630_s20  }
  0x11   :  { %6626 = dma.done.wait [#allocation4], 7168  }
  0x12   :  { %6627 = vsyncadd [#allocation4], 4294960128  ;;  %vm51_vm0 = vcmask 1043456   ;;  %vm38_vm1 = vcmask 31744   ;;  %v25_v0 = vld [vmem:[#allocation3 + $0x170] sm:$0xf] }
  0x13   :  { %v34_v1 = vld [vmem:[%s7492_s0] sm:$0xff]  ;;  %v35_v2 = vld [vmem:[%s7492_s0 + $0x8] sm:$0xff]  ;;  %5576 = vmatprep.subr.msk.mxu0 %vm51_vm0, %v25_v0  ;;  %v36_v3 = vld [vmem:[%s7492_s0 + $0x10] sm:$0xff]  ;;  %s6631_s1 = smov 96   ;;  %vm156_vm2 = vcmask 261120   ;;  %s6632_s3 = smov 64  }
  0x14   :  { %5578 = vmatprep.mubr.msk.f32.mxu0 %vm38_vm1, %v34_v1  ;;  %v30_v4 = vld [vmem:[#allocation3 + $0x178] sm:$0xff]  ;;  %5577 = vmatpush3.msk.msra.mxu0 %vm51_vm0, %v25_v0  ;;  %v31_v5 = vld [vmem:[#allocation3 + $0x180] sm:$0xff]  ;;  %v33_v7 = vld [vmem:[#allocation3 + $0x190] sm:$0xff]  ;;  %vm510_vm3 = vcmask 64512   ;;  %s6634_s4 = smov 120   ;;  %s6635_s5 = smov 80  }
  0x15   :  { %254 = vrot.lane.b32.xlu1 %v30_v4, %s6631_s1  ;;  %5579 = vmatmul.mubr.msk.f32.vlgmr.msra.gmra.mrb[0].mxu0 %vm38_vm1, %v35_v2  ;;  %v37_v6 = vld [vmem:[%s7492_s0 + $0x18] sm:$0xff]  ;;  %v375_v16 = vld [vmem:[#allocation3] sm:$0xff]  ;;  %v376_v17 = vld [vmem:[#allocation3 + $0x8] sm:$0xff]  ;;  %s6633_s0 = smov 88   ;;  %s6636_s6 = smov 72   ;;  %vm1245_vm5 = vcmask 130048  }
  0x16   :  { %5581 = vmatprep.mubr.msk.f32.mxu0 %vm38_vm1, %v36_v3  ;;  %5592 = vmatprep.mubr.msk.f32.mxu1 %vm156_vm2, %v30_v4  ;;  %v5994_v18 = vpack.c.bf16 %v376_v17, %v375_v16  ;;  %v32_v19 = vld [vmem:[#allocation3 + $0x188] sm:$0xff]  ;;  %v377_v32 = vld [vmem:[#allocation3 + $0x10] sm:$0xff]  ;;  %v378_v33 = vld [vmem:[#allocation3 + $0x18] sm:$0xff]  ;;  %s6637_s7 = smov 112   ;;  %s6638_s8 = smov 104   ;;  %vm1654_vm6 = vcmask 130112  }
  0x17   :  { %v5998_v34 = vpack.c.bf16 %v378_v33, %v377_v32  ;;  %v26_v39 = vld [vmem:[#allocation3 + $0x150] sm:$0xff]  ;;  %v27_v41 = vld [vmem:[#allocation3 + $0x158] sm:$0xff]  ;;  %v28_v49 = vld [vmem:[#allocation3 + $0x160] sm:$0xff]  ;;  %s6639_s9 = smov 56   ;;  %s6640_s10 = smov 40   ;;  %vm1752_vm7 = vcmask 195712  }
  0x18   :  { %5995 = vmatprep.subr.bf16.mxu0 %v5994_v18  ;;  %v29_v51 = vld [vmem:[#allocation3 + $0x168] sm:$0xff]  ;;  %v5196_v55 = vld [vmem:[#allocation3 + $0xa0] ss:$0 sm:$0xff]  ;;  %vm6775_vm4 = vmpackc.low %vm510_vm3, %vm510_vm3  ;;  %s6641_s11 = smov 48   ;;  %s6642_s12 = smov 16   ;;  %vm1850_vm8 = vcmask 261312  }
  0x19   :  { %256 = vrot.lane.b32.xlu1 %v31_v5, %s6631_s1  ;;  %5582 = vmatmul.mubr.msk.f32.gmra.mrb[2].mxu0 %vm38_vm1, %v37_v6  ;;  %s6643_s13 = smov 24   ;;  %vm2520_vm9 = vcmask 523264  }
  0x1a   :  { %5997 = vmatpush3.bf16.msra.mxu0 %v5994_v18 }
  0x1b   :  { %5999 = vmatprep.subr.bf16.mxu0 %v5998_v34 }
  0x1d   :  { %260 = vrot.lane.b32.xlu1 %v33_v7, %s6631_s1 }
  0x1e   :  { %6001 = vmatpush3.bf16.msra.mxu0 %v5998_v34 }
  0x87   :  { %v255_v20 = vpop.permute.xlu1 %254 }
  0x8b   :  { %v257_v29 = vpop.permute.xlu1 %256 }
  0x8f   :  { %v261_v31 = vpop.permute.xlu1 %260 }
  0xe8   :  { %v5580_v8 = vpop.f32.mrb[0].mxu0 }
  0xe9   :  { %146 = vrot.lane.b32.xlu1 %v5580_v8, %s6631_s1  ;;  %v121_v9 = vpop.f32.mrb[1].mxu0 }
  0xea   :  { %v6266_v10 = vpack.i.bf16 %v5580_v8, %v121_v9  ;;  %v5978_v11 = vpack.c.bf16 %v5580_v8, %v121_v9 }
  0xec   :  { %6267 = vrot.lane.b32.xlu0 %v6266_v10, %s6632_s3  ;;  %v5583_v12 = vpop.f32.mrb[2].mxu0  ;;  %5979 = vmatprep.subr.bf16.mxu1 %v5978_v11 }
  0xed   :  { %5981 = vmatpush3.bf16.msra.mxu1 %v5978_v11  ;;  %150 = vrot.lane.b32.xlu1 %v5583_v12, %s6631_s1  ;;  %v131_v13 = vpop.f32.mrb[3].mxu0 }
  0xee   :  { %v6271_v14 = vpack.i.bf16 %v5583_v12, %v131_v13  ;;  %v5982_v15 = vpack.c.bf16 %v5583_v12, %v131_v13 }
  0xf0   :  { %6272 = vrot.lane.b32.xlu0 %v6271_v14, %s6632_s3  ;;  %5983 = vmatprep.subr.bf16.mxu1 %v5982_v15 }
  0xf1   :  { %5985 = vmatpush3.bf16.msra.mxu1 %v5982_v15 }
  0xf4   :  { %258 = vrot.lane.b32.xlu0 %v32_v19, %s6631_s1  ;;  %5593 = vmatmul.mubr.msk.f32.vlgmr.msra.gmra.mrb[0].mxu1 %vm156_vm2, %v31_v5 }
  0xf5   :  { %5595 = vmatprep.mubr.msk.f32.mxu1 %vm156_vm2, %v32_v19 }
  0xf8   :  { %144 = vrot.lane.b32.xlu0 %v121_v9, %s6631_s1  ;;  %5596 = vmatmul.mubr.msk.f32.gmra.mrb[2].mxu1 %vm156_vm2, %v33_v7 }
  0xf9   :  { %5606 = vmatprep.mubr.msk.f32.mxu1 %vm156_vm2, %v255_v20 }
  0xfc   :  { %148 = vrot.lane.b32.xlu0 %v131_v13, %s6631_s1 }
 0x15b   :  { %v147_v35 = vpop.permute.xlu1 %146 }
 0x15e   :  { %v6268_v21 = vpop.permute.xlu0 %6267 }
 0x15f   :  { %v6270_v22 = vunpack.i.h.bf16 %v6268_v21  ;;  %v6269_v23 = vunpack.i.l.bf16 %v6268_v21  ;;  %v151_v43 = vpop.permute.xlu1 %150 }
 0x161   :  { %v5986_v24 = vpack.c.bf16 %v6270_v22, %v6269_v23 }
 0x162   :  { %v6273_v25 = vpop.permute.xlu0 %6272 }
 0x163   :  { %v6275_v26 = vunpack.i.h.bf16 %v6273_v25  ;;  %v6274_v27 = vunpack.i.l.bf16 %v6273_v25  ;;  %5987 = vmatprep.subr.bf16.mxu1 %v5986_v24 }
 0x164   :  { %5989 = vmatpush3.bf16.msra.mxu1 %v5986_v24 }
 0x165   :  { %v5990_v28 = vpack.c.bf16 %v6275_v26, %v6274_v27 }
 0x166   :  { %v259_v30 = vpop.permute.xlu0 %258 }
 0x167   :  { %5991 = vmatprep.subr.bf16.mxu1 %v5990_v28 }
 0x168   :  { %5993 = vmatpush3.bf16.msra.mxu1 %v5990_v28 }
 0x16a   :  { %v145_v36 = vpop.permute.xlu0 %144 }
 0x16b   :  { %5607 = vmatmul.mubr.msk.f32.vlgmr.msra.gmra.mrb[0].mxu1 %vm156_vm2, %v257_v29 }
 0x16c   :  { %5609 = vmatprep.mubr.msk.f32.mxu1 %vm156_vm2, %v259_v30 }
 0x16e   :  { %v149_v46 = vpop.permute.xlu0 %148 }
 0x16f   :  { %5610 = vmatmul.mubr.msk.f32.gmra.mrb[2].mxu1 %vm156_vm2, %v261_v31 }
 0x23e   :  { %v5608_v37 = vpop.f32.mrb[0].mxu1 }
 0x23f   :  { %v6242_v38 = vadd.f32 %v5608_v37, %v147_v35  ;;  %v348_v40 = vpop.f32.mrb[1].mxu1 }
 0x240   :  { %v6243_v42 = vadd.f32 %v348_v40, %v145_v36 }
 0x241   :  { %v6708_v47 = vadd.f32 %v6242_v38, %v27_v41 }
 0x242   :  { %v6706_v44 = vadd.f32 %v6243_v42, %v26_v39  ;;  %v5611_v45 = vpop.f32.mrb[2].mxu1 }
 0x243   :  { %v6244_v48 = vadd.f32 %v5611_v45, %v151_v43  ;;  %v358_v50 = vpop.f32.mrb[3].mxu1 }
 0x244   :  { %v6245_v52 = vadd.f32 %v358_v50, %v149_v46  ;;  %5620 = vmatprep.mubr.msk.f32.mxu0 %vm156_vm2, %v6706_v44 }
 0x245   :  { %5621 = vmatmul.mubr.msk.f32.vlgmr.msra.gmra.mrb[4].mxu0 %vm156_vm2, %v6708_v47  ;;  %v6716_v54 = vadd.f32 %v6244_v48, %v29_v51 }
 0x246   :  { %v6714_v53 = vadd.f32 %v6245_v52, %v28_v49 }
 0x248   :  { %5623 = vmatprep.mubr.msk.f32.mxu0 %vm156_vm2, %v6714_v53 }
 0x249   :  { %5624 = vmatmul.mubr.msk.f32.gmra.mrb[6].mxu0 %vm156_vm2, %v6716_v54 }
 0x318   :  { %v5622_v56 = vpop.f32.mrb[4].mxu0 }
 0x319   :  { %v6722_v57 = vadd.f32 %v5622_v56, %v5196_v55  ;;  %v485_v58 = vpop.f32.mrb[5].mxu0 }
 0x31a   :  { %v486_v59 = vadd.f32 %v5196_v55, %v485_v58 }
 0x31c   :  { %v5625_v60 = vpop.f32.mrb[6].mxu0  ;;  %5630 = vmatprep.mubr.msk.f32.mxu0 %vm510_vm3, %v486_v59  ;;  %v6726_v61 = vpack.i.bf16 %v6722_v57, %v486_v59 }
 0x31d   :  { %v495_v62 = vpop.f32.mrb[7].mxu0  ;;  %v6739_v63 = vadd.f32 %v5625_v60, %v5196_v55 }
 0x31e   :  { %6282 = vrot.lane.b32.xlu1 %v6726_v61, %s6633_s0  ;;  %6277 = vrot.lane.b32.xlu0 %v6726_v61, %s6631_s1  ;;  %v6741_v0 = vadd.f32 %v5196_v55, %v495_v62 }
 0x320   :  { %v6748_v1 = vpack.i.bf16 %v6739_v63, %v6741_v0 }
 0x322   :  { %598 = vrot.lane.b32.xlu1 %v6722_v57, %s6634_s4  ;;  %6287 = vrot.lane.b32.xlu0 %v6726_v61, %s6635_s5 }
 0x326   :  { %6292 = vrot.lane.b32.xlu1 %v6726_v61, %s6636_s6  ;;  %596 = vrot.lane.b32.xlu0 %v486_v59, %s6634_s4 }
 0x32a   :  { %691 = vrot.lane.b32.xlu1 %v6722_v57, %s6637_s7  ;;  %689 = vrot.lane.b32.xlu0 %v486_v59, %s6637_s7 }
 0x32e   :  { %6302 = vrot.lane.b32.xlu1 %v6748_v1, %s6633_s0  ;;  %6297 = vrot.lane.b32.xlu0 %v6748_v1, %s6631_s1 }
 0x332   :  { %784 = vrot.lane.b32.xlu1 %v6722_v57, %s6638_s8  ;;  %782 = vrot.lane.b32.xlu0 %v486_v59, %s6638_s8 }
 0x336   :  { %6312 = vrot.lane.b32.xlu1 %v6748_v1, %s6636_s6  ;;  %6307 = vrot.lane.b32.xlu0 %v6748_v1, %s6635_s5 }
 0x33a   :  { %968 = vrot.lane.b32.xlu1 %v6739_v63, %s6634_s4  ;;  %966 = vrot.lane.b32.xlu0 %v6741_v0, %s6634_s4 }
 0x33e   :  { %1061 = vrot.lane.b32.xlu1 %v6739_v63, %s6637_s7  ;;  %1059 = vrot.lane.b32.xlu0 %v6741_v0, %s6637_s7 }
 0x342   :  { %1154 = vrot.lane.b32.xlu1 %v6739_v63, %s6638_s8  ;;  %1152 = vrot.lane.b32.xlu0 %v6741_v0, %s6638_s8 }
 0x390   :  { %v6283_v2 = vpop.permute.xlu1 %6282  ;;  %v6278_v3 = vpop.permute.xlu0 %6277 }
 0x391   :  { %v6285_v4 = vunpack.i.h.bf16 %v6283_v2  ;;  %v6284_v5 = vunpack.i.l.bf16 %v6283_v2  ;;  %v6280_v6 = vunpack.i.h.bf16 %v6278_v3  ;;  %v6279_v7 = vunpack.i.l.bf16 %v6278_v3 }
 0x393   :  { %v6008_v9 = vpack.c.bf16 %v6285_v4, %v6284_v5  ;;  %v6002_v10 = vpack.c.bf16 %v6280_v6, %v6279_v7 }
 0x394   :  { %v599_v11 = vpop.permute.xlu1 %598  ;;  %v6288_v12 = vpop.permute.xlu0 %6287 }
 0x395   :  { %v6290_v13 = vunpack.i.h.bf16 %v6288_v12  ;;  %v6289_v14 = vunpack.i.l.bf16 %v6288_v12  ;;  %6004 = vmatprep.subr.msk.bf16.mxu0 %vm6775_vm4, %v6002_v10  ;;  %6010 = vmatprep.subr.msk.bf16.mxu1 %vm6775_vm4, %v6008_v9 }
 0x396   :  { %6007 = vmatpush3.bf16.xpose.msk.msra.mxu0 %vm6775_vm4, %v6002_v10  ;;  %6013 = vmatpush3.bf16.xpose.msk.msra.mxu1 %vm6775_vm4, %v6008_v9 }
 0x397   :  { %v6014_v15 = vpack.c.bf16 %v6290_v13, %v6289_v14 }
 0x398   :  { %v6293_v16 = vpop.permute.xlu1 %6292  ;;  %v597_v17 = vpop.permute.xlu0 %596 }
 0x399   :  { %v6295_v18 = vunpack.i.h.bf16 %v6293_v16  ;;  %v6294_v19 = vunpack.i.l.bf16 %v6293_v16  ;;  %5637 = vmatprep.mubr.msk.f32.mxu1 %vm510_vm3, %v597_v17  ;;  %6016 = vmatprep.subr.msk.bf16.mxu0 %vm6775_vm4, %v6014_v15 }
 0x39b   :  { %v6020_v20 = vpack.c.bf16 %v6295_v18, %v6294_v19 }
 0x39c   :  { %v692_v21 = vpop.permute.xlu1 %691  ;;  %v690_v22 = vpop.permute.xlu0 %689 }
 0x39d   :  { %5631 = vmatmul.mubr.msk.f32.vlgmr.msra.gmra.mrb[8].mxu0 %vm510_vm3, %v6722_v57  ;;  %5638 = vmatmul.mubr.msk.f32.vlgmr.msra.gmra.mrb[4].mxu1 %vm510_vm3, %v599_v11 }
 0x39e   :  { %6022 = vmatprep.subr.msk.bf16.mxu1 %vm6775_vm4, %v6020_v20  ;;  %6019 = vmatpush3.bf16.xpose.msk.msra.mxu0 %vm6775_vm4, %v6014_v15 }
 0x39f   :  { %5644 = vmatprep.mubr.msk.f32.mxu0 %vm510_vm3, %v690_v22  ;;  %6025 = vmatpush3.bf16.xpose.msk.msra.mxu1 %vm6775_vm4, %v6020_v20 }
 0x3a0   :  { %v6303_v23 = vpop.permute.xlu1 %6302  ;;  %v6298_v24 = vpop.permute.xlu0 %6297 }
 0x3a1   :  { %v6305_v25 = vunpack.i.h.bf16 %v6303_v23  ;;  %v6304_v26 = vunpack.i.l.bf16 %v6303_v23  ;;  %v6300_v27 = vunpack.i.h.bf16 %v6298_v24  ;;  %v6299_v28 = vunpack.i.l.bf16 %v6298_v24 }
 0x3a3   :  { %v6032_v29 = vpack.c.bf16 %v6305_v25, %v6304_v26  ;;  %v6026_v30 = vpack.c.bf16 %v6300_v27, %v6299_v28 }
 0x3a4   :  { %v785_v31 = vpop.permute.xlu1 %784  ;;  %v783_v32 = vpop.permute.xlu0 %782 }
 0x3a5   :  { %5645 = vmatmul.mubr.msk.f32.vlgmr.msra.gmra.mrb[10].mxu0 %vm510_vm3, %v692_v21  ;;  %5651 = vmatprep.mubr.msk.f32.mxu1 %vm510_vm3, %v783_v32 }
 0x3a6   :  { %6028 = vmatprep.subr.msk.bf16.mxu0 %vm6775_vm4, %v6026_v30  ;;  %6034 = vmatprep.subr.msk.bf16.mxu1 %vm6775_vm4, %v6032_v29 }
 0x3a7   :  { %5652 = vmatmul.mubr.msk.f32.vlgmr.msra.gmra.mrb[6].mxu1 %vm510_vm3, %v785_v31  ;;  %6031 = vmatpush3.bf16.xpose.msk.msra.mxu0 %vm6775_vm4, %v6026_v30 }
 0x3a8   :  { %5658 = vmatprep.mubr.msk.f32.mxu0 %vm510_vm3, %v6741_v0  ;;  %6037 = vmatpush3.bf16.xpose.msk.msra.mxu1 %vm6775_vm4, %v6032_v29  ;;  %v6313_v33 = vpop.permute.xlu1 %6312  ;;  %v6308_v34 = vpop.permute.xlu0 %6307 }
 0x3a9   :  { %v6315_v35 = vunpack.i.h.bf16 %v6313_v33  ;;  %v6314_v36 = vunpack.i.l.bf16 %v6313_v33  ;;  %v6310_v37 = vunpack.i.h.bf16 %v6308_v34  ;;  %v6309_v38 = vunpack.i.l.bf16 %v6308_v34 }
 0x3ab   :  { %v6044_v39 = vpack.c.bf16 %v6315_v35, %v6314_v36  ;;  %v6038_v40 = vpack.c.bf16 %v6310_v37, %v6309_v38 }
 0x3ac   :  { %v969_v41 = vpop.permute.xlu1 %968  ;;  %v967_v42 = vpop.permute.xlu0 %966 }
 0x3ad   :  { %5665 = vmatprep.mubr.msk.f32.mxu1 %vm510_vm3, %v967_v42  ;;  %6040 = vmatprep.subr.msk.bf16.mxu0 %vm6775_vm4, %v6038_v40 }
 0x3ae   :  { %5659 = vmatmul.mubr.msk.f32.vlgmr.msra.gmra.mrb[12].mxu0 %vm510_vm3, %v6739_v63  ;;  %6046 = vmatprep.subr.msk.bf16.mxu1 %vm6775_vm4, %v6044_v39 }
 0x3af   :  { %5666 = vmatmul.mubr.msk.f32.vlgmr.msra.gmra.mrb[8].mxu1 %vm510_vm3, %v969_v41  ;;  %6043 = vmatpush3.bf16.xpose.msk.msra.mxu0 %vm6775_vm4, %v6038_v40 }
 0x3b0   :  { %6049 = vmatpush3.bf16.xpose.msk.msra.mxu1 %vm6775_vm4, %v6044_v39  ;;  %v1062_v43 = vpop.permute.xlu1 %1061  ;;  %v1060_v45 = vpop.permute.xlu0 %1059 }
 0x3b1   :  { %5672 = vmatprep.mubr.msk.f32.mxu0 %vm510_vm3, %v1060_v45 }
 0x3b4   :  { %v1155_v46 = vpop.permute.xlu1 %1154  ;;  %v1153_v48 = vpop.permute.xlu0 %1152 }
 0x3b5   :  { %5679 = vmatprep.mubr.msk.f32.mxu1 %vm510_vm3, %v1153_v48 }
 0x3b6   :  { %5673 = vmatmul.mubr.msk.f32.vlgmr.msra.gmra.mrb[14].mxu0 %vm510_vm3, %v1062_v43 }
 0x3b7   :  { %5680 = vmatmul.mubr.msk.f32.vlgmr.msra.gmra.mrb[10].mxu1 %vm510_vm3, %v1155_v46 }
 0x470   :  { %v5632_v49 = vpop.f32.mrb[8].mxu0  ;;  %v5639_v50 = vpop.f32.mrb[4].mxu1 }
 0x471   :  { %v6829_v51 = vmul.f32 0.35355338, %v5632_v49  ;;  %v6831_v52 = vmul.f32 0.35355338, %v5639_v50  ;;  %v585_v55 = vpop.f32.mrb[9].mxu0  ;;  %v678_v56 = vpop.f32.mrb[5].mxu1 }
 0x472   :  { %v6833_v57 = vmul.f32 0.35355338, %v585_v55  ;;  %v6839_v60 = vmul.f32 0.35355338, %v678_v56 }
 0x473   :  { %v1249_v58 = vsel %vm1245_vm5, %v6829_v51, -inf  ;;  %v1255_v59 = vsel %vm1245_vm5, %v6831_v52, -inf }
 0x474   :  { %1250 = vmax.xlane.f32.xlu1 %v1249_v58  ;;  %1256 = vmax.xlane.f32.xlu0 %v1255_v59  ;;  %v1246_v62 = vsel %vm1245_vm5, %v6833_v57, -inf  ;;  %v1252_v6 = vsel %vm1245_vm5, %v6839_v60, -inf }
 0x478   :  { %v5646_v63 = vpop.f32.mrb[10].mxu0  ;;  %1247 = vmax.xlane.f32.xlu0 %v1246_v62 }
 0x479   :  { %v771_v0 = vpop.f32.mrb[11].mxu0  ;;  %v6845_v4 = vmul.f32 0.35355338, %v5646_v63 }
 0x47a   :  { %v6843_v2 = vmul.f32 0.35355338, %v771_v0  ;;  %v5653_v3 = vpop.f32.mrb[6].mxu1 }
 0x47b   :  { %v864_v5 = vpop.f32.mrb[7].mxu1  ;;  %v6853_v10 = vmul.f32 0.35355338, %v5653_v3  ;;  %v1261_v11 = vsel %vm1245_vm5, %v6845_v4, -inf }
 0x47c   :  { %v6849_v7 = vmul.f32 0.35355338, %v864_v5  ;;  %1253 = vmax.xlane.f32.xlu0 %v1252_v6  ;;  %v1258_v9 = vsel %vm1245_vm5, %v6843_v2, -inf }
 0x47d   :  { %1259 = vmax.xlane.f32.xlu1 %v1258_v9  ;;  %v1267_v19 = vsel %vm1245_vm5, %v6853_v10, -inf }
 0x47e   :  { %v1264_v12 = vsel %vm1245_vm5, %v6849_v7, -inf }
 0x480   :  { %1262 = vmax.xlane.f32.xlu0 %v1261_v11 }
 0x481   :  { %v5660_v13 = vpop.f32.mrb[12].mxu0  ;;  %1265 = vmax.xlane.f32.xlu1 %v1264_v12 }
 0x482   :  { %v955_v14 = vpop.f32.mrb[13].mxu0  ;;  %v5667_v15 = vpop.f32.mrb[8].mxu1  ;;  %v6859_v16 = vmul.f32 0.35355338, %v5660_v13 }
 0x483   :  { %v6861_v17 = vmul.f32 0.35355338, %v955_v14  ;;  %v1048_v18 = vpop.f32.mrb[9].mxu1  ;;  %v6869_v22 = vmul.f32 0.35355338, %v5667_v15 }
 0x484   :  { %1268 = vmax.xlane.f32.xlu0 %v1267_v19  ;;  %v6865_v20 = vmul.f32 0.35355338, %v1048_v18  ;;  %v1273_v23 = vsel %vm1245_vm5, %v6859_v16, -inf }
 0x485   :  { %v1270_v21 = vsel %vm1245_vm5, %v6861_v17, -inf  ;;  %v1279_v30 = vsel %vm1245_vm5, %v6869_v22, -inf }
 0x486   :  { %1271 = vmax.xlane.f32.xlu1 %v1270_v21  ;;  %v1276_v25 = vsel %vm1245_vm5, %v6865_v20, -inf }
 0x488   :  { %1274 = vmax.xlane.f32.xlu0 %v1273_v23 }
 0x489   :  { %v5674_v24 = vpop.f32.mrb[14].mxu0 }
 0x48a   :  { %v1141_v26 = vpop.f32.mrb[15].mxu0  ;;  %v5681_v27 = vpop.f32.mrb[10].mxu1  ;;  %1277 = vmax.xlane.f32.xlu1 %v1276_v25  ;;  %v6875_v28 = vmul.f32 0.35355338, %v5674_v24 }
 0x48b   :  { %v1234_v29 = vpop.f32.mrb[11].mxu1  ;;  %v6879_v31 = vmul.f32 0.35355338, %v5681_v27  ;;  %v6895_v34 = vmul.f32 0.35355338, %v1141_v26 }
 0x48c   :  { %1280 = vmax.xlane.f32.xlu0 %v1279_v30  ;;  %v1285_v32 = vsel %vm1245_vm5, %v6875_v28, -inf  ;;  %v6897_v35 = vmul.f32 0.35355338, %v1234_v29 }
 0x48d   :  { %v1291_v33 = vsel %vm1245_vm5, %v6879_v31, -inf  ;;  %v1282_v36 = vsel %vm1245_vm5, %v6895_v34, -inf }
 0x48e   :  { %v1288_v37 = vsel %vm1245_vm5, %v6897_v35, -inf }
 0x490   :  { %1286 = vmax.xlane.f32.xlu0 %v1285_v32 }
 0x494   :  { %1292 = vmax.xlane.f32.xlu0 %v1291_v33 }
 0x49b   :  { %6322 = vrot.lane.b32.xlu1 %v6726_v61, %s6639_s9 }
 0x49f   :  { %6332 = vrot.lane.b32.xlu1 %v6726_v61, %s6640_s10 }
 0x4aa   :  { %6317 = vrot.lane.b32.xlu0 %v6726_v61, %s6632_s3 }
 0x4ae   :  { %6327 = vrot.lane.b32.xlu0 %v6726_v61, %s6641_s11 }
 0x4b2   :  { %6337 = vrot.lane.b32.xlu0 %v6748_v1, %s6632_s3 }
 0x4c3   :  { %1283 = vmax.xlane.f32.xlu1 %v1282_v36 }
 0x4c7   :  { %1289 = vmax.xlane.f32.xlu1 %v1288_v37 }
 0x4d8   :  { %6342 = vrot.lane.b32.xlu1 %v6748_v1, %s6639_s9 }
 0x501   :  { %v1251_v38 = vpop.xlane.xlu1 %1250  ;;  %v1257_v61 = vpop.xlane.xlu0 %1256 }
 0x502   :  { %v1295_v39 = vsub.f32 %v6829_v51, %v1251_v38  ;;  %v1297_v40 = vsub.f32 %v6831_v52, %v1257_v61 }
 0x504   :  { %v1312_v41 = vmul.f32 1.442695, %v1295_v39  ;;  %v1316_v42 = vmul.f32 1.442695, %v1297_v40 }
 0x505   :  { %v1248_v43 = vpop.xlane.xlu0 %1247 }
 0x506   :  { %6436 = vpow2.f32 %v1312_v41  ;;  %v1294_v45 = vsub.f32 %v6833_v57, %v1248_v43 }
 0x507   :  { %6438 = vpow2.f32 %v1316_v42 }
 0x508   :  { %v1310_v46 = vmul.f32 1.442695, %v1294_v45 }
 0x509   :  { %v1254_v48 = vpop.xlane.xlu0 %1253 }
 0x50a   :  { %6440 = vpow2.f32 %v1310_v46  ;;  %v1296_v49 = vsub.f32 %v6839_v60, %v1254_v48  ;;  %v1260_v50 = vpop.xlane.xlu1 %1259 }
 0x50b   :  { %v1298_v55 = vsub.f32 %v6843_v2, %v1260_v50 }
 0x50c   :  { %v1314_v56 = vmul.f32 1.442695, %v1296_v49 }
 0x50d   :  { %v1318_v58 = vmul.f32 1.442695, %v1298_v55  ;;  %v1263_v51 = vpop.xlane.xlu0 %1262 }
 0x50e   :  { %6442 = vpow2.f32 %v1314_v56  ;;  %v1299_v52 = vsub.f32 %v6845_v4, %v1263_v51  ;;  %v1266_v59 = vpop.xlane.xlu1 %1265 }
 0x50f   :  { %v1300_v62 = vsub.f32 %v6849_v7, %v1266_v59  ;;  %6444 = vpow2.f32 %v1318_v58 }
 0x510   :  { %v6912_v63 = vpop.eup %6436  ;;  %v1320_v57 = vmul.f32 1.442695, %v1299_v52 }
 0x511   :  { %v1322_v0 = vmul.f32 1.442695, %v1300_v62  ;;  %v1269_v3 = vpop.xlane.xlu0 %1268  ;;  %v1345_v60 = vsel %vm1245_vm5, %v6912_v63, 0.0  ;;  %v6916_v5 = vpop.eup %6438 }
 0x512   :  { %6446 = vpow2.f32 %v1320_v57  ;;  %v1301_v2 = vsub.f32 %v6853_v10, %v1269_v3  ;;  %1346 = vadd.xlane.f32.xlu0 %v1345_v60  ;;  %v1351_v12 = vsel %vm1245_vm5, %v6916_v5, 0.0 }
 0x513   :  { %v1272_v6 = vpop.xlane.xlu1 %1271  ;;  %6448 = vpow2.f32 %v1322_v0 }
 0x514   :  { %v6919_v4 = vpop.eup %6440  ;;  %v1324_v7 = vmul.f32 1.442695, %v1301_v2  ;;  %v1302_v9 = vsub.f32 %v6861_v17, %v1272_v6 }
 0x515   :  { %v1275_v11 = vpop.xlane.xlu0 %1274  ;;  %v1342_v13 = vsel %vm1245_vm5, %v6919_v4, 0.0 }
 0x516   :  { %6450 = vpow2.f32 %v1324_v7  ;;  %v1326_v14 = vmul.f32 1.442695, %v1302_v9  ;;  %v1303_v15 = vsub.f32 %v6859_v16, %v1275_v11  ;;  %1352 = vadd.xlane.f32.xlu0 %v1351_v12  ;;  %1343 = vadd.xlane.f32.xlu1 %v1342_v13 }
 0x517   :  { %v1278_v10 = vpop.xlane.xlu1 %1277 }
 0x518   :  { %v6927_v18 = vpop.eup %6442  ;;  %6452 = vpow2.f32 %v1326_v14  ;;  %v1328_v19 = vmul.f32 1.442695, %v1303_v15  ;;  %v1304_v17 = vsub.f32 %v6865_v20, %v1278_v10 }
 0x519   :  { %v1281_v21 = vpop.xlane.xlu0 %1280  ;;  %v1348_v23 = vsel %vm1245_vm5, %v6927_v18, 0.0  ;;  %v6932_v24 = vpop.eup %6444 }
 0x51a   :  { %6454 = vpow2.f32 %v1328_v19  ;;  %v1330_v25 = vmul.f32 1.442695, %v1304_v17  ;;  %v1305_v26 = vsub.f32 %v6869_v22, %v1281_v21  ;;  %1349 = vadd.xlane.f32.xlu1 %v1348_v23  ;;  %v1354_v20 = vsel %vm1245_vm5, %v6932_v24, 0.0 }
 0x51b   :  { %v6323_v40 = vpop.permute.xlu1 %6322 }
 0x51c   :  { %v6935_v16 = vpop.eup %6446  ;;  %v1332_v27 = vmul.f32 1.442695, %v1305_v26  ;;  %6456 = vpow2.f32 %v1330_v25  ;;  %v6325_v43 = vunpack.i.h.bf16 %v6323_v40  ;;  %v6324_v49 = vunpack.i.l.bf16 %v6323_v40 }
 0x51d   :  { %v1287_v29 = vpop.xlane.xlu0 %1286  ;;  %v1357_v30 = vsel %vm1245_vm5, %v6935_v16, 0.0  ;;  %v6941_v32 = vpop.eup %6448 }
 0x51e   :  { %6458 = vpow2.f32 %v1332_v27  ;;  %v1307_v33 = vsub.f32 %v6875_v28, %v1287_v29  ;;  %1358 = vadd.xlane.f32.xlu0 %v1357_v30  ;;  %1355 = vadd.xlane.f32.xlu1 %v1354_v20  ;;  %v1360_v61 = vsel %vm1245_vm5, %v6941_v32, 0.0  ;;  %v6969_v62 = vpack.c.bf16 %v6325_v43, %v6324_v49 }
 0x51f   :  { %v6982_v11 = vpop.permute.xlu1 %6332 }
 0x520   :  { %v6944_v22 = vpop.eup %6450  ;;  %v1336_v36 = vmul.f32 1.442695, %v1307_v33 }
 0x521   :  { %v1293_v37 = vpop.xlane.xlu0 %1292  ;;  %v1363_v38 = vsel %vm1245_vm5, %v6944_v22, 0.0 }
 0x522   :  { %v6950_v39 = vpop.eup %6452  ;;  %6460 = vpow2.f32 %v1336_v36  ;;  %v1309_v41 = vsub.f32 %v6879_v31, %v1293_v37  ;;  %1364 = vadd.xlane.f32.xlu0 %v1363_v38  ;;  %1361 = vadd.xlane.f32.xlu1 %v1360_v61 }
 0x523   :  { %v1366_v48 = vsel %vm1245_vm5, %v6950_v39, 0.0 }
 0x524   :  { %v6953_v28 = vpop.eup %6454  ;;  %v1340_v42 = vmul.f32 1.442695, %v1309_v41 }
 0x525   :  { %v6318_v45 = vpop.permute.xlu0 %6317  ;;  %v1369_v46 = vsel %vm1245_vm5, %v6953_v28, 0.0 }
 0x526   :  { %6462 = vpow2.f32 %v1340_v42  ;;  %v6320_v50 = vunpack.i.h.bf16 %v6318_v45  ;;  %v6319_v55 = vunpack.i.l.bf16 %v6318_v45  ;;  %1370 = vadd.xlane.f32.xlu0 %v1369_v46  ;;  %1367 = vadd.xlane.f32.xlu1 %v1366_v48  ;;  %v6959_v31 = vpop.eup %6456 }
 0x527   :  { %v1372_v59 = vsel %vm1245_vm5, %v6959_v31, 0.0 }
 0x528   :  { %v6961_v56 = vpop.eup %6458  ;;  %v6050_v58 = vpack.c.bf16 %v6320_v50, %v6319_v55 }
 0x529   :  { %v6963_v51 = vpop.permute.xlu0 %6327  ;;  %v1375_v52 = vsel %vm1245_vm5, %v6961_v56, 0.0 }
 0x52a   :  { %1376 = vadd.xlane.f32.xlu0 %v1375_v52  ;;  %6051 = vmatprep.subr.bf16.mxu0 %v6050_v58  ;;  %v6330_v52 = vunpack.i.h.bf16 %v6963_v51 }
 0x52b   :  { %1373 = vadd.xlane.f32.xlu1 %v1372_v59  ;;  %6053 = vmatpush3.bf16.msra.mxu0 %v6050_v58  ;;  %v6329_v59 = vunpack.i.l.bf16 %v6963_v51 }
 0x52c   :  { %v6971_v57 = vpop.eup %6460  ;;  %6055 = vmatprep.subr.bf16.mxu0 %v6969_v62 }
 0x52d   :  { %v6338_v0 = vpop.permute.xlu0 %6337  ;;  %v1381_v3 = vsel %vm1245_vm5, %v6971_v57, 0.0 }
 0x52e   :  { %v6340_v60 = vunpack.i.h.bf16 %v6338_v0  ;;  %v6339_v2 = vunpack.i.l.bf16 %v6338_v0  ;;  %1382 = vadd.xlane.f32.xlu0 %v1381_v3 }
 0x530   :  { %v6976_v6 = vpop.eup %6462  ;;  %v6066_v7 = vpack.c.bf16 %v6340_v60, %v6339_v2 }
 0x531   :  { %v1387_v9 = vsel %vm1245_vm5, %v6976_v6, 0.0 }
 0x532   :  { %6067 = vmatprep.subr.bf16.mxu1 %v6066_v7  ;;  %1388 = vadd.xlane.f32.xlu1 %v1387_v9 }
 0x533   :  { %6069 = vmatpush3.bf16.msra.mxu1 %v6066_v7 }
 0x544   :  { %6347 = vrot.lane.b32.xlu0 %v6748_v1, %s6641_s11 }
 0x550   :  { %v1284_v12 = vpop.xlane.xlu1 %1283 }
 0x551   :  { %v1306_v13 = vsub.f32 %v6895_v34, %v1284_v12 }
 0x553   :  { %v1334_v14 = vmul.f32 1.442695, %v1306_v13 }
 0x554   :  { %v1290_v15 = vpop.xlane.xlu1 %1289 }
 0x555   :  { %6464 = vpow2.f32 %v1334_v14  ;;  %v1308_v10 = vsub.f32 %v6897_v35, %v1290_v15  ;;  %v6335_v15 = vunpack.i.h.bf16 %v6982_v11 }
 0x557   :  { %v1338_v19 = vmul.f32 1.442695, %v1308_v10  ;;  %v6334_v10 = vunpack.i.l.bf16 %v6982_v11 }
 0x558   :  { %v6996_v34 = vpop.permute.xlu1 %6342 }
 0x559   :  { %6466 = vpow2.f32 %v1338_v19 }
 0x55f   :  { %v6986_v17 = vpop.eup %6464 }
 0x560   :  { %v1378_v21 = vsel %vm1245_vm5, %v6986_v17, 0.0 }
 0x561   :  { %1379 = vadd.xlane.f32.xlu1 %v1378_v21 }
 0x563   :  { %v6990_v23 = vpop.eup %6466 }
 0x564   :  { %v1384_v25 = vsel %vm1245_vm5, %v6990_v23, 0.0 }
 0x565   :  { %1385 = vadd.xlane.f32.xlu1 %v1384_v25 }
 0x576   :  { %6352 = vrot.lane.b32.xlu1 %v6748_v1, %s6640_s10 }
 0x59f   :  { %v1347_v35 = vpop.xlane.xlu0 %1346 }
 0x5a0   :  { %6468 = vrcp.f32 %v1347_v35 }
 0x5a3   :  { %v1353_v26 = vpop.xlane.xlu0 %1352  ;;  %v1344_v27 = vpop.xlane.xlu1 %1343 }
 0x5a4   :  { %6470 = vrcp.f32 %v1353_v26 }
 0x5a5   :  { %6472 = vrcp.f32 %v1344_v27 }
 0x5a7   :  { %v1350_v29 = vpop.xlane.xlu1 %1349 }
 0x5a8   :  { %6474 = vrcp.f32 %v1350_v29 }
 0x5aa   :  { %v6469_v30 = vpop.eup %6468 }
 0x5ab   :  { %v1407_v20 = vmul.f32 %v6469_v30, %v1347_v35  ;;  %v1359_v33 = vpop.xlane.xlu0 %1358  ;;  %v1356_v36 = vpop.xlane.xlu1 %1355 }
 0x5ac   :  { %6476 = vrcp.f32 %v1359_v33 }
 0x5ad   :  { %6478 = vrcp.f32 %v1356_v36  ;;  %v1423_v61 = vsub.f32 2.0, %v1407_v20 }
 0x5ae   :  { %v6471_v37 = vpop.eup %6470 }
 0x5af   :  { %v6473_v38 = vpop.eup %6472  ;;  %v1409_v1 = vmul.f32 %v6471_v37, %v1353_v26  ;;  %v1365_v40 = vpop.xlane.xlu0 %1364  ;;  %v1439_v46 = vmul.f32 %v6469_v30, %v1423_v61 }
 0x5b0   :  { %v1362_v41 = vpop.xlane.xlu1 %1361  ;;  %v1406_v42 = vmul.f32 %v6473_v38, %v1344_v27  ;;  %6480 = vrcp.f32 %v1365_v40 }
 0x5b1   :  { %6482 = vrcp.f32 %v1362_v41  ;;  %v1425_v48 = vsub.f32 2.0, %v1409_v1  ;;  %v1455_v7 = vmul.f32 %v6912_v63, %v1439_v46 }
 0x5b2   :  { %v6475_v43 = vpop.eup %6474  ;;  %v1422_v45 = vsub.f32 2.0, %v1406_v42 }
 0x5b3   :  { %v1408_v49 = vmul.f32 %v6475_v43, %v1350_v29  ;;  %v1371_v50 = vpop.xlane.xlu0 %1370  ;;  %v1441_v9 = vmul.f32 %v6471_v37, %v1425_v48  ;;  %v6345_v37 = vunpack.i.h.bf16 %v6996_v34 }
 0x5b4   :  { %v1368_v55 = vpop.xlane.xlu1 %1367  ;;  %v1438_v58 = vmul.f32 %v6473_v38, %v1422_v45  ;;  %6484 = vrcp.f32 %v1371_v50 }
 0x5b5   :  { %v1424_v0 = vsub.f32 2.0, %v1408_v49  ;;  %6486 = vrcp.f32 %v1368_v55  ;;  %v1457_v27 = vmul.f32 %v6916_v5, %v1441_v9 }
 0x5b6   :  { %v6477_v3 = vpop.eup %6476  ;;  %v1454_v60 = vmul.f32 %v6919_v4, %v1438_v58  ;;  %v6058_v4 = vpack.c.bf16 %v6330_v52, %v6329_v59 }
 0x5b7   :  { %v6479_v2 = vpop.eup %6478  ;;  %v1440_v12 = vmul.f32 %v6475_v43, %v1424_v0  ;;  %v1411_v13 = vmul.f32 %v6477_v3, %v1359_v33  ;;  %v1377_v14 = vpop.xlane.xlu0 %1376 }
 0x5b8   :  { %v1410_v19 = vmul.f32 %v6479_v2, %v1356_v36  ;;  %6488 = vrcp.f32 %v1377_v14  ;;  %5686 = vmatprep.mubr.msk.f32.mxu0 %vm1245_vm5, %v1454_v60  ;;  %v1374_v51 = vpop.xlane.xlu1 %1373  ;;  %v6062_v36 = vpack.c.bf16 %v6335_v15, %v6334_v10 }
 0x5b9   :  { %v1427_v21 = vsub.f32 2.0, %v1411_v13  ;;  %6490 = vrcp.f32 %v1374_v51  ;;  %5687 = vmatmul.mubr.msk.f32.vlgmr.msra.gmra.mrb[16].mxu0 %vm1245_vm5, %v1455_v7  ;;  %v1456_v63 = vmul.f32 %v6927_v18, %v1440_v12  ;;  %v6344_v18 = vunpack.i.l.bf16 %v6996_v34 }
 0x5ba   :  { %v6481_v25 = vpop.eup %6480  ;;  %v1426_v35 = vsub.f32 2.0, %v1410_v19  ;;  %6057 = vmatpush3.bf16.msra.mxu0 %v6969_v62 }
 0x5bb   :  { %v6483_v26 = vpop.eup %6482  ;;  %v1443_v11 = vmul.f32 %v6477_v3, %v1427_v21  ;;  %v1413_v29 = vmul.f32 %v6481_v25, %v1365_v40  ;;  %6059 = vmatprep.subr.bf16.mxu0 %v6058_v4  ;;  %v7009_v30 = vpop.xlane.xlu0 %1382  ;;  %5693 = vmatprep.mubr.msk.f32.mxu0 %vm1245_vm5, %v1456_v63  ;;  %v6070_v58 = vpack.c.bf16 %v6345_v37, %v6344_v18 }
 0x5bc   :  { %v1442_v20 = vmul.f32 %v6479_v2, %v1426_v35  ;;  %v1412_v33 = vmul.f32 %v6483_v26, %v1362_v41  ;;  %6492 = vrcp.f32 %v7009_v30 }
 0x5bd   :  { %v1459_v38 = vmul.f32 %v6935_v16, %v1443_v11  ;;  %v1429_v62 = vsub.f32 2.0, %v1413_v29  ;;  %5694 = vmatmul.mubr.msk.f32.vlgmr.msra.gmra.mrb[18].mxu0 %vm1245_vm5, %v1457_v27 }
 0x5be   :  { %v6485_v5 = vpop.eup %6484  ;;  %v1428_v61 = vsub.f32 2.0, %v1412_v33  ;;  %6061 = vmatpush3.bf16.msra.mxu0 %v6058_v4  ;;  %v1458_v1 = vmul.f32 %v6932_v24, %v1442_v20 }
 0x5bf   :  { %v6487_v40 = vpop.eup %6486  ;;  %v1445_v42 = vmul.f32 %v6481_v25, %v1429_v62  ;;  %v1415_v43 = vmul.f32 %v6485_v5, %v1371_v50  ;;  %6063 = vmatprep.subr.bf16.mxu0 %v6062_v36  ;;  %v6348_v41 = vpop.permute.xlu0 %6347 }
 0x5c0   :  { %v1444_v45 = vmul.f32 %v6483_v26, %v1428_v61  ;;  %v1414_v46 = vmul.f32 %v6487_v40, %v1368_v55  ;;  %v6350_v48 = vunpack.i.h.bf16 %v6348_v41  ;;  %v6349_v49 = vunpack.i.l.bf16 %v6348_v41  ;;  %5700 = vmatprep.mubr.msk.f32.mxu0 %vm1245_vm5, %v1458_v1  ;;  %v381_v41 = vld [vmem:[#allocation3 + $0x30] sm:$0xff] }
 0x5c1   :  { %v1461_v16 = vmul.f32 %v6944_v22, %v1445_v42  ;;  %v1431_v34 = vsub.f32 2.0, %v1415_v43  ;;  %5701 = vmatmul.mubr.msk.f32.vlgmr.msra.gmra.mrb[20].mxu0 %vm1245_vm5, %v1459_v38  ;;  %v379_v42 = vld [vmem:[#allocation3 + $0x20] sm:$0xff]  ;;  %v380_v43 = vld [vmem:[#allocation3 + $0x28] sm:$0xff] }
 0x5c2   :  { %v6489_v52 = vpop.eup %6488  ;;  %v1430_v59 = vsub.f32 2.0, %v1414_v46  ;;  %6065 = vmatpush3.bf16.msra.mxu0 %v6062_v36  ;;  %v1460_v24 = vmul.f32 %v6941_v32, %v1444_v45  ;;  %v6074_v50 = vpack.c.bf16 %v6350_v48, %v6349_v49  ;;  %v382_v45 = vld [vmem:[#allocation3 + $0x38] sm:$0xff] }
 0x5c3   :  { %v6491_v0 = vpop.eup %6490  ;;  %v1447_v3 = vmul.f32 %v6485_v5, %v1431_v34  ;;  %v1417_v60 = vmul.f32 %v6489_v52, %v1377_v14  ;;  %6071 = vmatprep.subr.bf16.mxu0 %v6070_v58  ;;  %v6086_v46 = vpack.c.bf16 %v382_v45, %v381_v41  ;;  %v385_v41 = vld [vmem:[#allocation3 + $0x50] sm:$0xff]  ;;  %v386_v45 = vld [vmem:[#allocation3 + $0x58] sm:$0xff] }
 0x5c4   :  { %v1446_v55 = vmul.f32 %v6487_v40, %v1430_v59  ;;  %v1416_v2 = vmul.f32 %v6491_v0, %v1374_v51  ;;  %5707 = vmatprep.mubr.msk.f32.mxu0 %vm1245_vm5, %v1460_v24  ;;  %6075 = vmatprep.subr.bf16.mxu1 %v6074_v50 }
 0x5c5   :  { %v1463_v22 = vmul.f32 %v6953_v28, %v1447_v3  ;;  %v1433_v7 = vsub.f32 2.0, %v1417_v60  ;;  %5708 = vmatmul.mubr.msk.f32.vlgmr.msra.gmra.mrb[22].mxu0 %vm1245_vm5, %v1461_v16  ;;  %v1389_v28 = vpop.xlane.xlu1 %1388 }
 0x5c6   :  { %v1432_v9 = vsub.f32 2.0, %v1416_v2  ;;  %6073 = vmatpush3.bf16.msra.mxu0 %v6070_v58  ;;  %v1462_v12 = vmul.f32 %v6950_v39, %v1446_v55  ;;  %6494 = vrcp.f32 %v1389_v28  ;;  %v6493_v10 = vpop.eup %6492 }
 0x5c7   :  { %v1449_v32 = vmul.f32 %v6489_v52, %v1433_v7 }
 0x5c8   :  { %v1448_v13 = vmul.f32 %v6491_v0, %v1432_v9  ;;  %5714 = vmatprep.mubr.msk.f32.mxu1 %vm1245_vm5, %v1462_v12 }
 0x5c9   :  { %v1465_v14 = vmul.f32 %v6961_v56, %v1449_v32  ;;  %5715 = vmatmul.mubr.msk.f32.vlgmr.msra.gmra.mrb[12].mxu1 %vm1245_vm5, %v1463_v22  ;;  %v1419_v56 = vmul.f32 %v6493_v10, %v7009_v30 }
 0x5ca   :  { %6077 = vmatpush3.bf16.msra.mxu1 %v6074_v50  ;;  %v1464_v15 = vmul.f32 %v6959_v31, %v1448_v13 }
 0x5cb   :  { %v1435_v25 = vsub.f32 2.0, %v1419_v56 }
 0x5cc   :  { %5721 = vmatprep.mubr.msk.f32.mxu0 %vm1245_vm5, %v1464_v15 }
 0x5cd   :  { %5722 = vmatmul.mubr.msk.f32.vlgmr.msra.gmra.mrb[24].mxu0 %vm1245_vm5, %v1465_v14  ;;  %v1451_v20 = vmul.f32 %v6493_v10, %v1435_v25 }
 0x5cf   :  { %v1467_v38 = vmul.f32 %v6971_v57, %v1451_v20 }
 0x5d0   :  { %v6495_v51 = vpop.eup %6494 }
 0x5d1   :  { %v1421_v35 = vmul.f32 %v6495_v51, %v1389_v28 }
 0x5d3   :  { %v1437_v33 = vsub.f32 2.0, %v1421_v35 }
 0x5d5   :  { %v1453_v62 = vmul.f32 %v6495_v51, %v1437_v33 }
 0x5d7   :  { %v1469_v1 = vmul.f32 %v6976_v6, %v1453_v62 }
 0x5ee   :  { %v1380_v39 = vpop.xlane.xlu1 %1379 }
 0x5ef   :  { %6496 = vrcp.f32 %v1380_v39 }
 0x5f2   :  { %v1386_v19 = vpop.xlane.xlu1 %1385 }
 0x5f3   :  { %6498 = vrcp.f32 %v1386_v19 }
 0x5f6   :  { %v6353_v21 = vpop.permute.xlu1 %6352 }
 0x5f7   :  { %v6355_v4 = vunpack.i.h.bf16 %v6353_v21  ;;  %v6354_v63 = vunpack.i.l.bf16 %v6353_v21  ;;  %v5249_v21 = vld [vmem:[#allocation3 + $0xa1] ss:$0 sm:$0xff] }
 0x5f9   :  { %v6497_v31 = vpop.eup %6496  ;;  %v6078_v26 = vpack.c.bf16 %v6355_v4, %v6354_v63 }
 0x5fa   :  { %v1418_v27 = vmul.f32 %v6497_v31, %v1380_v39 }
 0x5fb   :  { %6079 = vmatprep.subr.bf16.mxu0 %v6078_v26 }
 0x5fc   :  { %v1434_v11 = vsub.f32 2.0, %v1418_v27  ;;  %6081 = vmatpush3.bf16.msra.mxu0 %v6078_v26 }
 0x5fd   :  { %v6499_v29 = vpop.eup %6498 }
 0x5fe   :  { %v1450_v36 = vmul.f32 %v6497_v31, %v1434_v11  ;;  %v1420_v37 = vmul.f32 %v6499_v29, %v1386_v19 }
 0x600   :  { %v1436_v18 = vsub.f32 2.0, %v1420_v37  ;;  %v1466_v30 = vmul.f32 %v6986_v17, %v1450_v36  ;;  %v6082_v17 = vpack.c.bf16 %v380_v43, %v379_v42 }
 0x602   :  { %v1452_v5 = vmul.f32 %v6499_v29, %v1436_v18  ;;  %5728 = vmatprep.mubr.msk.f32.mxu1 %vm1245_vm5, %v1466_v30  ;;  %6083 = vmatprep.subr.bf16.mxu1 %v6082_v17 }
 0x603   :  { %5729 = vmatmul.mubr.msk.f32.vlgmr.msra.gmra.mrb[14].mxu1 %vm1245_vm5, %v1467_v38 }
 0x604   :  { %v1468_v61 = vmul.f32 %v6990_v23, %v1452_v5  ;;  %6085 = vmatpush3.bf16.msra.mxu1 %v6082_v17 }
 0x605   :  { %6087 = vmatprep.subr.bf16.mxu1 %v6086_v46 }
 0x606   :  { %5735 = vmatprep.mubr.msk.f32.mxu0 %vm1245_vm5, %v1468_v61 }
 0x607   :  { %5736 = vmatmul.mubr.msk.f32.vlgmr.msra.gmra.mrb[26].mxu0 %vm1245_vm5, %v1469_v1 }
 0x608   :  { %6089 = vmatpush3.bf16.msra.mxu1 %v6086_v46  ;;  %v6094_v46 = vpack.c.bf16 %v386_v45, %v385_v41 }
 0x68c   :  { %v5688_v40 = vpop.f32.mrb[16].mxu0 }
 0x68d   :  { %1558 = vst.msk [vmem:[#allocation2 + $0x8] sm:$0xff] %vm510_vm3, %v5688_v40  ;;  %v1548_v57 = vpop.f32.mrb[17].mxu0 }
 0x68e   :  { %1557 = vst.msk [vmem:[#allocation2] sm:$0xff] %vm510_vm3, %v1548_v57  ;;  %v383_v57 = vld [vmem:[#allocation3 + $0x40] sm:$0xff] }
 0x690   :  { %v5695_v23 = vpop.f32.mrb[18].mxu0 }
 0x691   :  { %1650 = vrot.lane.b32.xlu1 %v5695_v23, %s6630_s20  ;;  %v1637_v6 = vpop.f32.mrb[19].mxu0 }
 0x692   :  { %1648 = vrot.lane.b32.xlu0 %v1637_v6, %s6630_s20 }
 0x694   :  { %v5702_v48 = vpop.f32.mrb[20].mxu0 }
 0x695   :  { %1748 = vrot.lane.b32.xlu1 %v5702_v48, %s6642_s12  ;;  %v1735_v49 = vpop.f32.mrb[21].mxu0 }
 0x696   :  { %1746 = vrot.lane.b32.xlu0 %v1735_v49, %s6642_s12 }
 0x698   :  { %v5709_v16 = vpop.f32.mrb[22].mxu0 }
 0x699   :  { %1846 = vrot.lane.b32.xlu1 %v5709_v16, %s6643_s13  ;;  %v1833_v34 = vpop.f32.mrb[23].mxu0 }
 0x69a   :  { %1844 = vrot.lane.b32.xlu0 %v1833_v34, %s6643_s13 }
 0x69c   :  { %v5716_v58 = vpop.f32.mrb[12].mxu1 }
 0x69d   :  { %1941 = vst.msk [vmem:[#allocation2 + $0x18] sm:$0xff] %vm510_vm3, %v5716_v58  ;;  %v1931_v52 = vpop.f32.mrb[13].mxu1 }
 0x69e   :  { %1940 = vst.msk [vmem:[#allocation2 + $0x10] sm:$0xff] %vm510_vm3, %v1931_v52 }
 0x6a0   :  { %v5723_v59 = vpop.f32.mrb[24].mxu0 }
 0x6a1   :  { %2033 = vrot.lane.b32.xlu1 %v5723_v59, %s6630_s20  ;;  %v2020_v24 = vpop.f32.mrb[25].mxu0 }
 0x6a2   :  { %2031 = vrot.lane.b32.xlu0 %v2020_v24, %s6630_s20 }
 0x6d6   :  { %v5730_v50 = vpop.f32.mrb[14].mxu1 }
 0x6d7   :  { %v2117_v0 = vpop.f32.mrb[15].mxu1  ;;  %2130 = vrot.lane.b32.xlu1 %v5730_v50, %s6642_s12  ;;  %v387_v50 = vld [vmem:[#allocation3 + $0x60] sm:$0xff] }
 0x6d8   :  { %2128 = vrot.lane.b32.xlu0 %v2117_v0, %s6642_s12  ;;  %v388_v0 = vld [vmem:[#allocation3 + $0x68] sm:$0xff] }
 0x6da   :  { %v5737_v3 = vpop.f32.mrb[26].mxu0 }
 0x6db   :  { %2227 = vrot.lane.b32.xlu1 %v5737_v3, %s6643_s13  ;;  %v2214_v60 = vpop.f32.mrb[27].mxu0  ;;  %v389_v3 = vld [vmem:[#allocation3 + $0x70] sm:$0xff] }
 0x6dc   :  { %2225 = vrot.lane.b32.xlu0 %v2214_v60, %s6643_s13  ;;  %v6098_v60 = vpack.c.bf16 %v388_v0, %v387_v50 }
 0x6de   :  { %6099 = vmatprep.subr.bf16.mxu1 %v6098_v60 }
 0x703   :  { %v1651_v55 = vpop.permute.xlu1 %1650 }
 0x704   :  { %1656 = vst.msk [vmem:[#allocation2 + $0x8] sm:$0xff] %vm1654_vm6, %v1651_v55  ;;  %v1649_v2 = vpop.permute.xlu0 %1648  ;;  %v390_v55 = vld [vmem:[#allocation3 + $0x78] sm:$0xff] }
 0x705   :  { %1655 = vst.msk [vmem:[#allocation2] sm:$0xff] %vm1654_vm6, %v1649_v2  ;;  %v6102_v2 = vpack.c.bf16 %v390_v55, %v389_v3 }
 0x707   :  { %v1749_v22 = vpop.permute.xlu1 %1748 }
 0x708   :  { %1754 = vst.msk [vmem:[#allocation2 + $0x8] sm:$0xff] %vm1752_vm7, %v1749_v22  ;;  %v1747_v7 = vpop.permute.xlu0 %1746  ;;  %v391_v22 = vld [vmem:[#allocation3 + $0x80] sm:$0xff] }
 0x709   :  { %1753 = vst.msk [vmem:[#allocation2] sm:$0xff] %vm1752_vm7, %v1747_v7  ;;  %v392_v7 = vld [vmem:[#allocation3 + $0x88] sm:$0xff] }
 0x70b   :  { %v1847_v9 = vpop.permute.xlu1 %1846 }
 0x70c   :  { %1852 = vst.msk [vmem:[#allocation2 + $0x8] sm:$0xff] %vm1850_vm8, %v1847_v9  ;;  %v1845_v12 = vpop.permute.xlu0 %1844  ;;  %v6106_v9 = vpack.c.bf16 %v392_v7, %v391_v22 }
 0x70d   :  { %1851 = vst.msk [vmem:[#allocation2] sm:$0xff] %vm1850_vm8, %v1845_v12 }
 0x713   :  { %v2034_v32 = vpop.permute.xlu1 %2033  ;;  %v2234_v15 = vld [vmem:[#allocation2 + $0x8] sm:$0xff] }
 0x714   :  { %2038 = vst.msk [vmem:[#allocation2 + $0x18] sm:$0xff] %vm1654_vm6, %v2034_v32  ;;  %v2032_v13 = vpop.permute.xlu0 %2031  ;;  %v2233_v14 = vld [vmem:[#allocation2] sm:$0xff] }
 0x715   :  { %2037 = vst.msk [vmem:[#allocation2 + $0x10] sm:$0xff] %vm1654_vm6, %v2032_v13  ;;  %5746 = vmatprep.mubr.msk.f32.mxu1 %vm156_vm2, %v2233_v14 }
 0x716   :  { %5747 = vmatmul.mubr.msk.f32.vlgmr.msra.gmra.mrb[16].mxu1 %vm156_vm2, %v2234_v15 }
 0x717   :  { %6101 = vmatpush3.bf16.msra.mxu1 %v6098_v60 }
 0x718   :  { %6103 = vmatprep.subr.bf16.mxu1 %v6102_v2 }
 0x71b   :  { %6105 = vmatpush3.bf16.msra.mxu1 %v6102_v2 }
 0x71c   :  { %6107 = vmatprep.subr.bf16.mxu1 %v6106_v9 }
 0x71f   :  { %6109 = vmatpush3.bf16.msra.mxu1 %v6106_v9 }
 0x749   :  { %v2131_v28 = vpop.permute.xlu1 %2130 }
 0x74a   :  { %2135 = vst.msk [vmem:[#allocation2 + $0x18] sm:$0xff] %vm1752_vm7, %v2131_v28  ;;  %v2129_v39 = vpop.permute.xlu0 %2128 }
 0x74b   :  { %2134 = vst.msk [vmem:[#allocation2 + $0x10] sm:$0xff] %vm1752_vm7, %v2129_v39 }
 0x74d   :  { %v2228_v10 = vpop.permute.xlu1 %2227 }
 0x74e   :  { %2232 = vst.msk [vmem:[#allocation2 + $0x18] sm:$0xff] %vm1850_vm8, %v2228_v10  ;;  %v2226_v19 = vpop.permute.xlu0 %2225  ;;  %v5254_v10 = vld [vmem:[#allocation3 + $0xa2] ss:$0 sm:$0xff] }
 0x74f   :  { %2231 = vst.msk [vmem:[#allocation2 + $0x10] sm:$0xff] %vm1850_vm8, %v2226_v19 }
 0x755   :  { %v2236_v51 = vld [vmem:[#allocation2 + $0x18] sm:$0xff] }
 0x756   :  { %v2235_v56 = vld [vmem:[#allocation2 + $0x10] sm:$0xff] }
 0x757   :  { %5749 = vmatprep.mubr.msk.f32.mxu1 %vm156_vm2, %v2235_v56 }
 0x758   :  { %5750 = vmatmul.mubr.msk.f32.gmra.mrb[18].mxu1 %vm156_vm2, %v2236_v51 }
 0x7e9   :  { %v5748_v4 = vpop.f32.mrb[16].mxu1 }
 0x7ea   :  { %v2325_v63 = vadd.f32 %v5748_v4, %v5249_v21  ;;  %v2319_v31 = vpop.f32.mrb[17].mxu1 }
 0x7eb   :  { %v2320_v25 = vadd.f32 %v5249_v21, %v2319_v31 }
 0x7ec   :  { %v2339_v35 = vadd.f32 %v2325_v63, %v6708_v47 }
 0x7ed   :  { %v2338_v26 = vadd.f32 %v2320_v25, %v6706_v44 }
 0x7ee   :  { %v2345_v27 = vsel %vm156_vm2, %v2339_v35, 0.0 }
 0x7ef   :  { %2346 = vadd.xlane.f32.xlu1 %v2345_v27  ;;  %v2342_v11 = vsel %vm156_vm2, %v2338_v26, 0.0 }
 0x7f0   :  { %2343 = vadd.xlane.f32.xlu0 %v2342_v11 }
 0x82b   :  { %v5751_v29 = vpop.f32.mrb[18].mxu1 }
 0x82c   :  { %v2329_v20 = vpop.f32.mrb[19].mxu1  ;;  %v2335_v33 = vadd.f32 %v5751_v29, %v5249_v21 }
 0x82d   :  { %v2330_v36 = vadd.f32 %v5249_v21, %v2329_v20  ;;  %v5255_v21 = vld [vmem:[#allocation3 + $0xa3] ss:$0 sm:$0xff] }
 0x82e   :  { %v2341_v30 = vadd.f32 %v2335_v33, %v6716_v54  ;;  %v384_v54 = vld [vmem:[#allocation3 + $0x48] sm:$0xff] }
 0x82f   :  { %v2340_v37 = vadd.f32 %v2330_v36, %v6714_v53  ;;  %v6090_v17 = vpack.c.bf16 %v384_v54, %v383_v57 }
 0x830   :  { %v2351_v47 = vsel %vm156_vm2, %v2341_v30, 0.0 }
 0x831   :  { %v2348_v18 = vsel %vm156_vm2, %v2340_v37, 0.0  ;;  %6091 = vmatprep.subr.bf16.mxu0 %v6090_v17 }
 0x832   :  { %2349 = vadd.xlane.f32.xlu0 %v2348_v18  ;;  %6093 = vmatpush3.bf16.msra.mxu0 %v6090_v17 }
 0x833   :  { %6095 = vmatprep.subr.bf16.mxu0 %v6094_v46 }
 0x836   :  { %2352 = vadd.xlane.f32.xlu0 %v2351_v47  ;;  %6097 = vmatpush3.bf16.msra.mxu0 %v6094_v46 }
 0x87c   :  { %v2347_v44 = vpop.xlane.xlu1 %2346 }
 0x87d   :  { %v2356_v38 = vmul.f32 0.03125, %v2347_v44  ;;  %v2344_v62 = vpop.xlane.xlu0 %2343 }
 0x87e   :  { %v2355_v5 = vmul.f32 0.03125, %v2344_v62  ;;  %v393_v62 = vld [vmem:[#allocation3 + $0x90] sm:$0xff] }
 0x87f   :  { %v2360_v61 = vsub.f32 %v2339_v35, %v2356_v38 }
 0x880   :  { %v2359_v1 = vsub.f32 %v2338_v26, %v2355_v5  ;;  %v394_v5 = vld [vmem:[#allocation3 + $0x98] sm:$0xff] }
 0x881   :  { %v2364_v40 = vmul.f32 %v2360_v61, %v2360_v61 }
 0x882   :  { %v2363_v42 = vmul.f32 %v2359_v1, %v2359_v1 }
 0x883   :  { %v2370_v43 = vsel %vm156_vm2, %v2364_v40, 0.0 }
 0x884   :  { %2371 = vadd.xlane.f32.xlu0 %v2370_v43  ;;  %v2367_v53 = vsel %vm156_vm2, %v2363_v42, 0.0 }
 0x885   :  { %2368 = vadd.xlane.f32.xlu1 %v2367_v53 }
 0x8bf   :  { %v2350_v23 = vpop.xlane.xlu0 %2349 }
 0x8c0   :  { %v2357_v6 = vmul.f32 0.03125, %v2350_v23 }
 0x8c2   :  { %v2361_v48 = vsub.f32 %v2340_v37, %v2357_v6 }
 0x8c3   :  { %v2353_v49 = vpop.xlane.xlu0 %2352 }
 0x8c4   :  { %v2358_v16 = vmul.f32 0.03125, %v2353_v49  ;;  %v2365_v34 = vmul.f32 %v2361_v48, %v2361_v48 }
 0x8c6   :  { %v2362_v58 = vsub.f32 %v2341_v30, %v2358_v16  ;;  %v2373_v52 = vsel %vm156_vm2, %v2365_v34, 0.0 }
 0x8c7   :  { %2374 = vadd.xlane.f32.xlu1 %v2373_v52 }
 0x8c8   :  { %v2366_v59 = vmul.f32 %v2362_v58, %v2362_v58 }
 0x8ca   :  { %v2376_v24 = vsel %vm156_vm2, %v2366_v59, 0.0 }
 0x8cb   :  { %2377 = vadd.xlane.f32.xlu0 %v2376_v24 }
 0x911   :  { %v2372_v12 = vpop.xlane.xlu0 %2371 }
 0x912   :  { %v2380_v32 = vmul.f32 0.03125, %v2372_v12  ;;  %v2369_v13 = vpop.xlane.xlu1 %2368 }
 0x913   :  { %v2379_v14 = vmul.f32 0.03125, %v2369_v13 }
 0x914   :  { %v2384_v15 = vadd.f32 1e-05, %v2380_v32 }
 0x915   :  { %v2383_v28 = vadd.f32 1e-05, %v2379_v14 }
 0x916   :  { %6500 = vrsqrt.f32 %v2384_v15 }
 0x917   :  { %6502 = vrsqrt.f32 %v2383_v28 }
 0x920   :  { %v6501_v39 = vpop.eup %6500 }
 0x921   :  { %v6503_v19 = vpop.eup %6502  ;;  %v2392_v56 = vmul.f32 %v6501_v39, %v2360_v61  ;;  %v6110_v61 = vpack.c.bf16 %v394_v5, %v393_v62 }
 0x922   :  { %v2391_v51 = vmul.f32 %v6503_v19, %v2359_v1  ;;  %v5256_v1 = vld [vmem:[#allocation3 + $0xa4] ss:$0 sm:$0xff] }
 0x923   :  { %v2400_v4 = vmul.f32 %v5254_v10, %v2392_v56  ;;  %6111 = vmatprep.subr.bf16.mxu1 %v6110_v61 }
 0x924   :  { %v2399_v63 = vmul.f32 %v5254_v10, %v2391_v51  ;;  %6113 = vmatpush3.bf16.msra.mxu1 %v6110_v61  ;;  %v2690_v51 = vld [vmem:[#allocation3 + $0xa8] sm:$0xff] }
 0x925   :  { %v2408_v25 = vadd.f32 %v5255_v21, %v2400_v4 }
 0x926   :  { %v2407_v31 = vadd.f32 %v5255_v21, %v2399_v63  ;;  %v2692_v63 = vld [vmem:[#allocation3 + $0xb8] sm:$0xff] }
 0x928   :  { %5760 = vmatprep.mubr.msk.f32.mxu0 %vm156_vm2, %v2407_v31 }
 0x929   :  { %5761 = vmatmul.mubr.msk.f32.vlgmr.msra.gmra.mrb[28].mxu0 %vm156_vm2, %v2408_v25 }
 0x954   :  { %v2375_v35 = vpop.xlane.xlu1 %2374 }
 0x955   :  { %v2381_v26 = vmul.f32 0.03125, %v2375_v35 }
 0x957   :  { %v2385_v27 = vadd.f32 1e-05, %v2381_v26 }
 0x958   :  { %v2378_v11 = vpop.xlane.xlu0 %2377 }
 0x959   :  { %6504 = vrsqrt.f32 %v2385_v27  ;;  %v2382_v29 = vmul.f32 0.03125, %v2378_v11 }
 0x95b   :  { %v2386_v20 = vadd.f32 1e-05, %v2382_v29 }
 0x95d   :  { %6506 = vrsqrt.f32 %v2386_v20 }
 0x963   :  { %v6505_v33 = vpop.eup %6504 }
 0x964   :  { %v2393_v36 = vmul.f32 %v6505_v33, %v2361_v48  ;;  %v5261_v48 = vld [vmem:[#allocation3 + $0xa5] ss:$0 sm:$0xff] }
 0x966   :  { %v2401_v37 = vmul.f32 %v5254_v10, %v2393_v36 }
 0x967   :  { %v6507_v18 = vpop.eup %6506 }
 0x968   :  { %v2409_v30 = vadd.f32 %v5255_v21, %v2401_v37  ;;  %v2394_v47 = vmul.f32 %v6507_v18, %v2362_v58 }
 0x96a   :  { %5763 = vmatprep.mubr.msk.f32.mxu0 %vm156_vm2, %v2409_v30  ;;  %v2402_v44 = vmul.f32 %v5254_v10, %v2394_v47 }
 0x96c   :  { %v2410_v38 = vadd.f32 %v5255_v21, %v2402_v44  ;;  %v2691_v21 = vld [vmem:[#allocation3 + $0xb0] sm:$0xff] }
 0x96d   :  { %v6114_v4 = vpack.c.bf16 %v2691_v21, %v2690_v51 }
 0x96e   :  { %5764 = vmatmul.mubr.msk.f32.gmra.mrb[30].mxu0 %vm156_vm2, %v2410_v38 }
 0x96f   :  { %6115 = vmatprep.subr.bf16.mxu0 %v6114_v4 }
 0x970   :  { %6117 = vmatpush3.bf16.msra.mxu0 %v6114_v4 }
 0x9fc   :  { %v5762_v40 = vpop.f32.mrb[28].mxu0 }
 0x9fd   :  { %v2499_v42 = vadd.f32 %v5762_v40, %v5256_v1  ;;  %v2493_v43 = vpop.f32.mrb[29].mxu0 }
 0x9fe   :  { %v2494_v53 = vadd.f32 %v5256_v1, %v2493_v43 }
 0x9ff   :  { %v2513_v54 = vmax.f32 %v2499_v42, 0.0 }
 0xa00   :  { %v2512_v57 = vmax.f32 %v2494_v53, 0.0  ;;  %v5267_v53 = vld [vmem:[#allocation3 + $0xa7] ss:$0 sm:$0xff] }
 0xa02   :  { %5782 = vmatprep.mubr.msk.f32.mxu1 %vm2520_vm9, %v2512_v57 }
 0xa03   :  { %5783 = vmatmul.mubr.msk.f32.vlgmr.msra.gmra.mrb[20].mxu1 %vm2520_vm9, %v2513_v54 }
 0xa41   :  { %v5765_v17 = vpop.f32.mrb[30].mxu0 }
 0xa42   :  { %v2509_v41 = vadd.f32 %v5765_v17, %v5256_v1  ;;  %v2503_v45 = vpop.f32.mrb[31].mxu0 }
 0xa43   :  { %v2504_v46 = vadd.f32 %v5256_v1, %v2503_v45  ;;  %v5266_v1 = vld [vmem:[#allocation3 + $0xa6] ss:$0 sm:$0xff] }
 0xa44   :  { %v2515_v6 = vmax.f32 %v2509_v41, 0.0 }
 0xa45   :  { %v2514_v23 = vmax.f32 %v2504_v46, 0.0 }
 0xa47   :  { %5785 = vmatprep.mubr.msk.f32.mxu1 %vm2520_vm9, %v2514_v23 }
 0xa48   :  { %5786 = vmatmul.mubr.msk.f32.gmra.mrb[22].mxu1 %vm2520_vm9, %v2515_v6 }
 0xad6   :  { %v5784_v49 = vpop.f32.mrb[20].mxu1 }
 0xad7   :  { %v2605_v16 = vadd.f32 %v5784_v49, %v5261_v48  ;;  %v2599_v34 = vpop.f32.mrb[21].mxu1 }
 0xad8   :  { %v2600_v58 = vadd.f32 %v5261_v48, %v2599_v34 }
 0xad9   :  { %v2619_v52 = vadd.f32 %v2605_v16, %v2408_v25 }
 0xada   :  { %v2618_v59 = vadd.f32 %v2600_v58, %v2407_v31  ;;  %v2693_v31 = vld [vmem:[#allocation3 + $0xc0] sm:$0xff] }
 0xadb   :  { %v2625_v24 = vsel %vm156_vm2, %v2619_v52, 0.0  ;;  %v6118_v25 = vpack.c.bf16 %v2693_v31, %v2692_v63 }
 0xadc   :  { %2626 = vadd.xlane.f32.xlu0 %v2625_v24  ;;  %v2622_v50 = vsel %vm156_vm2, %v2618_v59, 0.0 }
 0xadd   :  { %2623 = vadd.xlane.f32.xlu1 %v2622_v50  ;;  %6119 = vmatprep.subr.bf16.mxu0 %v6118_v25 }
 0xade   :  { %6121 = vmatpush3.bf16.msra.mxu0 %v6118_v25 }
 0xb1b   :  { %v5787_v0 = vpop.f32.mrb[22].mxu1 }
 0xb1c   :  { %v2615_v3 = vadd.f32 %v5787_v0, %v5261_v48  ;;  %v2609_v60 = vpop.f32.mrb[23].mxu1 }
 0xb1d   :  { %v2610_v55 = vadd.f32 %v5261_v48, %v2609_v60 }
 0xb1e   :  { %v2621_v2 = vadd.f32 %v2615_v3, %v2410_v38  ;;  %v5268_v3 = vld [vmem:[#allocation3 + $0x148] ss:$0 sm:$0xff] }
 0xb1f   :  { %v2620_v22 = vadd.f32 %v2610_v55, %v2409_v30 }
 0xb20   :  { %v2631_v7 = vsel %vm156_vm2, %v2621_v2, 0.0 }
 0xb21   :  { %2632 = vadd.xlane.f32.xlu0 %v2631_v7  ;;  %v2628_v9 = vsel %vm156_vm2, %v2620_v22, 0.0 }
 0xb22   :  { %2629 = vadd.xlane.f32.xlu1 %v2628_v9 }
 0xb69   :  { %v2627_v12 = vpop.xlane.xlu0 %2626 }
 0xb6a   :  { %v2635_v32 = vmul.f32 0.03125, %v2627_v12  ;;  %v2624_v13 = vpop.xlane.xlu1 %2623 }
 0xb6b   :  { %v2634_v14 = vmul.f32 0.03125, %v2624_v13 }
 0xb6c   :  { %v2639_v15 = vsub.f32 %v2619_v52, %v2635_v32 }
 0xb6d   :  { %v2638_v28 = vsub.f32 %v2618_v59, %v2634_v14 }
 0xb6e   :  { %v2643_v39 = vmul.f32 %v2639_v15, %v2639_v15 }
 0xb6f   :  { %v2642_v10 = vmul.f32 %v2638_v28, %v2638_v28 }
 0xb70   :  { %v2649_v19 = vsel %vm156_vm2, %v2643_v39, 0.0 }
 0xb71   :  { %2650 = vadd.xlane.f32.xlu0 %v2649_v19  ;;  %v2646_v56 = vsel %vm156_vm2, %v2642_v10, 0.0 }
 0xb72   :  { %2647 = vadd.xlane.f32.xlu1 %v2646_v56 }
 0xbae   :  { %v2633_v35 = vpop.xlane.xlu0 %2632 }
 0xbaf   :  { %v2637_v26 = vmul.f32 0.03125, %v2633_v35  ;;  %v2630_v27 = vpop.xlane.xlu1 %2629 }
 0xbb0   :  { %v2636_v11 = vmul.f32 0.03125, %v2630_v27 }
 0xbb1   :  { %v2641_v29 = vsub.f32 %v2621_v2, %v2637_v26 }
 0xbb2   :  { %v2640_v20 = vsub.f32 %v2620_v22, %v2636_v11 }
 0xbb3   :  { %v2645_v33 = vmul.f32 %v2641_v29, %v2641_v29 }
 0xbb4   :  { %v2644_v36 = vmul.f32 %v2640_v20, %v2640_v20 }
 0xbb5   :  { %v2655_v37 = vsel %vm156_vm2, %v2645_v33, 0.0 }
 0xbb6   :  { %2656 = vadd.xlane.f32.xlu0 %v2655_v37  ;;  %v2652_v18 = vsel %vm156_vm2, %v2644_v36, 0.0 }
 0xbb7   :  { %2653 = vadd.xlane.f32.xlu1 %v2652_v18 }
 0xbfe   :  { %v2651_v30 = vpop.xlane.xlu0 %2650 }
 0xbff   :  { %v2659_v47 = vmul.f32 0.03125, %v2651_v30  ;;  %v2648_v44 = vpop.xlane.xlu1 %2647 }
 0xc00   :  { %v2658_v38 = vmul.f32 0.03125, %v2648_v44 }
 0xc01   :  { %v2663_v62 = vadd.f32 1e-05, %v2659_v47 }
 0xc02   :  { %v2662_v5 = vadd.f32 1e-05, %v2658_v38 }
 0xc03   :  { %6508 = vrsqrt.f32 %v2663_v62 }
 0xc04   :  { %6510 = vrsqrt.f32 %v2662_v5 }
 0xc0d   :  { %v6509_v61 = vpop.eup %6508 }
 0xc0e   :  { %v6511_v40 = vpop.eup %6510  ;;  %v2671_v42 = vmul.f32 %v6509_v61, %v2639_v15 }
 0xc0f   :  { %v2670_v43 = vmul.f32 %v6511_v40, %v2638_v28 }
 0xc10   :  { %v2679_v57 = vmul.f32 %v5266_v1, %v2671_v42 }
 0xc11   :  { %v2678_v54 = vmul.f32 %v5266_v1, %v2670_v43 }
 0xc12   :  { %v7103_v41 = vadd.f32 %v5267_v53, %v2679_v57 }
 0xc13   :  { %v7101_v17 = vadd.f32 %v5267_v53, %v2678_v54 }
 0xc15   :  { %5796 = vmatprep.mubr.msk.f32.mxu0 %vm156_vm2, %v7101_v17 }
 0xc16   :  { %5797 = vmatmul.mubr.msk.f32.vlgmr.msra.gmra.mrb[32].mxu0 %vm156_vm2, %v7103_v41 }
 0xc43   :  { %v2657_v45 = vpop.xlane.xlu0 %2656 }
 0xc44   :  { %v2661_v46 = vmul.f32 0.03125, %v2657_v45  ;;  %v2654_v23 = vpop.xlane.xlu1 %2653 }
 0xc45   :  { %v2660_v6 = vmul.f32 0.03125, %v2654_v23 }
 0xc46   :  { %v2665_v48 = vadd.f32 1e-05, %v2661_v46 }
 0xc47   :  { %v2664_v49 = vadd.f32 1e-05, %v2660_v6 }
 0xc48   :  { %6512 = vrsqrt.f32 %v2665_v48 }
 0xc49   :  { %6514 = vrsqrt.f32 %v2664_v49 }
 0xc52   :  { %v6513_v16 = vpop.eup %6512 }
 0xc53   :  { %v6515_v34 = vpop.eup %6514  ;;  %v2673_v58 = vmul.f32 %v6513_v16, %v2641_v29 }
 0xc54   :  { %v2672_v52 = vmul.f32 %v6515_v34, %v2640_v20 }
 0xc55   :  { %v2681_v59 = vmul.f32 %v5266_v1, %v2673_v58 }
 0xc56   :  { %v2680_v24 = vmul.f32 %v5266_v1, %v2672_v52 }
 0xc57   :  { %v7111_v0 = vadd.f32 %v5267_v53, %v2681_v59 }
 0xc58   :  { %v7109_v50 = vadd.f32 %v5267_v53, %v2680_v24 }
 0xc5a   :  { %5799 = vmatprep.mubr.msk.f32.mxu0 %vm156_vm2, %v7109_v50 }
 0xc5b   :  { %5800 = vmatmul.mubr.msk.f32.gmra.mrb[34].mxu0 %vm156_vm2, %v7111_v0 }
 0xce9   :  { %v5798_v60 = vpop.f32.mrb[32].mxu0 }
 0xcea   :  { %v2806_v55 = vadd.f32 %v5798_v60, %v5268_v3  ;;  %v2800_v2 = vpop.f32.mrb[33].mxu0 }
 0xceb   :  { %v2801_v22 = vadd.f32 %v5268_v3, %v2800_v2 }
 0xced   :  { %5806 = vmatprep.mubr.msk.f32.mxu0 %vm510_vm3, %v2801_v22  ;;  %v7118_v7 = vpack.i.bf16 %v2806_v55, %v2801_v22 }
 0xcef   :  { %6362 = vrot.lane.b32.xlu0 %v7118_v7, %s6633_s0  ;;  %6357 = vrot.lane.b32.xlu1 %v7118_v7, %s6631_s1 }
 0xcf3   :  { %2910 = vrot.lane.b32.xlu0 %v2801_v22, %s6634_s4  ;;  %2912 = vrot.lane.b32.xlu1 %v2806_v55, %s6634_s4 }
 0xcf7   :  { %3003 = vrot.lane.b32.xlu0 %v2801_v22, %s6637_s7  ;;  %6367 = vrot.lane.b32.xlu1 %v7118_v7, %s6635_s5 }
 0xcfb   :  { %6372 = vrot.lane.b32.xlu1 %v7118_v7, %s6636_s6 }
 0xcff   :  { %3005 = vrot.lane.b32.xlu1 %v2806_v55, %s6637_s7 }
 0xd2e   :  { %v5801_v9 = vpop.f32.mrb[34].mxu0 }
 0xd2f   :  { %v7132_v12 = vadd.f32 %v5801_v9, %v5268_v3  ;;  %v2810_v32 = vpop.f32.mrb[35].mxu0 }
 0xd30   :  { %v2811_v13 = vadd.f32 %v5268_v3, %v2810_v32 }
 0xd32   :  { %v7135_v14 = vpack.i.bf16 %v7132_v12, %v2811_v13 }
 0xd34   :  { %6382 = vrot.lane.b32.xlu1 %v7135_v14, %s6633_s0  ;;  %6377 = vrot.lane.b32.xlu0 %v7135_v14, %s6631_s1 }
 0xd38   :  { %3098 = vrot.lane.b32.xlu1 %v2806_v55, %s6638_s8  ;;  %3096 = vrot.lane.b32.xlu0 %v2801_v22, %s6638_s8 }
 0xd3c   :  { %6392 = vrot.lane.b32.xlu1 %v7135_v14, %s6636_s6  ;;  %6387 = vrot.lane.b32.xlu0 %v7135_v14, %s6635_s5 }
 0xd40   :  { %3282 = vrot.lane.b32.xlu1 %v7132_v12, %s6634_s4  ;;  %3280 = vrot.lane.b32.xlu0 %v2811_v13, %s6634_s4 }
 0xd44   :  { %3375 = vrot.lane.b32.xlu1 %v7132_v12, %s6637_s7  ;;  %3373 = vrot.lane.b32.xlu0 %v2811_v13, %s6637_s7 }
 0xd48   :  { %3468 = vrot.lane.b32.xlu1 %v7132_v12, %s6638_s8  ;;  %3466 = vrot.lane.b32.xlu0 %v2811_v13, %s6638_s8 }
 0xd4c   :  { %6397 = vrot.lane.b32.xlu1 %v7118_v7, %s6632_s3 }
 0xd61   :  { %v6358_v15 = vpop.permute.xlu1 %6357  ;;  %v6363_v28 = vpop.permute.xlu0 %6362 }
 0xd62   :  { %v6360_v39 = vunpack.i.h.bf16 %v6358_v15  ;;  %v6359_v10 = vunpack.i.l.bf16 %v6358_v15  ;;  %v6365_v19 = vunpack.i.h.bf16 %v6363_v28  ;;  %v6364_v56 = vunpack.i.l.bf16 %v6363_v28 }
 0xd64   :  { %v6122_v51 = vpack.c.bf16 %v6360_v39, %v6359_v10  ;;  %v6128_v21 = vpack.c.bf16 %v6365_v19, %v6364_v56 }
 0xd65   :  { %v2913_v4 = vpop.permute.xlu1 %2912  ;;  %v2911_v63 = vpop.permute.xlu0 %2910 }
 0xd66   :  { %6124 = vmatprep.subr.msk.bf16.mxu0 %vm6775_vm4, %v6122_v51  ;;  %6130 = vmatprep.subr.msk.bf16.mxu1 %vm6775_vm4, %v6128_v21 }
 0xd67   :  { %5813 = vmatprep.mubr.msk.f32.mxu1 %vm510_vm3, %v2911_v63  ;;  %6127 = vmatpush3.bf16.xpose.msk.msra.mxu0 %vm6775_vm4, %v6122_v51 }
 0xd68   :  { %6133 = vmatpush3.bf16.xpose.msk.msra.mxu1 %vm6775_vm4, %v6128_v21 }
 0xd69   :  { %v6368_v31 = vpop.permute.xlu1 %6367  ;;  %v3004_v20 = vpop.permute.xlu0 %3003 }
 0xd6a   :  { %v6370_v25 = vunpack.i.h.bf16 %v6368_v31  ;;  %v6369_v35 = vunpack.i.l.bf16 %v6368_v31 }
 0xd6c   :  { %v6134_v26 = vpack.c.bf16 %v6370_v25, %v6369_v35 }
 0xd6d   :  { %v6373_v27 = vpop.permute.xlu1 %6372 }
 0xd6e   :  { %v6375_v11 = vunpack.i.h.bf16 %v6373_v27  ;;  %v6374_v29 = vunpack.i.l.bf16 %v6373_v27  ;;  %5807 = vmatmul.mubr.msk.f32.vlgmr.msra.gmra.mrb[36].mxu0 %vm510_vm3, %v2806_v55  ;;  %6136 = vmatprep.subr.msk.bf16.mxu0 %vm6775_vm4, %v6134_v26 }
 0xd6f   :  { %5814 = vmatmul.mubr.msk.f32.vlgmr.msra.gmra.mrb[24].mxu1 %vm510_vm3, %v2913_v4  ;;  %6139 = vmatpush3.bf16.xpose.msk.msra.mxu0 %vm6775_vm4, %v6134_v26 }
 0xd70   :  { %v6140_v33 = vpack.c.bf16 %v6375_v11, %v6374_v29  ;;  %5820 = vmatprep.mubr.msk.f32.mxu0 %vm510_vm3, %v3004_v20 }
 0xd71   :  { %v3006_v36 = vpop.permute.xlu1 %3005 }
 0xd72   :  { %6142 = vmatprep.subr.msk.bf16.mxu1 %vm6775_vm4, %v6140_v33 }
 0xd73   :  { %6145 = vmatpush3.bf16.xpose.msk.msra.mxu1 %vm6775_vm4, %v6140_v33 }
 0xd76   :  { %5821 = vmatmul.mubr.msk.f32.vlgmr.msra.gmra.mrb[38].mxu0 %vm510_vm3, %v3006_v36 }
 0xd77   :  { %5834 = vmatprep.mubr.msk.f32.mxu0 %vm510_vm3, %v2811_v13 }
 0xda6   :  { %v6383_v37 = vpop.permute.xlu1 %6382  ;;  %v6378_v18 = vpop.permute.xlu0 %6377 }
 0xda7   :  { %v6385_v30 = vunpack.i.h.bf16 %v6383_v37  ;;  %v6384_v47 = vunpack.i.l.bf16 %v6383_v37  ;;  %v6380_v44 = vunpack.i.h.bf16 %v6378_v18  ;;  %v6379_v38 = vunpack.i.l.bf16 %v6378_v18 }
 0xda9   :  { %v6152_v62 = vpack.c.bf16 %v6385_v30, %v6384_v47  ;;  %v6146_v5 = vpack.c.bf16 %v6380_v44, %v6379_v38 }
 0xdaa   :  { %v3099_v61 = vpop.permute.xlu1 %3098  ;;  %v3097_v1 = vpop.permute.xlu0 %3096 }
 0xdab   :  { %5827 = vmatprep.mubr.msk.f32.mxu1 %vm510_vm3, %v3097_v1  ;;  %6148 = vmatprep.subr.msk.bf16.mxu0 %vm6775_vm4, %v6146_v5 }
 0xdac   :  { %6154 = vmatprep.subr.msk.bf16.mxu1 %vm6775_vm4, %v6152_v62  ;;  %5828 = vmatmul.mubr.msk.f32.vlgmr.msra.gmra.mrb[26].mxu1 %vm510_vm3, %v3099_v61 }
 0xdad   :  { %6151 = vmatpush3.bf16.xpose.msk.msra.mxu0 %vm6775_vm4, %v6146_v5  ;;  %6157 = vmatpush3.bf16.xpose.msk.msra.mxu1 %vm6775_vm4, %v6152_v62 }
 0xdae   :  { %v6393_v40 = vpop.permute.xlu1 %6392  ;;  %v6388_v42 = vpop.permute.xlu0 %6387 }
 0xdaf   :  { %v6395_v43 = vunpack.i.h.bf16 %v6393_v40  ;;  %v6394_v53 = vunpack.i.l.bf16 %v6393_v40  ;;  %v6390_v57 = vunpack.i.h.bf16 %v6388_v42  ;;  %v6389_v54 = vunpack.i.l.bf16 %v6388_v42 }
 0xdb1   :  { %v6164_v45 = vpack.c.bf16 %v6395_v43, %v6394_v53  ;;  %v6158_v46 = vpack.c.bf16 %v6390_v57, %v6389_v54 }
 0xdb2   :  { %v3283_v23 = vpop.permute.xlu1 %3282  ;;  %v3281_v6 = vpop.permute.xlu0 %3280 }
 0xdb3   :  { %5841 = vmatprep.mubr.msk.f32.mxu1 %vm510_vm3, %v3281_v6  ;;  %6160 = vmatprep.subr.msk.bf16.mxu0 %vm6775_vm4, %v6158_v46 }
 0xdb4   :  { %5835 = vmatmul.mubr.msk.f32.vlgmr.msra.gmra.mrb[40].mxu0 %vm510_vm3, %v7132_v12  ;;  %6166 = vmatprep.subr.msk.bf16.mxu1 %vm6775_vm4, %v6164_v45 }
 0xdb5   :  { %5842 = vmatmul.mubr.msk.f32.vlgmr.msra.gmra.mrb[28].mxu1 %vm510_vm3, %v3283_v23  ;;  %6163 = vmatpush3.bf16.xpose.msk.msra.mxu0 %vm6775_vm4, %v6158_v46 }
 0xdb6   :  { %6169 = vmatpush3.bf16.xpose.msk.msra.mxu1 %vm6775_vm4, %v6164_v45  ;;  %v3376_v48 = vpop.permute.xlu1 %3375  ;;  %v3374_v49 = vpop.permute.xlu0 %3373 }
 0xdb7   :  { %5848 = vmatprep.mubr.msk.f32.mxu0 %vm510_vm3, %v3374_v49 }
 0xdba   :  { %v3469_v16 = vpop.permute.xlu1 %3468  ;;  %v3467_v34 = vpop.permute.xlu0 %3466 }
 0xdbb   :  { %5855 = vmatprep.mubr.msk.f32.mxu1 %vm510_vm3, %v3467_v34 }
 0xdbc   :  { %5849 = vmatmul.mubr.msk.f32.vlgmr.msra.gmra.mrb[42].mxu0 %vm510_vm3, %v3376_v48 }
 0xdbd   :  { %5856 = vmatmul.mubr.msk.f32.vlgmr.msra.gmra.mrb[30].mxu1 %vm510_vm3, %v3469_v16 }
 0xdbe   :  { %v6398_v58 = vpop.permute.xlu1 %6397 }
 0xdbf   :  { %v6400_v52 = vunpack.i.h.bf16 %v6398_v58  ;;  %v6399_v59 = vunpack.i.l.bf16 %v6398_v58 }
 0xdc1   :  { %v6170_v24 = vpack.c.bf16 %v6400_v52, %v6399_v59 }
 0xdc3   :  { %6171 = vmatprep.subr.bf16.mxu0 %v6170_v24 }
 0xdc4   :  { %6173 = vmatpush3.bf16.msra.mxu0 %v6170_v24 }
 0xe41   :  { %v5808_v8 = vpop.f32.mrb[36].mxu0 }
 0xe42   :  { %v7206_v3 = vmul.f32 0.35355338, %v5808_v8  ;;  %v5815_v60 = vpop.f32.mrb[24].mxu1  ;;  %v2899_v55 = vpop.f32.mrb[37].mxu0 }
 0xe43   :  { %v7208_v2 = vmul.f32 0.35355338, %v5815_v60  ;;  %v2992_v22 = vpop.f32.mrb[25].mxu1  ;;  %v7212_v12 = vmul.f32 0.35355338, %v2899_v55 }
 0xe44   :  { %v3562_v9 = vsel %vm1245_vm5, %v7206_v3, -inf  ;;  %v7216_v13 = vmul.f32 0.35355338, %v2992_v22 }
 0xe45   :  { %3563 = vmax.xlane.f32.xlu1 %v3562_v9  ;;  %v3568_v32 = vsel %vm1245_vm5, %v7208_v2, -inf  ;;  %v3559_v28 = vsel %vm1245_vm5, %v7212_v12, -inf }
 0xe46   :  { %3569 = vmax.xlane.f32.xlu0 %v3568_v32  ;;  %v3565_v56 = vsel %vm1245_vm5, %v7216_v13, -inf }
 0xe49   :  { %v5822_v15 = vpop.f32.mrb[38].mxu0 }
 0xe4a   :  { %3560 = vmax.xlane.f32.xlu0 %v3559_v28  ;;  %v3085_v39 = vpop.f32.mrb[39].mxu0  ;;  %v7222_v19 = vmul.f32 0.35355338, %v5822_v15 }
 0xe4b   :  { %v7220_v10 = vmul.f32 0.35355338, %v3085_v39 }
 0xe4c   :  { %v3574_v21 = vsel %vm1245_vm5, %v7222_v19, -inf }
 0xe4d   :  { %v3571_v51 = vsel %vm1245_vm5, %v7220_v10, -inf }
 0xe4e   :  { %3566 = vmax.xlane.f32.xlu0 %v3565_v56  ;;  %3572 = vmax.xlane.f32.xlu1 %v3571_v51 }
 0xe52   :  { %3575 = vmax.xlane.f32.xlu0 %v3574_v21 }
 0xe7f   :  { %v5829_v4 = vpop.f32.mrb[26].mxu1 }
 0xe80   :  { %v7230_v63 = vmul.f32 0.35355338, %v5829_v4  ;;  %v3178_v31 = vpop.f32.mrb[27].mxu1 }
 0xe81   :  { %v7232_v25 = vmul.f32 0.35355338, %v3178_v31 }
 0xe82   :  { %v3580_v35 = vsel %vm1245_vm5, %v7230_v63, -inf }
 0xe83   :  { %3581 = vmax.xlane.f32.xlu0 %v3580_v35  ;;  %v3577_v26 = vsel %vm1245_vm5, %v7232_v25, -inf }
 0xe84   :  { %3578 = vmax.xlane.f32.xlu1 %v3577_v26 }
 0xe87   :  { %v5836_v27 = vpop.f32.mrb[40].mxu0 }
 0xe88   :  { %v7238_v11 = vmul.f32 0.35355338, %v5836_v27  ;;  %v3269_v29 = vpop.f32.mrb[41].mxu0  ;;  %v5843_v20 = vpop.f32.mrb[28].mxu1 }
 0xe89   :  { %v7240_v33 = vmul.f32 0.35355338, %v3269_v29  ;;  %v3362_v36 = vpop.f32.mrb[29].mxu1  ;;  %v7242_v37 = vmul.f32 0.35355338, %v5843_v20 }
 0xe8a   :  { %v3586_v18 = vsel %vm1245_vm5, %v7238_v11, -inf  ;;  %v7246_v30 = vmul.f32 0.35355338, %v3362_v36 }
 0xe8b   :  { %3587 = vmax.xlane.f32.xlu0 %v3586_v18  ;;  %v3583_v47 = vsel %vm1245_vm5, %v7240_v33, -inf  ;;  %v3592_v44 = vsel %vm1245_vm5, %v7242_v37, -inf }
 0xe8c   :  { %3584 = vmax.xlane.f32.xlu1 %v3583_v47  ;;  %v3589_v62 = vsel %vm1245_vm5, %v7246_v30, -inf }
 0xe8f   :  { %v5850_v38 = vpop.f32.mrb[42].mxu0  ;;  %3593 = vmax.xlane.f32.xlu0 %v3592_v44 }
 0xe90   :  { %v7254_v5 = vmul.f32 0.35355338, %v5850_v38  ;;  %v3455_v61 = vpop.f32.mrb[43].mxu0  ;;  %v5857_v1 = vpop.f32.mrb[30].mxu1  ;;  %3590 = vmax.xlane.f32.xlu1 %v3589_v62 }
 0xe91   :  { %v3548_v40 = vpop.f32.mrb[31].mxu1  ;;  %v7256_v42 = vmul.f32 0.35355338, %v5857_v1  ;;  %v7270_v57 = vmul.f32 0.35355338, %v3455_v61 }
 0xe92   :  { %v3598_v43 = vsel %vm1245_vm5, %v7254_v5, -inf  ;;  %v7272_v54 = vmul.f32 0.35355338, %v3548_v40 }
 0xe93   :  { %3599 = vmax.xlane.f32.xlu0 %v3598_v43  ;;  %v3604_v53 = vsel %vm1245_vm5, %v7256_v42, -inf  ;;  %v3595_v45 = vsel %vm1245_vm5, %v7270_v57, -inf }
 0xe94   :  { %v3601_v46 = vsel %vm1245_vm5, %v7272_v54, -inf }
 0xe97   :  { %3605 = vmax.xlane.f32.xlu0 %v3604_v53 }
 0xea1   :  { %6407 = vrot.lane.b32.xlu1 %v7118_v7, %s6641_s11 }
 0xea5   :  { %6412 = vrot.lane.b32.xlu1 %v7118_v7, %s6640_s10 }
 0xead   :  { %6402 = vrot.lane.b32.xlu0 %v7118_v7, %s6639_s9 }
 0xeb1   :  { %6417 = vrot.lane.b32.xlu0 %v7135_v14, %s6632_s3 }
 0xec9   :  { %3596 = vmax.xlane.f32.xlu1 %v3595_v45 }
 0xecd   :  { %3602 = vmax.xlane.f32.xlu1 %v3601_v46 }
 0xed2   :  { %v3564_v23 = vpop.xlane.xlu1 %3563 }
 0xed3   :  { %v3608_v6 = vsub.f32 %v7206_v3, %v3564_v23  ;;  %v3570_v48 = vpop.xlane.xlu0 %3569 }
 0xed4   :  { %v3610_v7 = vsub.f32 %v7208_v2, %v3570_v48 }
 0xed5   :  { %v3625_v49 = vmul.f32 1.442695, %v3608_v6 }
 0xed6   :  { %v3629_v16 = vmul.f32 1.442695, %v3610_v7 }
 0xed7   :  { %6516 = vpow2.f32 %v3625_v49  ;;  %v3561_v34 = vpop.xlane.xlu0 %3560 }
 0xed8   :  { %6518 = vpow2.f32 %v3629_v16  ;;  %v3607_v2 = vsub.f32 %v7212_v12, %v3561_v34 }
 0xeda   :  { %v3623_v32 = vmul.f32 1.442695, %v3607_v2 }
 0xedb   :  { %v3567_v58 = vpop.xlane.xlu0 %3566  ;;  %v3573_v28 = vpop.xlane.xlu1 %3572 }
 0xedc   :  { %v3609_v15 = vsub.f32 %v7216_v13, %v3567_v58 }
 0xede   :  { %6422 = vrot.lane.b32.xlu1 %v7135_v14, %s6639_s9  ;;  %v3627_v39 = vmul.f32 1.442695, %v3609_v15 }
 0xedf   :  { %v3576_v52 = vpop.xlane.xlu0 %3575 }
 0xee0   :  { %v3612_v59 = vsub.f32 %v7222_v19, %v3576_v52  ;;  %v3611_v19 = vsub.f32 %v7220_v10, %v3573_v28 }
 0xee1   :  { %v7283_v24 = vpop.eup %6516 }
 0xee2   :  { %v3633_v8 = vmul.f32 1.442695, %v3612_v59  ;;  %v3658_v3 = vsel %vm1245_vm5, %v7283_v24, 0.0  ;;  %v7287_v60 = vpop.eup %6518  ;;  %v3631_v56 = vmul.f32 1.442695, %v3611_v19 }
 0xee3   :  { %3659 = vadd.xlane.f32.xlu0 %v3658_v3  ;;  %v3664_v55 = vsel %vm1245_vm5, %v7287_v60, 0.0 }
 0xee4   :  { %6520 = vpow2.f32 %v3633_v8 }
 0xee5   :  { %6522 = vpow2.f32 %v3623_v32 }
 0xee6   :  { %6524 = vpow2.f32 %v3627_v39 }
 0xee7   :  { %3665 = vadd.xlane.f32.xlu0 %v3664_v55  ;;  %6526 = vpow2.f32 %v3631_v56 }
 0xeee   :  { %v7292_v22 = vpop.eup %6520 }
 0xeef   :  { %v3670_v9 = vsel %vm1245_vm5, %v7292_v22, 0.0  ;;  %v7298_v51 = vpop.eup %6522 }
 0xef0   :  { %3671 = vadd.xlane.f32.xlu0 %v3670_v9  ;;  %v3655_v12 = vsel %vm1245_vm5, %v7298_v51, 0.0  ;;  %v7302_v21 = vpop.eup %6524 }
 0xef1   :  { %v3661_v13 = vsel %vm1245_vm5, %v7302_v21, 0.0  ;;  %v7306_v4 = vpop.eup %6526 }
 0xef2   :  { %v3667_v10 = vsel %vm1245_vm5, %v7306_v4, 0.0 }
 0xf02   :  { %3656 = vadd.xlane.f32.xlu1 %v3655_v12 }
 0xf06   :  { %3662 = vadd.xlane.f32.xlu1 %v3661_v13 }
 0xf0a   :  { %3668 = vadd.xlane.f32.xlu1 %v3667_v10 }
 0xf10   :  { %v3582_v31 = vpop.xlane.xlu0 %3581 }
 0xf11   :  { %v3614_v35 = vsub.f32 %v7230_v63, %v3582_v31  ;;  %v3579_v26 = vpop.xlane.xlu1 %3578 }
 0xf12   :  { %v3613_v27 = vsub.f32 %v7232_v25, %v3579_v26 }
 0xf13   :  { %v3637_v29 = vmul.f32 1.442695, %v3614_v35 }
 0xf14   :  { %v3635_v20 = vmul.f32 1.442695, %v3613_v27 }
 0xf15   :  { %6528 = vpow2.f32 %v3637_v29 }
 0xf16   :  { %6530 = vpow2.f32 %v3635_v20 }
 0xf18   :  { %v3588_v36 = vpop.xlane.xlu0 %3587 }
 0xf19   :  { %v3616_v18 = vsub.f32 %v7238_v11, %v3588_v36  ;;  %v3585_v47 = vpop.xlane.xlu1 %3584 }
 0xf1a   :  { %v3615_v44 = vsub.f32 %v7240_v33, %v3585_v47 }
 0xf1b   :  { %v3641_v38 = vmul.f32 1.442695, %v3616_v18 }
 0xf1c   :  { %v3639_v62 = vmul.f32 1.442695, %v3615_v44  ;;  %v3594_v61 = vpop.xlane.xlu0 %3593 }
 0xf1d   :  { %6532 = vpow2.f32 %v3641_v38  ;;  %v3618_v1 = vsub.f32 %v7242_v37, %v3594_v61  ;;  %v3591_v63 = vpop.xlane.xlu1 %3590 }
 0xf1e   :  { %6534 = vpow2.f32 %v3639_v62  ;;  %v3617_v25 = vsub.f32 %v7246_v30, %v3591_v63 }
 0xf1f   :  { %v7316_v40 = vpop.eup %6528  ;;  %v3645_v43 = vmul.f32 1.442695, %v3618_v1 }
 0xf20   :  { %v7318_v53 = vpop.eup %6530  ;;  %v3643_v45 = vmul.f32 1.442695, %v3617_v25  ;;  %v3600_v11 = vpop.xlane.xlu0 %3599  ;;  %v3676_v33 = vsel %vm1245_vm5, %v7316_v40, 0.0 }
 0xf21   :  { %6536 = vpow2.f32 %v3645_v43  ;;  %v3620_v46 = vsub.f32 %v7254_v5, %v3600_v11  ;;  %v6408_v23 = vpop.permute.xlu1 %6407  ;;  %3677 = vadd.xlane.f32.xlu0 %v3676_v33  ;;  %v3673_v37 = vsel %vm1245_vm5, %v7318_v53, 0.0 }
 0xf22   :  { %6538 = vpow2.f32 %v3643_v45  ;;  %v6410_v30 = vunpack.i.h.bf16 %v6408_v23  ;;  %v6409_v6 = vunpack.i.l.bf16 %v6408_v23  ;;  %3674 = vadd.xlane.f32.xlu1 %v3673_v37 }
 0xf23   :  { %v3649_v48 = vmul.f32 1.442695, %v3620_v46 }
 0xf24   :  { %v6178_v7 = vpack.c.bf16 %v6410_v30, %v6409_v6  ;;  %v3606_v49 = vpop.xlane.xlu0 %3605 }
 0xf25   :  { %6540 = vpow2.f32 %v3649_v48  ;;  %v3622_v16 = vsub.f32 %v7256_v42, %v3606_v49  ;;  %v6413_v35 = vpop.permute.xlu1 %6412 }
 0xf26   :  { %6179 = vmatprep.subr.bf16.mxu1 %v6178_v7 }
 0xf27   :  { %v7326_v34 = vpop.eup %6532  ;;  %v3653_v58 = vmul.f32 1.442695, %v3622_v16  ;;  %6181 = vmatpush3.bf16.msra.mxu1 %v6178_v7 }
 0xf28   :  { %v7328_v5 = vpop.eup %6534  ;;  %v6403_v52 = vpop.permute.xlu0 %6402  ;;  %v3682_v59 = vsel %vm1245_vm5, %v7326_v34, 0.0 }
 0xf29   :  { %6542 = vpow2.f32 %v3653_v58  ;;  %v6405_v8 = vunpack.i.h.bf16 %v6403_v52  ;;  %v6404_v3 = vunpack.i.l.bf16 %v6403_v52  ;;  %3683 = vadd.xlane.f32.xlu0 %v3682_v59  ;;  %v3679_v55 = vsel %vm1245_vm5, %v7328_v5, 0.0 }
 0xf2a   :  { %3680 = vadd.xlane.f32.xlu1 %v3679_v55  ;;  %v6415_v59 = vunpack.i.h.bf16 %v6413_v35 }
 0xf2b   :  { %v7334_v42 = vpop.eup %6536  ;;  %v7336_v2 = vpack.c.bf16 %v6405_v8, %v6404_v3  ;;  %v6414_v8 = vunpack.i.l.bf16 %v6413_v35 }
 0xf2c   :  { %v7338_v9 = vpop.eup %6538  ;;  %v6418_v32 = vpop.permute.xlu0 %6417  ;;  %v3688_v15 = vsel %vm1245_vm5, %v7334_v42, 0.0 }
 0xf2d   :  { %v6420_v28 = vunpack.i.h.bf16 %v6418_v32  ;;  %v6419_v39 = vunpack.i.l.bf16 %v6418_v32  ;;  %3689 = vadd.xlane.f32.xlu0 %v3688_v15  ;;  %6175 = vmatprep.subr.bf16.mxu0 %v7336_v2  ;;  %v3685_v19 = vsel %vm1245_vm5, %v7338_v9, 0.0 }
 0xf2e   :  { %3686 = vadd.xlane.f32.xlu1 %v3685_v19 }
 0xf2f   :  { %v7345_v56 = vpop.eup %6540  ;;  %v7347_v12 = vpack.c.bf16 %v6420_v28, %v6419_v39 }
 0xf30   :  { %v3694_v13 = vsel %vm1245_vm5, %v7345_v56, 0.0 }
 0xf31   :  { %3695 = vadd.xlane.f32.xlu0 %v3694_v13  ;;  %6187 = vmatprep.subr.bf16.mxu1 %v7347_v12 }
 0xf33   :  { %v7352_v10 = vpop.eup %6542 }
 0xf34   :  { %v3700_v31 = vsel %vm1245_vm5, %v7352_v10, 0.0 }
 0xf35   :  { %3701 = vadd.xlane.f32.xlu0 %v3700_v31  ;;  %v6182_v31 = vpack.c.bf16 %v6415_v59, %v6414_v8 }
 0xf4b   :  { %6427 = vrot.lane.b32.xlu0 %v7135_v14, %s6641_s11 }
 0xf56   :  { %v3597_v26 = vpop.xlane.xlu1 %3596 }
 0xf57   :  { %v3619_v27 = vsub.f32 %v7270_v57, %v3597_v26 }
 0xf59   :  { %v3647_v29 = vmul.f32 1.442695, %v3619_v27 }
 0xf5a   :  { %v3603_v20 = vpop.xlane.xlu1 %3602 }
 0xf5b   :  { %6544 = vpow2.f32 %v3647_v29  ;;  %v3621_v36 = vsub.f32 %v7272_v54, %v3603_v20 }
 0xf5d   :  { %v3651_v18 = vmul.f32 1.442695, %v3621_v36 }
 0xf5e   :  { %v6423_v61 = vpop.permute.xlu1 %6422 }
 0xf5f   :  { %6546 = vpow2.f32 %v3651_v18  ;;  %v6425_v26 = vunpack.i.h.bf16 %v6423_v61  ;;  %v6424_v27 = vunpack.i.l.bf16 %v6423_v61 }
 0xf61   :  { %v6190_v36 = vpack.c.bf16 %v6425_v26, %v6424_v27 }
 0xf65   :  { %v7360_v47 = vpop.eup %6544 }
 0xf66   :  { %v3691_v44 = vsel %vm1245_vm5, %v7360_v47, 0.0 }
 0xf67   :  { %3692 = vadd.xlane.f32.xlu1 %v3691_v44 }
 0xf69   :  { %v7364_v38 = vpop.eup %6546 }
 0xf6a   :  { %v3697_v62 = vsel %vm1245_vm5, %v7364_v38, 0.0 }
 0xf6b   :  { %3698 = vadd.xlane.f32.xlu1 %v3697_v62 }
 0xf70   :  { %v3660_v57 = vpop.xlane.xlu0 %3659 }
 0xf71   :  { %6548 = vrcp.f32 %v3660_v57 }
 0xf74   :  { %v3666_v54 = vpop.xlane.xlu0 %3665 }
 0xf75   :  { %6550 = vrcp.f32 %v3666_v54 }
 0xf7b   :  { %v6549_v25 = vpop.eup %6548 }
 0xf7c   :  { %6432 = vrot.lane.b32.xlu1 %v7135_v14, %s6640_s10  ;;  %v3720_v45 = vmul.f32 %v6549_v25, %v3660_v57 }
 0xf7d   :  { %v3672_v1 = vpop.xlane.xlu0 %3671 }
 0xf7e   :  { %v3736_v23 = vsub.f32 2.0, %v3720_v45 }
 0xf7f   :  { %v6551_v11 = vpop.eup %6550 }
 0xf80   :  { %v3722_v37 = vmul.f32 %v6551_v11, %v3666_v54  ;;  %v3752_v7 = vmul.f32 %v6549_v25, %v3736_v23 }
 0xf82   :  { %v3738_v49 = vsub.f32 2.0, %v3722_v37  ;;  %v3768_v15 = vmul.f32 %v7283_v24, %v3752_v7 }
 0xf84   :  { %v3754_v28 = vmul.f32 %v6551_v11, %v3738_v49 }
 0xf8f   :  { %v3657_v63 = vpop.xlane.xlu1 %3656 }
 0xf90   :  { %6552 = vrcp.f32 %v3657_v63 }
 0xf91   :  { %6554 = vrcp.f32 %v3672_v1 }
 0xf93   :  { %v3663_v43 = vpop.xlane.xlu1 %3662 }
 0xf94   :  { %6556 = vrcp.f32 %v3663_v43 }
 0xf97   :  { %v3669_v33 = vpop.xlane.xlu1 %3668 }
 0xf98   :  { %6558 = vrcp.f32 %v3669_v33 }
 0xf9a   :  { %v6553_v46 = vpop.eup %6552 }
 0xf9b   :  { %v6555_v14 = vpop.eup %6554  ;;  %v3719_v30 = vmul.f32 %v6553_v46, %v3657_v63 }
 0xf9c   :  { %v3724_v16 = vmul.f32 %v6555_v14, %v3672_v1 }
 0xf9d   :  { %v3735_v6 = vsub.f32 2.0, %v3719_v30 }
 0xf9e   :  { %v6557_v48 = vpop.eup %6556  ;;  %v3740_v39 = vsub.f32 2.0, %v3724_v16 }
 0xf9f   :  { %v3751_v58 = vmul.f32 %v6553_v46, %v3735_v6  ;;  %v3721_v52 = vmul.f32 %v6557_v48, %v3663_v43 }
 0xfa0   :  { %v3756_v20 = vmul.f32 %v6555_v14, %v3740_v39 }
 0xfa1   :  { %v3767_v3 = vmul.f32 %v7298_v51, %v3751_v58  ;;  %v3737_v55 = vsub.f32 2.0, %v3721_v52  ;;  %v3770_v51 = vmul.f32 %v7287_v60, %v3754_v28 }
 0xfa2   :  { %v6559_v32 = vpop.eup %6558  ;;  %v3772_v44 = vmul.f32 %v7292_v22, %v3756_v20 }
 0xfa3   :  { %v3753_v19 = vmul.f32 %v6557_v48, %v3737_v55  ;;  %v3723_v13 = vmul.f32 %v6559_v32, %v3669_v33  ;;  %5862 = vmatprep.mubr.msk.f32.mxu0 %vm1245_vm5, %v3767_v3 }
 0xfa4   :  { %5863 = vmatmul.mubr.msk.f32.vlgmr.msra.gmra.mrb[44].mxu0 %vm1245_vm5, %v3768_v15 }
 0xfa5   :  { %v3769_v29 = vmul.f32 %v7302_v21, %v3753_v19  ;;  %v3739_v35 = vsub.f32 2.0, %v3723_v13  ;;  %6177 = vmatpush3.bf16.msra.mxu0 %v7336_v2 }
 0xfa6   :  { %6183 = vmatprep.subr.bf16.mxu0 %v6182_v31 }
 0xfa7   :  { %v3755_v24 = vmul.f32 %v6559_v32, %v3739_v35  ;;  %5869 = vmatprep.mubr.msk.f32.mxu0 %vm1245_vm5, %v3769_v29 }
 0xfa8   :  { %5870 = vmatmul.mubr.msk.f32.vlgmr.msra.gmra.mrb[46].mxu0 %vm1245_vm5, %v3770_v51 }
 0xfa9   :  { %v3771_v18 = vmul.f32 %v7306_v4, %v3755_v24  ;;  %6185 = vmatpush3.bf16.msra.mxu0 %v6182_v31 }
 0xfaa   :  { %6191 = vmatprep.subr.bf16.mxu0 %v6190_v36 }
 0xfab   :  { %5876 = vmatprep.mubr.msk.f32.mxu1 %vm1245_vm5, %v3771_v18 }
 0xfac   :  { %5877 = vmatmul.mubr.msk.f32.vlgmr.msra.gmra.mrb[32].mxu1 %vm1245_vm5, %v3772_v44 }
 0xfad   :  { %6189 = vmatpush3.bf16.msra.mxu1 %v7347_v12 }
 0xfae   :  { %v3678_v60 = vpop.xlane.xlu0 %3677 }
 0xfaf   :  { %6560 = vrcp.f32 %v3678_v60  ;;  %v3675_v21 = vpop.xlane.xlu1 %3674 }
 0xfb0   :  { %6562 = vrcp.f32 %v3675_v21 }
 0xfb6   :  { %v3684_v2 = vpop.xlane.xlu0 %3683 }
 0xfb7   :  { %6564 = vrcp.f32 %v3684_v2  ;;  %v3681_v62 = vpop.xlane.xlu1 %3680 }
 0xfb8   :  { %6566 = vrcp.f32 %v3681_v62 }
 0xfb9   :  { %v6561_v57 = vpop.eup %6560 }
 0xfba   :  { %v6563_v4 = vpop.eup %6562  ;;  %v3726_v54 = vmul.f32 %v6561_v57, %v3678_v60  ;;  %v3690_v61 = vpop.xlane.xlu0 %3689 }
 0xfbb   :  { %v3725_v22 = vmul.f32 %v6563_v4, %v3675_v21  ;;  %6568 = vrcp.f32 %v3690_v61  ;;  %v3687_v1 = vpop.xlane.xlu1 %3686 }
 0xfbc   :  { %v3742_v63 = vsub.f32 2.0, %v3726_v54  ;;  %6570 = vrcp.f32 %v3687_v1 }
 0xfbd   :  { %v3741_v25 = vsub.f32 2.0, %v3725_v22 }
 0xfbe   :  { %v3758_v43 = vmul.f32 %v6561_v57, %v3742_v63  ;;  %v3696_v12 = vpop.xlane.xlu0 %3695 }
 0xfbf   :  { %v3757_v45 = vmul.f32 %v6563_v4, %v3741_v25  ;;  %6572 = vrcp.f32 %v3696_v12 }
 0xfc0   :  { %v3774_v23 = vmul.f32 %v7316_v40, %v3758_v43 }
 0xfc1   :  { %v6565_v11 = vpop.eup %6564  ;;  %v3773_v33 = vmul.f32 %v7318_v53, %v3757_v45 }
 0xfc2   :  { %v6567_v46 = vpop.eup %6566  ;;  %v3728_v37 = vmul.f32 %v6565_v11, %v3684_v2  ;;  %v3702_v14 = vpop.xlane.xlu0 %3701 }
 0xfc3   :  { %v3727_v30 = vmul.f32 %v6567_v46, %v3681_v62  ;;  %5883 = vmatprep.mubr.msk.f32.mxu0 %vm1245_vm5, %v3773_v33  ;;  %6574 = vrcp.f32 %v3702_v14  ;;  %v2696_v33 = vld [vmem:[#allocation3 + $0xd8] sm:$0xff] }
 0xfc4   :  { %v3744_v6 = vsub.f32 2.0, %v3728_v37  ;;  %5884 = vmatmul.mubr.msk.f32.vlgmr.msra.gmra.mrb[48].mxu0 %vm1245_vm5, %v3774_v23  ;;  %v2697_v23 = vld [vmem:[#allocation3 + $0xe0] sm:$0xff] }
 0xfc5   :  { %v6569_v48 = vpop.eup %6568  ;;  %v3743_v7 = vsub.f32 2.0, %v3727_v30  ;;  %6193 = vmatpush3.bf16.msra.mxu0 %v6190_v36  ;;  %v6206_v37 = vpack.c.bf16 %v2697_v23, %v2696_v33 }
 0xfc6   :  { %v6571_v49 = vpop.eup %6570  ;;  %v3760_v16 = vmul.f32 %v6565_v11, %v3744_v6  ;;  %v3730_v58 = vmul.f32 %v6569_v48, %v3690_v61  ;;  %v6428_v52 = vpop.permute.xlu0 %6427  ;;  %v2695_v11 = vld [vmem:[#allocation3 + $0xd0] sm:$0xff] }
 0xfc7   :  { %v3759_v59 = vmul.f32 %v6567_v46, %v3743_v7  ;;  %v3729_v53 = vmul.f32 %v6571_v49, %v3687_v1  ;;  %v6430_v8 = vunpack.i.h.bf16 %v6428_v52  ;;  %v6429_v3 = vunpack.i.l.bf16 %v6428_v52 }
 0xfc8   :  { %v3746_v40 = vsub.f32 2.0, %v3730_v58  ;;  %v3776_v28 = vmul.f32 %v7326_v34, %v3760_v16 }
 0xfc9   :  { %v3775_v55 = vmul.f32 %v7328_v5, %v3759_v59  ;;  %v3745_v32 = vsub.f32 2.0, %v3729_v53  ;;  %v6194_v15 = vpack.c.bf16 %v6430_v8, %v6429_v3  ;;  %v6573_v34 = vpop.eup %6572 }
 0xfca   :  { %v3762_v39 = vmul.f32 %v6569_v48, %v3746_v40  ;;  %v3732_v27 = vmul.f32 %v6573_v34, %v3696_v12 }
 0xfcb   :  { %v3761_v19 = vmul.f32 %v6571_v49, %v3745_v32  ;;  %5890 = vmatprep.mubr.msk.f32.mxu1 %vm1245_vm5, %v3775_v55  ;;  %6195 = vmatprep.subr.bf16.mxu1 %v6194_v15 }
 0xfcc   :  { %5891 = vmatmul.mubr.msk.f32.vlgmr.msra.gmra.mrb[34].mxu1 %vm1245_vm5, %v3776_v28  ;;  %v3778_v31 = vmul.f32 %v7334_v42, %v3762_v39  ;;  %v3748_v24 = vsub.f32 2.0, %v3732_v27 }
 0xfcd   :  { %v3777_v13 = vmul.f32 %v7338_v9, %v3761_v19  ;;  %6197 = vmatpush3.bf16.msra.mxu1 %v6194_v15  ;;  %v6575_v29 = vpop.eup %6574 }
 0xfce   :  { %v3734_v36 = vmul.f32 %v6575_v29, %v3702_v14  ;;  %v3764_v21 = vmul.f32 %v6573_v34, %v3748_v24 }
 0xfcf   :  { %5897 = vmatprep.mubr.msk.f32.mxu0 %vm1245_vm5, %v3777_v13 }
 0xfd0   :  { %5898 = vmatmul.mubr.msk.f32.vlgmr.msra.gmra.mrb[50].mxu0 %vm1245_vm5, %v3778_v31  ;;  %v3750_v2 = vsub.f32 2.0, %v3734_v36  ;;  %v3780_v61 = vmul.f32 %v7345_v56, %v3764_v21 }
 0xfd2   :  { %v3766_v22 = vmul.f32 %v6575_v29, %v3750_v2  ;;  %v5321_v29 = vld [vmem:[#allocation3 + $0x149] ss:$0 sm:$0xff] }
 0xfd4   :  { %v3782_v25 = vmul.f32 %v7352_v10, %v3766_v22  ;;  %v2694_v10 = vld [vmem:[#allocation3 + $0xc8] sm:$0xff] }
 0xfd5   :  { %v6202_v46 = vpack.c.bf16 %v2695_v11, %v2694_v10 }
 0xfd7   :  { %6203 = vmatprep.subr.bf16.mxu1 %v6202_v46 }
 0xff4   :  { %v3693_v5 = vpop.xlane.xlu1 %3692 }
 0xff5   :  { %6576 = vrcp.f32 %v3693_v5 }
 0xff8   :  { %v3699_v26 = vpop.xlane.xlu1 %3698 }
 0xff9   :  { %6578 = vrcp.f32 %v3699_v26 }
 0xffc   :  { %v6433_v35 = vpop.permute.xlu1 %6432 }
 0xffd   :  { %v6435_v51 = vunpack.i.h.bf16 %v6433_v35  ;;  %v6434_v20 = vunpack.i.l.bf16 %v6433_v35 }
 0xfff   :  { %v6577_v9 = vpop.eup %6576  ;;  %v6198_v42 = vpack.c.bf16 %v6435_v51, %v6434_v20 }
0x1000   :  { %v3731_v18 = vmul.f32 %v6577_v9, %v3693_v5 }
0x1001   :  { %6199 = vmatprep.subr.bf16.mxu0 %v6198_v42 }
0x1002   :  { %v3747_v44 = vsub.f32 2.0, %v3731_v18  ;;  %6201 = vmatpush3.bf16.msra.mxu0 %v6198_v42 }
0x1003   :  { %v6579_v60 = vpop.eup %6578 }
0x1004   :  { %v3763_v62 = vmul.f32 %v6577_v9, %v3747_v44  ;;  %v3733_v57 = vmul.f32 %v6579_v60, %v3699_v26 }
0x1006   :  { %v3779_v4 = vmul.f32 %v7360_v47, %v3763_v62  ;;  %v3749_v54 = vsub.f32 2.0, %v3733_v57 }
0x1008   :  { %v3765_v1 = vmul.f32 %v6579_v60, %v3749_v54  ;;  %5904 = vmatprep.mubr.msk.f32.mxu1 %vm1245_vm5, %v3779_v4 }
0x1009   :  { %5905 = vmatmul.mubr.msk.f32.vlgmr.msra.gmra.mrb[36].mxu1 %vm1245_vm5, %v3780_v61 }
0x100a   :  { %v3781_v63 = vmul.f32 %v7364_v38, %v3765_v1  ;;  %6205 = vmatpush3.bf16.msra.mxu1 %v6202_v46 }
0x100b   :  { %6207 = vmatprep.subr.bf16.mxu1 %v6206_v37 }
0x100c   :  { %5911 = vmatprep.mubr.msk.f32.mxu0 %vm1245_vm5, %v3781_v63 }
0x100d   :  { %5912 = vmatmul.mubr.msk.f32.vlgmr.msra.gmra.mrb[52].mxu0 %vm1245_vm5, %v3782_v25 }
0x100e   :  { %6209 = vmatpush3.bf16.msra.mxu1 %v6206_v37 }
0x1077   :  { %v5864_v43 = vpop.f32.mrb[44].mxu0 }
0x1078   :  { %3871 = vst.msk [vmem:[#allocation2 + $0x8] sm:$0xff] %vm510_vm3, %v5864_v43  ;;  %v3861_v47 = vpop.f32.mrb[45].mxu0 }
0x1079   :  { %3870 = vst.msk [vmem:[#allocation2] sm:$0xff] %vm510_vm3, %v3861_v47 }
0x107b   :  { %v5871_v56 = vpop.f32.mrb[46].mxu0 }
0x107c   :  { %3963 = vrot.lane.b32.xlu1 %v5871_v56, %s6630_s20  ;;  %v3950_v12 = vpop.f32.mrb[47].mxu0  ;;  %v2699_v56 = vld [vmem:[#allocation3 + $0xf0] sm:$0xff] }
0x107d   :  { %3961 = vrot.lane.b32.xlu0 %v3950_v12, %s6630_s20 }
0x107f   :  { %v5878_v45 = vpop.f32.mrb[32].mxu1 }
0x1080   :  { %v4047_v38 = vpop.f32.mrb[33].mxu1  ;;  %4060 = vrot.lane.b32.xlu1 %v5878_v45, %s6642_s12  ;;  %v2700_v45 = vld [vmem:[#allocation3 + $0xf8] sm:$0xff] }
0x1081   :  { %4058 = vrot.lane.b32.xlu0 %v4047_v38, %s6642_s12  ;;  %v2701_v38 = vld [vmem:[#allocation3 + $0x100] sm:$0xff] }
0x1082   :  { %v6214_v10 = vpack.c.bf16 %v2701_v38, %v2700_v45 }
0x1097   :  { %v5885_v14 = vpop.f32.mrb[48].mxu0 }
0x1098   :  { %4157 = vrot.lane.b32.xlu1 %v5885_v14, %s6643_s13  ;;  %v4144_v30 = vpop.f32.mrb[49].mxu0 }
0x1099   :  { %4155 = vrot.lane.b32.xlu0 %v4144_v30, %s6643_s13 }
0x109f   :  { %v5892_v6 = vpop.f32.mrb[34].mxu1 }
0x10a0   :  { %4251 = vst.msk [vmem:[#allocation2 + $0x18] sm:$0xff] %vm510_vm3, %v5892_v6  ;;  %v4241_v48 = vpop.f32.mrb[35].mxu1 }
0x10a1   :  { %4250 = vst.msk [vmem:[#allocation2 + $0x10] sm:$0xff] %vm510_vm3, %v4241_v48 }
0x10a3   :  { %v5899_v7 = vpop.f32.mrb[50].mxu0 }
0x10a4   :  { %4343 = vrot.lane.b32.xlu1 %v5899_v7, %s6630_s20  ;;  %v4330_v49 = vpop.f32.mrb[51].mxu0 }
0x10a5   :  { %4341 = vrot.lane.b32.xlu0 %v4330_v49, %s6630_s20  ;;  %v2702_v49 = vld [vmem:[#allocation3 + $0x108] sm:$0xff] }
0x10dc   :  { %v5906_v16 = vpop.f32.mrb[36].mxu1 }
0x10dd   :  { %v4427_v58 = vpop.f32.mrb[37].mxu1  ;;  %4440 = vrot.lane.b32.xlu1 %v5906_v16, %s6642_s12  ;;  %v2703_v16 = vld [vmem:[#allocation3 + $0x110] sm:$0xff] }
0x10de   :  { %4438 = vrot.lane.b32.xlu0 %v4427_v58, %s6642_s12  ;;  %v2704_v58 = vld [vmem:[#allocation3 + $0x118] sm:$0xff] }
0x10e0   :  { %v5913_v52 = vpop.f32.mrb[52].mxu0 }
0x10e1   :  { %4537 = vrot.lane.b32.xlu1 %v5913_v52, %s6643_s13  ;;  %v4524_v59 = vpop.f32.mrb[53].mxu0  ;;  %v6218_v52 = vpack.c.bf16 %v2703_v16, %v2702_v49 }
0x10e2   :  { %4535 = vrot.lane.b32.xlu0 %v4524_v59, %s6643_s13  ;;  %v2705_v59 = vld [vmem:[#allocation3 + $0x120] sm:$0xff] }
0x10e3   :  { %6219 = vmatprep.subr.bf16.mxu1 %v6218_v52 }
0x10ee   :  { %v3964_v53 = vpop.permute.xlu1 %3963 }
0x10ef   :  { %3968 = vst.msk [vmem:[#allocation2 + $0x8] sm:$0xff] %vm1654_vm6, %v3964_v53  ;;  %v3962_v8 = vpop.permute.xlu0 %3961  ;;  %v6222_v53 = vpack.c.bf16 %v2705_v59, %v2704_v58 }
0x10f0   :  { %3967 = vst.msk [vmem:[#allocation2] sm:$0xff] %vm1654_vm6, %v3962_v8  ;;  %v2706_v8 = vld [vmem:[#allocation3 + $0x128] sm:$0xff] }
0x10f2   :  { %v4061_v3 = vpop.permute.xlu1 %4060 }
0x10f3   :  { %4065 = vst.msk [vmem:[#allocation2 + $0x8] sm:$0xff] %vm1752_vm7, %v4061_v3  ;;  %v4059_v40 = vpop.permute.xlu0 %4058  ;;  %v2707_v3 = vld [vmem:[#allocation3 + $0x130] sm:$0xff] }
0x10f4   :  { %4064 = vst.msk [vmem:[#allocation2] sm:$0xff] %vm1752_vm7, %v4059_v40  ;;  %v6226_v40 = vpack.c.bf16 %v2707_v3, %v2706_v8 }
0x110a   :  { %v4158_v55 = vpop.permute.xlu1 %4157 }
0x110b   :  { %4162 = vst.msk [vmem:[#allocation2 + $0x8] sm:$0xff] %vm1850_vm8, %v4158_v55  ;;  %v4156_v32 = vpop.permute.xlu0 %4155 }
0x110c   :  { %4161 = vst.msk [vmem:[#allocation2] sm:$0xff] %vm1850_vm8, %v4156_v32 }
0x1112   :  { %v4544_v28 = vld [vmem:[#allocation2 + $0x8] sm:$0xff] }
0x1113   :  { %v4543_v15 = vld [vmem:[#allocation2] sm:$0xff] }
0x1114   :  { %5922 = vmatprep.mubr.msk.f32.mxu1 %vm156_vm2, %v4543_v15 }
0x1115   :  { %5923 = vmatmul.mubr.msk.f32.vlgmr.msra.gmra.mrb[38].mxu1 %vm156_vm2, %v4544_v28 }
0x1116   :  { %v4344_v39 = vpop.permute.xlu1 %4343  ;;  %6221 = vmatpush3.bf16.msra.mxu1 %v6218_v52 }
0x1117   :  { %4348 = vst.msk [vmem:[#allocation2 + $0x18] sm:$0xff] %vm1654_vm6, %v4344_v39  ;;  %v4342_v19 = vpop.permute.xlu0 %4341  ;;  %6223 = vmatprep.subr.bf16.mxu1 %v6222_v53 }
0x1118   :  { %4347 = vst.msk [vmem:[#allocation2 + $0x10] sm:$0xff] %vm1654_vm6, %v4342_v19 }
0x111a   :  { %6225 = vmatpush3.bf16.msra.mxu1 %v6222_v53 }
0x111b   :  { %6227 = vmatprep.subr.bf16.mxu1 %v6226_v40 }
0x111e   :  { %6229 = vmatpush3.bf16.msra.mxu1 %v6226_v40 }
0x114f   :  { %v4441_v13 = vpop.permute.xlu1 %4440 }
0x1150   :  { %4445 = vst.msk [vmem:[#allocation2 + $0x18] sm:$0xff] %vm1752_vm7, %v4441_v13  ;;  %v4439_v31 = vpop.permute.xlu0 %4438 }
0x1151   :  { %4444 = vst.msk [vmem:[#allocation2 + $0x10] sm:$0xff] %vm1752_vm7, %v4439_v31  ;;  %v5326_v31 = vld [vmem:[#allocation3 + $0x14a] ss:$0 sm:$0xff] }
0x1153   :  { %v4538_v5 = vpop.permute.xlu1 %4537 }
0x1154   :  { %4542 = vst.msk [vmem:[#allocation2 + $0x18] sm:$0xff] %vm1850_vm8, %v4538_v5  ;;  %v4536_v34 = vpop.permute.xlu0 %4535 }
0x1155   :  { %4541 = vst.msk [vmem:[#allocation2 + $0x10] sm:$0xff] %vm1850_vm8, %v4536_v34 }
0x115b   :  { %v4546_v27 = vld [vmem:[#allocation2 + $0x18] sm:$0xff] }
0x115c   :  { %v4545_v26 = vld [vmem:[#allocation2 + $0x10] sm:$0xff] }
0x115d   :  { %5925 = vmatprep.mubr.msk.f32.mxu1 %vm156_vm2, %v4545_v26 }
0x115e   :  { %5926 = vmatmul.mubr.msk.f32.gmra.mrb[40].mxu1 %vm156_vm2, %v4546_v27  ;;  %v5327_v27 = vld [vmem:[#allocation3 + $0x14b] ss:$0 sm:$0xff] }
0x11e8   :  { %v5924_v35 = vpop.f32.mrb[38].mxu1 }
0x11e9   :  { %v4635_v51 = vadd.f32 %v5924_v35, %v5321_v29  ;;  %v4629_v20 = vpop.f32.mrb[39].mxu1 }
0x11ea   :  { %v4630_v9 = vadd.f32 %v5321_v29, %v4629_v20 }
0x11eb   :  { %v4649_v24 = vadd.f32 %v4635_v51, %v7103_v41 }
0x11ec   :  { %v4648_v36 = vadd.f32 %v4630_v9, %v7101_v17 }
0x11ed   :  { %v4655_v42 = vsel %vm156_vm2, %v4649_v24, 0.0 }
0x11ee   :  { %4656 = vadd.xlane.f32.xlu1 %v4655_v42  ;;  %v4652_v18 = vsel %vm156_vm2, %v4648_v36, 0.0 }
0x11ef   :  { %4653 = vadd.xlane.f32.xlu0 %v4652_v18 }
0x1231   :  { %v5927_v44 = vpop.f32.mrb[40].mxu1 }
0x1232   :  { %v4639_v60 = vpop.f32.mrb[41].mxu1  ;;  %v4645_v21 = vadd.f32 %v5927_v44, %v5321_v29 }
0x1233   :  { %v4640_v2 = vadd.f32 %v5321_v29, %v4639_v60 }
0x1234   :  { %v4651_v57 = vadd.f32 %v4645_v21, %v7111_v0  ;;  %v2698_v0 = vld [vmem:[#allocation3 + $0xe8] sm:$0xff] }
0x1235   :  { %v4650_v62 = vadd.f32 %v4640_v2, %v7109_v50  ;;  %v6210_v12 = vpack.c.bf16 %v2699_v56, %v2698_v0 }
0x1236   :  { %v4661_v41 = vsel %vm156_vm2, %v4651_v57, 0.0 }
0x1237   :  { %v4658_v4 = vsel %vm156_vm2, %v4650_v62, 0.0  ;;  %6211 = vmatprep.subr.bf16.mxu0 %v6210_v12 }
0x1238   :  { %4659 = vadd.xlane.f32.xlu0 %v4658_v4  ;;  %6213 = vmatpush3.bf16.msra.mxu0 %v6210_v12 }
0x1239   :  { %6215 = vmatprep.subr.bf16.mxu0 %v6214_v10 }
0x123c   :  { %4662 = vadd.xlane.f32.xlu0 %v4661_v41  ;;  %6217 = vmatpush3.bf16.msra.mxu0 %v6214_v10 }
0x127b   :  { %v4657_v17 = vpop.xlane.xlu1 %4656 }
0x127c   :  { %v4665_v54 = vmul.f32 0.03125, %v4657_v17  ;;  %v4654_v61 = vpop.xlane.xlu0 %4653 }
0x127d   :  { %v4664_v22 = vmul.f32 0.03125, %v4654_v61  ;;  %v2709_v61 = vld [vmem:[#allocation3 + $0x140] sm:$0xff] }
0x127e   :  { %v4669_v1 = vsub.f32 %v4649_v24, %v4665_v54  ;;  %v2708_v54 = vld [vmem:[#allocation3 + $0x138] sm:$0xff] }
0x127f   :  { %v4668_v63 = vsub.f32 %v4648_v36, %v4664_v22  ;;  %v6230_v22 = vpack.c.bf16 %v2709_v61, %v2708_v54 }
0x1280   :  { %v4673_v25 = vmul.f32 %v4669_v1, %v4669_v1 }
0x1281   :  { %v4672_v43 = vmul.f32 %v4668_v63, %v4668_v63  ;;  %6231 = vmatprep.subr.bf16.mxu1 %v6230_v22 }
0x1282   :  { %v4679_v47 = vsel %vm156_vm2, %v4673_v25, 0.0  ;;  %6233 = vmatpush3.bf16.msra.mxu1 %v6230_v22 }
0x1283   :  { %4680 = vadd.xlane.f32.xlu0 %v4679_v47  ;;  %v4676_v50 = vsel %vm156_vm2, %v4672_v43, 0.0 }
0x1284   :  { %4677 = vadd.xlane.f32.xlu1 %v4676_v50 }
0x12c5   :  { %v4660_v11 = vpop.xlane.xlu0 %4659 }
0x12c6   :  { %v4666_v33 = vmul.f32 0.03125, %v4660_v11 }
0x12c8   :  { %v4670_v46 = vsub.f32 %v4650_v62, %v4666_v33  ;;  %v5333_v33 = vld [vmem:[#allocation3 + $0x14d] ss:$0 sm:$0xff] }
0x12c9   :  { %v4663_v23 = vpop.xlane.xlu0 %4662 }
0x12ca   :  { %v4667_v37 = vmul.f32 0.03125, %v4663_v23  ;;  %v4674_v14 = vmul.f32 %v4670_v46, %v4670_v46 }
0x12cc   :  { %v4671_v30 = vsub.f32 %v4651_v57, %v4667_v37  ;;  %v4682_v6 = vsel %vm156_vm2, %v4674_v14, 0.0 }
0x12cd   :  { %4683 = vadd.xlane.f32.xlu1 %v4682_v6 }
0x12ce   :  { %v4675_v48 = vmul.f32 %v4671_v30, %v4671_v30 }
0x12d0   :  { %v4685_v7 = vsel %vm156_vm2, %v4675_v48, 0.0 }
0x12d1   :  { %4686 = vadd.xlane.f32.xlu0 %v4685_v7 }
0x1310   :  { %v4681_v55 = vpop.xlane.xlu0 %4680 }
0x1311   :  { %v4689_v32 = vmul.f32 0.03125, %v4681_v55  ;;  %v4678_v15 = vpop.xlane.xlu1 %4677 }
0x1312   :  { %v4688_v28 = vmul.f32 0.03125, %v4678_v15 }
0x1313   :  { %v4693_v39 = vadd.f32 1e-05, %v4689_v32 }
0x1314   :  { %v4692_v19 = vadd.f32 1e-05, %v4688_v28 }
0x1315   :  { %6580 = vrsqrt.f32 %v4693_v39 }
0x1316   :  { %6582 = vrsqrt.f32 %v4692_v19 }
0x131f   :  { %v6581_v13 = vpop.eup %6580 }
0x1320   :  { %v6583_v5 = vpop.eup %6582  ;;  %v4701_v34 = vmul.f32 %v6581_v13, %v4669_v1  ;;  %v5328_v1 = vld [vmem:[#allocation3 + $0x14c] ss:$0 sm:$0xff] }
0x1321   :  { %v4700_v26 = vmul.f32 %v6583_v5, %v4668_v63 }
0x1322   :  { %v4709_v29 = vmul.f32 %v5326_v31, %v4701_v34 }
0x1323   :  { %v4708_v35 = vmul.f32 %v5326_v31, %v4700_v26 }
0x1324   :  { %v4717_v20 = vadd.f32 %v5327_v27, %v4709_v29 }
0x1325   :  { %v4716_v51 = vadd.f32 %v5327_v27, %v4708_v35 }
0x1327   :  { %5936 = vmatprep.mubr.msk.f32.mxu0 %vm156_vm2, %v4716_v51 }
0x1328   :  { %5937 = vmatmul.mubr.msk.f32.vlgmr.msra.gmra.mrb[54].mxu0 %vm156_vm2, %v4717_v20 }
0x135a   :  { %v4684_v9 = vpop.xlane.xlu1 %4683 }
0x135b   :  { %v4690_v24 = vmul.f32 0.03125, %v4684_v9 }
0x135d   :  { %v4694_v36 = vadd.f32 1e-05, %v4690_v24 }
0x135e   :  { %v4687_v42 = vpop.xlane.xlu0 %4686 }
0x135f   :  { %6584 = vrsqrt.f32 %v4694_v36  ;;  %v4691_v18 = vmul.f32 0.03125, %v4687_v42 }
0x1361   :  { %v4695_v44 = vadd.f32 1e-05, %v4691_v18 }
0x1363   :  { %6586 = vrsqrt.f32 %v4695_v44 }
0x1369   :  { %v6585_v60 = vpop.eup %6584 }
0x136a   :  { %v4702_v21 = vmul.f32 %v6585_v60, %v4670_v46 }
0x136c   :  { %v4710_v2 = vmul.f32 %v5326_v31, %v4702_v21 }
0x136d   :  { %v6587_v62 = vpop.eup %6586 }
0x136e   :  { %v4718_v57 = vadd.f32 %v5327_v27, %v4710_v2  ;;  %v4703_v4 = vmul.f32 %v6587_v62, %v4671_v30 }
0x1370   :  { %5939 = vmatprep.mubr.msk.f32.mxu0 %vm156_vm2, %v4718_v57  ;;  %v4711_v41 = vmul.f32 %v5326_v31, %v4703_v4 }
0x1372   :  { %v4719_v17 = vadd.f32 %v5327_v27, %v4711_v41 }
0x1374   :  { %5940 = vmatmul.mubr.msk.f32.gmra.mrb[56].mxu0 %vm156_vm2, %v4719_v17 }
0x13fb   :  { %v5938_v63 = vpop.f32.mrb[54].mxu0 }
0x13fc   :  { %v4808_v25 = vadd.f32 %v5938_v63, %v5328_v1  ;;  %v4802_v43 = vpop.f32.mrb[55].mxu0 }
0x13fd   :  { %v4803_v47 = vadd.f32 %v5328_v1, %v4802_v43 }
0x13fe   :  { %v4822_v0 = vmax.f32 %v4808_v25, 0.0 }
0x13ff   :  { %v4821_v50 = vmax.f32 %v4803_v47, 0.0 }
0x1401   :  { %5958 = vmatprep.mubr.msk.f32.mxu1 %vm2520_vm9, %v4821_v50 }
0x1402   :  { %5959 = vmatmul.mubr.msk.f32.vlgmr.msra.gmra.mrb[42].mxu1 %vm2520_vm9, %v4822_v0 }
0x1447   :  { %v5941_v56 = vpop.f32.mrb[56].mxu0 }
0x1448   :  { %v4818_v12 = vadd.f32 %v5941_v56, %v5328_v1  ;;  %v4812_v45 = vpop.f32.mrb[57].mxu0 }
0x1449   :  { %v4813_v38 = vadd.f32 %v5328_v1, %v4812_v45 }
0x144a   :  { %v4824_v11 = vmax.f32 %v4818_v12, 0.0 }
0x144b   :  { %v4823_v10 = vmax.f32 %v4813_v38, 0.0 }
0x144d   :  { %5961 = vmatprep.mubr.msk.f32.mxu1 %vm2520_vm9, %v4823_v10 }
0x144e   :  { %5962 = vmatmul.mubr.msk.f32.gmra.mrb[44].mxu1 %vm2520_vm9, %v4824_v11 }
0x14d5   :  { %v5960_v46 = vpop.f32.mrb[42].mxu1 }
0x14d6   :  { %v4913_v23 = vadd.f32 %v5960_v46, %v5333_v33  ;;  %v4907_v37 = vpop.f32.mrb[43].mxu1 }
0x14d7   :  { %v4908_v14 = vadd.f32 %v5333_v33, %v4907_v37 }
0x14d8   :  { %v4927_v30 = vadd.f32 %v4913_v23, %v4717_v20 }
0x14d9   :  { %v4926_v6 = vadd.f32 %v4908_v14, %v4716_v51 }
0x14da   :  { %v4933_v48 = vsel %vm156_vm2, %v4927_v30, 0.0 }
0x14db   :  { %4934 = vadd.xlane.f32.xlu0 %v4933_v48  ;;  %v4930_v7 = vsel %vm156_vm2, %v4926_v6, 0.0 }
0x14dc   :  { %4931 = vadd.xlane.f32.xlu1 %v4930_v7 }
0x1521   :  { %v5963_v49 = vpop.f32.mrb[44].mxu1 }
0x1522   :  { %v4923_v16 = vadd.f32 %v5963_v49, %v5333_v33  ;;  %v4917_v58 = vpop.f32.mrb[45].mxu1 }
0x1523   :  { %v4918_v52 = vadd.f32 %v5333_v33, %v4917_v58 }
0x1524   :  { %v4929_v59 = vadd.f32 %v4923_v16, %v4719_v17  ;;  %v5339_v17 = vld [vmem:[#allocation3 + $0x14f] ss:$0 sm:$0xff] }
0x1525   :  { %v4928_v53 = vadd.f32 %v4918_v52, %v4718_v57  ;;  %v5338_v57 = vld [vmem:[#allocation3 + $0x14e] ss:$0 sm:$0xff] }
0x1526   :  { %v4939_v8 = vsel %vm156_vm2, %v4929_v59, 0.0 }
0x1527   :  { %4940 = vadd.xlane.f32.xlu0 %v4939_v8  ;;  %v4936_v3 = vsel %vm156_vm2, %v4928_v53, 0.0 }
0x1528   :  { %4937 = vadd.xlane.f32.xlu1 %v4936_v3 }
0x1568   :  { %v4935_v40 = vpop.xlane.xlu0 %4934 }
0x1569   :  { %v4943_v55 = vmul.f32 0.03125, %v4935_v40  ;;  %v4932_v32 = vpop.xlane.xlu1 %4931  ;;  %v5001_v40 = vld [vmem:[#allocation3 + $0x1a0] sm:$0xff] }
0x156a   :  { %v4942_v15 = vmul.f32 0.03125, %v4932_v32 }
0x156b   :  { %v4947_v28 = vsub.f32 %v4927_v30, %v4943_v55  ;;  %v5002_v55 = vld [vmem:[#allocation3 + $0x1a8] sm:$0xff] }
0x156c   :  { %v4946_v39 = vsub.f32 %v4926_v6, %v4942_v15  ;;  %v6234_v32 = vpack.c.bf16 %v5002_v55, %v5001_v40  ;;  %v5003_v15 = vld [vmem:[#allocation3 + $0x1b0] sm:$0xff] }
0x156d   :  { %v4951_v19 = vmul.f32 %v4947_v28, %v4947_v28 }
0x156e   :  { %v4950_v13 = vmul.f32 %v4946_v39, %v4946_v39  ;;  %6235 = vmatprep.subr.bf16.mxu0 %v6234_v32 }
0x156f   :  { %v4957_v31 = vsel %vm156_vm2, %v4951_v19, 0.0  ;;  %6237 = vmatpush3.bf16.msra.mxu0 %v6234_v32 }
0x1570   :  { %4958 = vadd.xlane.f32.xlu0 %v4957_v31  ;;  %v4954_v5 = vsel %vm156_vm2, %v4950_v13, 0.0 }
0x1571   :  { %4955 = vadd.xlane.f32.xlu1 %v4954_v5 }
0x15b4   :  { %v4941_v34 = vpop.xlane.xlu0 %4940 }
0x15b5   :  { %v4945_v26 = vmul.f32 0.03125, %v4941_v34  ;;  %v4938_v27 = vpop.xlane.xlu1 %4937 }
0x15b6   :  { %v4944_v29 = vmul.f32 0.03125, %v4938_v27 }
0x15b7   :  { %v4949_v35 = vsub.f32 %v4929_v59, %v4945_v26 }
0x15b8   :  { %v4948_v51 = vsub.f32 %v4928_v53, %v4944_v29 }
0x15b9   :  { %v4953_v20 = vmul.f32 %v4949_v35, %v4949_v35 }
0x15ba   :  { %v4952_v9 = vmul.f32 %v4948_v51, %v4948_v51 }
0x15bb   :  { %v4963_v24 = vsel %vm156_vm2, %v4953_v20, 0.0 }
0x15bc   :  { %4964 = vadd.xlane.f32.xlu0 %v4963_v24  ;;  %v4960_v36 = vsel %vm156_vm2, %v4952_v9, 0.0 }
0x15bd   :  { %4961 = vadd.xlane.f32.xlu1 %v4960_v36 }
0x15fd   :  { %v4959_v42 = vpop.xlane.xlu0 %4958 }
0x15fe   :  { %v4967_v18 = vmul.f32 0.03125, %v4959_v42  ;;  %v4956_v44 = vpop.xlane.xlu1 %4955 }
0x15ff   :  { %v4966_v60 = vmul.f32 0.03125, %v4956_v44 }
0x1600   :  { %v4971_v21 = vadd.f32 1e-05, %v4967_v18 }
0x1601   :  { %v4970_v2 = vadd.f32 1e-05, %v4966_v60  ;;  %v5340_v60 = vld [vmem:[#allocation3 + $0x198] ss:$0 sm:$0xff] }
0x1602   :  { %6588 = vrsqrt.f32 %v4971_v21 }
0x1603   :  { %6590 = vrsqrt.f32 %v4970_v2 }
0x160c   :  { %v6589_v62 = vpop.eup %6588 }
0x160d   :  { %v6591_v4 = vpop.eup %6590  ;;  %v4979_v41 = vmul.f32 %v6589_v62, %v4947_v28  ;;  %v5004_v28 = vld [vmem:[#allocation3 + $0x1b8] sm:$0xff] }
0x160e   :  { %v4978_v54 = vmul.f32 %v6591_v4, %v4946_v39  ;;  %v6238_v39 = vpack.c.bf16 %v5004_v28, %v5003_v15 }
0x160f   :  { %v4987_v61 = vmul.f32 %v5338_v57, %v4979_v41 }
0x1610   :  { %v4986_v22 = vmul.f32 %v5338_v57, %v4978_v54  ;;  %6239 = vmatprep.subr.bf16.mxu0 %v6238_v39 }
0x1611   :  { %v4995_v1 = vadd.f32 %v5339_v17, %v4987_v61  ;;  %6241 = vmatpush3.bf16.msra.mxu0 %v6238_v39 }
0x1612   :  { %v4994_v63 = vadd.f32 %v5339_v17, %v4986_v22 }
0x1613   :  { %v5008_v25 = vsel %vm156_vm2, %v4995_v1, 0.0 }
0x1614   :  { %5009 = vadd.xlane.f32.xlu0 %v5008_v25  ;;  %v5005_v43 = vsel %vm156_vm2, %v4994_v63, 0.0 }
0x1615   :  { %5006 = vadd.xlane.f32.xlu1 %v5005_v43 }
0x1649   :  { %v4965_v47 = vpop.xlane.xlu0 %4964 }
0x164a   :  { %v4969_v50 = vmul.f32 0.03125, %v4965_v47  ;;  %v4962_v0 = vpop.xlane.xlu1 %4961 }
0x164b   :  { %v4968_v56 = vmul.f32 0.03125, %v4962_v0 }
0x164c   :  { %v4973_v12 = vadd.f32 1e-05, %v4969_v50 }
0x164d   :  { %v4972_v45 = vadd.f32 1e-05, %v4968_v56 }
0x164e   :  { %6592 = vrsqrt.f32 %v4973_v12 }
0x164f   :  { %6594 = vrsqrt.f32 %v4972_v45 }
0x1658   :  { %v6593_v38 = vpop.eup %6592 }
0x1659   :  { %v6595_v10 = vpop.eup %6594  ;;  %v4981_v11 = vmul.f32 %v6593_v38, %v4949_v35 }
0x165a   :  { %v4980_v33 = vmul.f32 %v6595_v10, %v4948_v51 }
0x165b   :  { %v4989_v46 = vmul.f32 %v5338_v57, %v4981_v11  ;;  %v5342_v11 = vld [vmem:[#allocation3 + $0x19a] ss:$0 sm:$0xff] }
0x165c   :  { %v4988_v23 = vmul.f32 %v5338_v57, %v4980_v33  ;;  %v5341_v57 = vld [vmem:[#allocation3 + $0x199] ss:$0 sm:$0xff] }
0x165d   :  { %v4997_v37 = vadd.f32 %v5339_v17, %v4989_v46 }
0x165e   :  { %v4996_v14 = vadd.f32 %v5339_v17, %v4988_v23 }
0x165f   :  { %v5014_v30 = vsel %vm156_vm2, %v4997_v37, 0.0 }
0x1660   :  { %5015 = vadd.xlane.f32.xlu0 %v5014_v30  ;;  %v5011_v6 = vsel %vm156_vm2, %v4996_v14, 0.0 }
0x1661   :  { %5012 = vadd.xlane.f32.xlu1 %v5011_v6 }
0x16a1   :  { %v5010_v48 = vpop.xlane.xlu0 %5009 }
0x16a2   :  { %v5018_v7 = vmul.f32 0.03125, %v5010_v48  ;;  %v5007_v49 = vpop.xlane.xlu1 %5006 }
0x16a3   :  { %v5017_v16 = vmul.f32 0.03125, %v5007_v49 }
0x16a4   :  { %v5022_v58 = vsub.f32 %v4995_v1, %v5018_v7 }
0x16a5   :  { %v5021_v52 = vsub.f32 %v4994_v63, %v5017_v16 }
0x16a6   :  { %v5026_v59 = vmul.f32 %v5022_v58, %v5022_v58 }
0x16a7   :  { %v5025_v53 = vmul.f32 %v5021_v52, %v5021_v52 }
0x16a8   :  { %v5032_v8 = vsel %vm156_vm2, %v5026_v59, 0.0 }
0x16a9   :  { %5033 = vadd.xlane.f32.xlu0 %v5032_v8  ;;  %v5029_v3 = vsel %vm156_vm2, %v5025_v53, 0.0 }
0x16aa   :  { %5030 = vadd.xlane.f32.xlu1 %v5029_v3 }
0x16ed   :  { %v5016_v19 = vpop.xlane.xlu0 %5015 }
0x16ee   :  { %v5020_v13 = vmul.f32 0.03125, %v5016_v19  ;;  %v5013_v31 = vpop.xlane.xlu1 %5012 }
0x16ef   :  { %v5019_v5 = vmul.f32 0.03125, %v5013_v31 }
0x16f0   :  { %v5024_v34 = vsub.f32 %v4997_v37, %v5020_v13 }
0x16f1   :  { %v5023_v26 = vsub.f32 %v4996_v14, %v5019_v5 }
0x16f2   :  { %v5028_v27 = vmul.f32 %v5024_v34, %v5024_v34 }
0x16f3   :  { %v5027_v29 = vmul.f32 %v5023_v26, %v5023_v26 }
0x16f4   :  { %v5038_v35 = vsel %vm156_vm2, %v5028_v27, 0.0 }
0x16f5   :  { %5039 = vadd.xlane.f32.xlu0 %v5038_v35  ;;  %v5035_v51 = vsel %vm156_vm2, %v5027_v29, 0.0 }
0x16f6   :  { %5036 = vadd.xlane.f32.xlu1 %v5035_v51 }
0x1736   :  { %v5034_v20 = vpop.xlane.xlu0 %5033 }
0x1737   :  { %v5042_v9 = vmul.f32 0.03125, %v5034_v20  ;;  %v5031_v24 = vpop.xlane.xlu1 %5030 }
0x1738   :  { %v5041_v36 = vmul.f32 0.03125, %v5031_v24 }
0x1739   :  { %v5046_v42 = vadd.f32 1e-05, %v5042_v9 }
0x173a   :  { %v5045_v18 = vadd.f32 1e-05, %v5041_v36 }
0x173b   :  { %6596 = vrsqrt.f32 %v5046_v42 }
0x173c   :  { %6598 = vrsqrt.f32 %v5045_v18 }
0x1745   :  { %v6597_v44 = vpop.eup %6596 }
0x1746   :  { %v6599_v21 = vpop.eup %6598  ;;  %v5054_v2 = vmul.f32 %v6597_v44, %v5022_v58 }
0x1747   :  { %v5053_v62 = vmul.f32 %v6599_v21, %v5021_v52 }
0x1748   :  { %v5062_v4 = vmul.f32 %v5340_v60, %v5054_v2 }
0x1749   :  { %v5061_v41 = vmul.f32 %v5340_v60, %v5053_v62 }
0x174a   :  { %v5070_v54 = vadd.f32 %v5341_v57, %v5062_v4 }
0x174b   :  { %v5069_v17 = vadd.f32 %v5341_v57, %v5061_v41 }
0x174d   :  { %5972 = vmatprep.mubr.msk.f32.mxu0 %vm156_vm2, %v5069_v17 }
0x174e   :  { %5973 = vmatmul.mubr.msk.f32.vlgmr.msra.gmra.mrb[58].mxu0 %vm156_vm2, %v5070_v54 }
0x1782   :  { %v5040_v61 = vpop.xlane.xlu0 %5039 }
0x1783   :  { %v5044_v22 = vmul.f32 0.03125, %v5040_v61  ;;  %v5037_v1 = vpop.xlane.xlu1 %5036 }
0x1784   :  { %v5043_v63 = vmul.f32 0.03125, %v5037_v1 }
0x1785   :  { %v5048_v25 = vadd.f32 1e-05, %v5044_v22 }
0x1786   :  { %v5047_v43 = vadd.f32 1e-05, %v5043_v63 }
0x1787   :  { %6600 = vrsqrt.f32 %v5048_v25 }
0x1788   :  { %6602 = vrsqrt.f32 %v5047_v43 }
0x1791   :  { %v6601_v47 = vpop.eup %6600 }
0x1792   :  { %v6603_v50 = vpop.eup %6602  ;;  %v5056_v0 = vmul.f32 %v6601_v47, %v5024_v34 }
0x1793   :  { %v5055_v56 = vmul.f32 %v6603_v50, %v5023_v26 }
0x1794   :  { %v5064_v12 = vmul.f32 %v5340_v60, %v5056_v0 }
0x1795   :  { %v5063_v45 = vmul.f32 %v5340_v60, %v5055_v56 }
0x1796   :  { %v5072_v10 = vadd.f32 %v5341_v57, %v5064_v12 }
0x1797   :  { %v5071_v38 = vadd.f32 %v5341_v57, %v5063_v45 }
0x1799   :  { %5975 = vmatprep.mubr.msk.f32.mxu0 %vm156_vm2, %v5071_v38 }
0x179a   :  { %5976 = vmatmul.mubr.msk.f32.gmra.mrb[60].mxu0 %vm156_vm2, %v5072_v10 }
0x1821   :  { %v5974_v33 = vpop.f32.mrb[58].mxu0 }
0x1822   :  { %v5161_v46 = vadd.f32 %v5974_v33, %v5342_v11  ;;  %v5155_v23 = vpop.f32.mrb[59].mxu0 }
0x1823   :  { %v5156_v37 = vadd.f32 %v5342_v11, %v5155_v23 }
0x1824   :  { %5175 = vst.msk [vmem:[%s7494_s2 + $0x8] sm:$0xff] %vm38_vm1, %v5161_v46 }
0x1825   :  { %5174 = vst.msk [vmem:[%s7494_s2] sm:$0xff] %vm38_vm1, %v5156_v37 }
0x186d   :  { %v5977_v14 = vpop.f32.mrb[60].mxu0 }
0x186e   :  { %v5171_v30 = vadd.f32 %v5977_v14, %v5342_v11  ;;  %v5165_v6 = vpop.f32.mrb[61].mxu0 }
0x186f   :  { %v5166_v48 = vadd.f32 %v5342_v11, %v5165_v6 }
0x1870   :  { %5177 = vst.msk [vmem:[%s7494_s2 + $0x18] sm:$0xff] %vm38_vm1, %v5171_v30 }
0x1871   :  { %5176 = vst.msk [vmem:[%s7494_s2 + $0x10] sm:$0xff] %vm38_vm1, %v5166_v48 }
0x1872   :  { %5182 = vsyncpa [#allocation4], 1 }

</bundles_post_ra>
